<compile_context>
chip_gen: v6e
topology: v6e:2x2x1
jax: 0.10.0
libtpu: 0.0.40
codegen_flags: <defaults>
</compile_context>

<pallas_src>
import functools
import math

import jax
import jax.numpy as jnp
from jax import lax
from jax.experimental import pallas as pl
from jax.experimental.pallas import tpu as pltpu

EPS = 1e-5     # nn.BatchNorm2d default
LANE = 128     # TPU lane width


def _pad_c(c):
    return ((c + LANE - 1) // LANE) * LANE


# ----------------------------------------------------------------------------
# Kernels
# ----------------------------------------------------------------------------
def _conv3x3_kernel(x_ref, s_ref, b_ref, w_ref, y_ref, st_ref, xpad_ref, *, apply_relu):
    # x_ref  : (1, H, W, CIN)   input tile (one image)
    # s_ref  : (1, CIN)         per-channel scale of the *previous* BN (1.0 for stage 1)
    # b_ref  : (1, CIN)         per-channel shift of the *previous* BN (0.0 for stage 1)
    # w_ref  : (9*CIN, COUT)    packed conv taps, bf16
    # y_ref  : (1, H, W, COUT)  raw conv output (pre-BN), f32
    # st_ref : (1, 2, COUT)     per-block partial [sum, sum-of-squares]
    # xpad_ref: (H+2, W+2, CIN) VMEM scratch for the zero halo
    _, H, W, CIN = x_ref.shape
    COUT = w_ref.shape[-1]

    # fused per-channel affine (previous BN) + optional ReLU on the input tile
    v = x_ref[0].astype(jnp.float32) * s_ref[...] + b_ref[...]
    if apply_relu:
        v = jnp.maximum(v, 0.0)

    # zero-padded image assembled in VMEM (no separate HBM pad pass)
    xpad_ref[...] = jnp.zeros(xpad_ref.shape, xpad_ref.dtype)
    xpad_ref[1:H + 1, 1:W + 1, :] = v

    # im2col slab: ONE MXU matmul with K = 9*CIN instead of 9 thin matmuls
    cols = [xpad_ref[dy:dy + H, dx:dx + W, :].reshape(H * W, CIN)
            for dy in range(3) for dx in range(3)]
    patches = jnp.concatenate(cols, axis=-1).astype(jnp.bfloat16)      # (H*W, 9*CIN)
    acc = jnp.dot(patches, w_ref[...], preferred_element_type=jnp.float32)

    # conv bias is skipped: exactly cancelled by the following BN mean-subtraction
    y_ref[0] = acc.reshape(H, W, COUT)

    # partial BN statistics for this block (combined across the grid in the wrapper)
    st_ref[0, 0:1, :] = jnp.sum(acc, axis=0, keepdims=True)
    st_ref[0, 1:2, :] = jnp.sum(acc * acc, axis=0, keepdims=True)


def _deconv2x2_kernel(x_ref, s_ref, b_ref, w_ref, t_ref, st_ref):
    # ConvTranspose2d(k=2, s=2): out[n, 2i+ky, 2j+kx, :] = x[n,i,j,:] @ W[:, :, ky, kx]
    # x_ref : (1, H, W, CIN)    raw stage-1 conv output (pre-BN)
    # s/b   : (1, CIN)          stage-1 BN scale/shift (fused here) + ReLU
    # w_ref : (CIN, 4*COUT)     packed taps, columns [tap0|tap1|tap2|tap3], bf16
    # t_ref : (1, H*W, 4*COUT)  raw deconv output (pre-BN), lane-dense
    # st_ref: (1, 2, COUT)      per-block partial stats over all 4*H*W pixels
    _, H, W, CIN = x_ref.shape
    C4 = w_ref.shape[-1]
    COUT = C4 // 4

    v = jnp.maximum(x_ref[0].astype(jnp.float32) * s_ref[...] + b_ref[...], 0.0)
    v = v.astype(jnp.bfloat16).reshape(H * W, CIN)

    t = jnp.dot(v, w_ref[...], preferred_element_type=jnp.float32)    # (H*W, 4*COUT)
    t_ref[0] = t

    # per-channel stats over the 4 taps (no concatenated copy needed)
    ssum = jnp.zeros((1, COUT), jnp.float32)
    ssq = jnp.zeros((1, COUT), jnp.float32)
    for k in range(4):
        tk = t[:, k * COUT:(k + 1) * COUT]
        ssum = ssum + jnp.sum(tk, axis=0, keepdims=True)
        ssq = ssq + jnp.sum(tk * tk, axis=0, keepdims=True)
    st_ref[0, 0:1, :] = ssum
    st_ref[0, 1:2, :] = ssq


def _bn_relu_kernel(y_ref, s_ref, b_ref, o_ref):
    # y_ref/o_ref: (1, R, C)   raw conv output / normalized+ReLU output
    # s_ref/b_ref: (1, C)      folded BN scale / shift
    o_ref[0] = jnp.maximum(y_ref[0] * s_ref[...] + b_ref[...], 0.0)


# ----------------------------------------------------------------------------
# pallas_call wrappers
# ----------------------------------------------------------------------------
def _conv3x3_pass(x, w_packed, scale, shift, *, apply_relu):
    # x: (N, H, W, Cp_in) f32, w_packed: (9*Cp_in, Cp_out) bf16, scale/shift: (1, Cp_in)
    N, H, W, cp_in = x.shape
    cp_out = w_packed.shape[-1]

    # rough per-step VMEM working set (double-buffered blocks + scratch + im2col)
    ws = (2 * H * W * cp_in * 4 + 2 * H * W * cp_out * 4 + 2 * 9 * cp_in * cp_out * 2
          + (H + 2) * (W + 2) * cp_in * 4 + H * W * 9 * cp_in * 6 + H * W * cp_out * 4)
    vmem_limit = min(int(1.5 * ws) + (2 << 20), 32 << 20)
    flops = 2 * N * H * W * (9 * cp_in) * cp_out
    bytes_acc = x.size * 4 + w_packed.size * 2 + N * H * W * cp_out * 4 + N * 2 * cp_out * 4

    y, st = pl.pallas_call(
        functools.partial(_conv3x3_kernel, apply_relu=apply_relu),
        grid=(N,),
        in_specs=[
            pl.BlockSpec((1, H, W, cp_in), lambda n: (n, 0, 0, 0)),
            pl.BlockSpec((1, cp_in), lambda n: (0, 0)),
            pl.BlockSpec((1, cp_in), lambda n: (0, 0)),
            pl.BlockSpec((9 * cp_in, cp_out), lambda n: (0, 0)),
        ],
        out_specs=[
            pl.BlockSpec((1, H, W, cp_out), lambda n: (n, 0, 0, 0)),
            pl.BlockSpec((1, 2, cp_out), lambda n: (n, 0, 0)),
        ],
        out_shape=[
            jax.ShapeDtypeStruct((N, H, W, cp_out), jnp.float32),
            jax.ShapeDtypeStruct((N, 2, cp_out), jnp.float32),
        ],
        scratch_shapes=[pltpu.VMEM((H + 2, W + 2, cp_in), jnp.float32)],
        compiler_params=pltpu.CompilerParams(
            dimension_semantics=("parallel",), vmem_limit_bytes=vmem_limit),
        cost_estimate=pl.CostEstimate(flops=flops, transcendentals=0,
                                      bytes_accessed=bytes_acc),
    )(x, scale, shift, w_packed)
    return y, st


def _deconv2x2_pass(x, w_packed, scale, shift):
    # x: (N, H, W, Cp_in) f32, w_packed: (Cp_in, 4*Cp_out) bf16
    N, H, W, cp_in = x.shape
    c4 = w_packed.shape[-1]
    cp_out = c4 // 4

    ws = (2 * H * W * cp_in * 4 + 2 * H * W * c4 * 4 + 2 * cp_in * c4 * 2
          + H * W * cp_in * 2 + H * W * c4 * 4)
    vmem_limit = min(int(1.5 * ws) + (2 << 20), 32 << 20)
    flops = 2 * N * H * W * cp_in * c4
    bytes_acc = x.size * 4 + w_packed.size * 2 + N * H * W * c4 * 4 + N * 2 * cp_out * 4

    t, st = pl.pallas_call(
        _deconv2x2_kernel,
        grid=(N,),
        in_specs=[
            pl.BlockSpec((1, H, W, cp_in), lambda n: (n, 0, 0, 0)),
            pl.BlockSpec((1, cp_in), lambda n: (0, 0)),
            pl.BlockSpec((1, cp_in), lambda n: (0, 0)),
            pl.BlockSpec((cp_in, c4), lambda n: (0, 0)),
        ],
        out_specs=[
            pl.BlockSpec((1, H * W, c4), lambda n: (n, 0, 0)),
            pl.BlockSpec((1, 2, cp_out), lambda n: (n, 0, 0)),
        ],
        out_shape=[
            jax.ShapeDtypeStruct((N, H * W, c4), jnp.float32),
            jax.ShapeDtypeStruct((N, 2, cp_out), jnp.float32),
        ],
        compiler_params=pltpu.CompilerParams(
            dimension_semantics=("parallel",), vmem_limit_bytes=vmem_limit),
        cost_estimate=pl.CostEstimate(flops=flops, transcendentals=0,
                                      bytes_accessed=bytes_acc),
    )(x, scale, shift, w_packed)
    return t, st


def _bn_relu_pass(y, scale, shift):
    # y: (N, R, C) raw conv output; scale/shift: (1, C)
    N, R, C = y.shape
    vmem_limit = min(6 * R * C * 4 + (2 << 20), 32 << 20)
    return pl.pallas_call(
        _bn_relu_kernel,
        grid=(N,),
        in_specs=[
            pl.BlockSpec((1, R, C), lambda n: (n, 0, 0)),
            pl.BlockSpec((1, C), lambda n: (0, 0)),
            pl.BlockSpec((1, C), lambda n: (0, 0)),
        ],
        out_specs=pl.BlockSpec((1, R, C), lambda n: (n, 0, 0)),
        out_shape=jax.ShapeDtypeStruct((N, R, C), jnp.float32),
        compiler_params=pltpu.CompilerParams(
            dimension_semantics=("parallel",), vmem_limit_bytes=vmem_limit),
        cost_estimate=pl.CostEstimate(flops=2 * N * R * C, transcendentals=0,
                                      bytes_accessed=2 * N * R * C * 4),
    )(y, scale, shift)


# ----------------------------------------------------------------------------
# Parameter packing / stats folding (tiny O(C) / O(C^2) host-side JAX ops)
# ----------------------------------------------------------------------------
def _pad_vec(v, cp):
    return jnp.zeros((cp,), jnp.float32).at[:v.shape[0]].set(v)


def _pack_conv3x3_weight(w_oihw, cp_in, cp_out):
    # torch Conv2d weight (Cout, Cin, 3, 3) -> (9*Cp_in, Cp_out) bf16, tap k = dy*3+dx
    cout, cin = w_oihw.shape[0], w_oihw.shape[1]
    taps = jnp.transpose(w_oihw, (2, 3, 1, 0)).reshape(9, cin, cout)
    w = jnp.zeros((9, cp_in, cp_out), jnp.float32).at[:, :cin, :cout].set(taps)
    return w.reshape(9 * cp_in, cp_out).astype(jnp.bfloat16)


def _pack_deconv2x2_weight(w_iohw, cp_in, cp_out):
    # torch ConvTranspose2d weight (Cin, Cout, 2, 2) -> (Cp_in, 4*Cp_out) bf16,
    # column blocks ordered k = ky*2 + kx.
    cin, cout = w_iohw.shape[0], w_iohw.shape[1]
    taps = jnp.transpose(w_iohw, (2, 3, 0, 1)).reshape(4, cin, cout)
    w = jnp.zeros((4, cp_in, cp_out), jnp.float32).at[:, :cin, :cout].set(taps)
    return jnp.transpose(w, (1, 0, 2)).reshape(cp_in, 4 * cp_out).astype(jnp.bfloat16)


def _affine_from_stats(partial_stats, gamma_p, beta_p, count):
    # Fold BN (training-mode, biased batch stats) into a per-channel scale/shift.
    # NOTE: E[x^2]-E[x]^2 with f32 sums; fine at these magnitudes/sizes.
    s = jnp.sum(partial_stats, axis=0)               # (2, Cp)
    mean = s[0] / count
    var = s[1] / count - mean * mean
    scale = gamma_p * lax.rsqrt(var + EPS)
    shift = beta_p - mean * scale
    return scale.reshape(1, -1), shift.reshape(1, -1)


# ----------------------------------------------------------------------------
# Full block forward (public API identical to the PyTorch module: NCHW in/out)
# ----------------------------------------------------------------------------
def plain_decoder_block_forward(x_nchw, params, stride):
    N, Cin, H, W = x_nchw.shape
    Cout = params["g2"].shape[0]
    cp_in, cp_out = _pad_c(Cin), _pad_c(Cout)

    # boundary layout: NCHW -> NHWC + lane padding (single small XLA op pair)
    x = jnp.transpose(x_nchw, (0, 2, 3, 1))
    x = jnp.pad(x, ((0, 0), (0, 0), (0, 0), (0, cp_in - Cin)))

    # --- stage 1: conv3x3 (raw) + batch stats ------------------------------
    w1 = _pack_conv3x3_weight(params["w1"], cp_in, cp_in)
    ones = jnp.ones((1, cp_in), jnp.float32)
    zeros = jnp.zeros((1, cp_in), jnp.float32)
    y1, st1 = _conv3x3_pass(x, w1, ones, zeros, apply_relu=False)
    g1, bt1 = _pad_vec(params["g1"], cp_in), _pad_vec(params["bt1"], cp_in)
    scale1, shift1 = _affine_from_stats(st1, g1, bt1, N * H * W)
    # (conv biases b1/b2 are intentionally not applied: cancelled by BN mean-sub)

    g2, bt2 = _pad_vec(params["g2"], cp_out), _pad_vec(params["bt2"], cp_out)

    if stride == 1:
        # --- stage 2: [BN1+ReLU fused] conv3x3 + stats, then BN2+ReLU ------
        w2 = _pack_conv3x3_weight(params["w2"], cp_in, cp_out)
        y2, st2 = _conv3x3_pass(y1, w2, scale1, shift1, apply_relu=True)
        scale2, shift2 = _affine_from_stats(st2, g2, bt2, N * H * W)
        o = _bn_relu_pass(y2.reshape(N, H * W, cp_out), scale2, shift2)
        o = o.reshape(N, H, W, cp_out)
        return jnp.transpose(o, (0, 3, 1, 2))[:, :Cout]
    else:
        # --- stage 2: [BN1+ReLU fused] convT2x2 s2 + stats, then BN2+ReLU --
        w2 = _pack_deconv2x2_weight(params["w2"], cp_in, cp_out)
        t2, st2 = _deconv2x2_pass(y1, w2, scale1, shift1)     # (N, H*W, 4*cp_out)
        scale2, shift2 = _affine_from_stats(st2, g2, bt2, N * H * W * 4)
        o = _bn_relu_pass(t2, jnp.tile(scale2, (1, 4)), jnp.tile(shift2, (1, 4)))
        # interleave taps + NHWC->NCHW + channel un-pad in ONE boundary transpose
        o = o.reshape(N, H, W, 2, 2, cp_out)
        o = jnp.transpose(o, (0, 5, 1, 3, 2, 4))[:, :Cout]
        return o.reshape(N, Cout, 2 * H, 2 * W)


# ----------------------------------------------------------------------------
# Deterministic parameter init (mimics torch's uniform(-1/sqrt(fan_in), ...))
# ----------------------------------------------------------------------------
def init_block_params(key, in_ch, out_ch, stride):
    k1, k2, k3, k4 = jax.random.split(key, 4)
    bound1 = 1.0 / math.sqrt(in_ch * 9)
    params = {
        "w1": jax.random.uniform(k1, (in_ch, in_ch, 3, 3), jnp.float32, -bound1, bound1),
        "b1": jax.random.uniform(k2, (in_ch,), jnp.float32, -bound1, bound1),
        "g1": jnp.ones((in_ch,), jnp.float32),
        "bt1": jnp.zeros((in_ch,), jnp.float32),
        "g2": jnp.ones((out_ch,), jnp.float32),
        "bt2": jnp.zeros((out_ch,), jnp.float32),
    }
    if stride == 1:
        bound2 = 1.0 / math.sqrt(in_ch * 9)
        params["w2"] = jax.random.uniform(k3, (out_ch, in_ch, 3, 3), jnp.float32, -bound2, bound2)
        params["b2"] = jax.random.uniform(k4, (out_ch,), jnp.float32, -bound2, bound2)
    else:
        bound2 = 1.0 / math.sqrt(out_ch * 4)
        params["w2"] = jax.random.uniform(k3, (in_ch, out_ch, 2, 2), jnp.float32, -bound2, bound2)
        params["b2"] = jax.random.uniform(k4, (out_ch,), jnp.float32, -bound2, bound2)
    return params


# ----------------------------------------------------------------------------
# Pure-JAX reference (sanity check; applies biases -> validates cancellation)
# ----------------------------------------------------------------------------
def _ref_bn_relu(y, g, bt):
    mean = y.mean(axis=(0, 1, 2), keepdims=True)
    var = ((y - mean) ** 2).mean(axis=(0, 1, 2), keepdims=True)
    return jnp.maximum((y - mean) * lax.rsqrt(var + EPS) * g + bt, 0.0)


def _ref_conv3x3(x, w_oihw, b):
    N, H, W, Cin = x.shape
    Cout = w_oihw.shape[0]
    xp = jnp.pad(x, ((0, 0), (1, 1), (1, 1), (0, 0)))
    y = jnp.zeros((N, H, W, Cout), jnp.float32)
    for dy in range(3):
        for dx in range(3):
            y = y + jnp.einsum("nhwi,io->nhwo", xp[:, dy:dy + H, dx:dx + W, :],
                               w_oihw[:, :, dy, dx].T, precision="highest")
    return y + b


def _ref_deconv2x2(x, w_iohw, b):
    N, H, W, Cin = x.shape
    Cout = w_iohw.shape[1]
    t = jnp.einsum("nhwi,iokl->nhkwlo", x, w_iohw, precision="highest")
    return t.reshape(N, 2 * H, 2 * W, Cout) + b


def reference_forward(x_nchw, params, stride):
    x = jnp.transpose(x_nchw, (0, 2, 3, 1))
    h = _ref_bn_relu(_ref_conv3x3(x, params["w1"], params["b1"]), params["g1"], params["bt1"])
    if stride == 1:
        y = _ref_bn_relu(_ref_conv3x3(h, params["w2"], params["b2"]), params["g2"], params["bt2"])
    else:
        y = _ref_bn_relu(_ref_deconv2x2(h, params["w2"], params["b2"]), params["g2"], params["bt2"])
    return jnp.transpose(y, (0, 3, 1, 2))


# ----------------------------------------------------------------------------
if __name__ == "__main__":
    key = jax.random.PRNGKey(0)
    kx, kp1, kp2 = jax.random.split(key, 3)

    N, Cin, Cout, H, W = 2, 4, 8, 16, 16
    x = jax.random.normal(kx, (N, Cin, H, W), jnp.float32)      # NCHW, like PyTorch

    fwd = jax.jit(plain_decoder_block_forward, static_argnames=("stride",))

    # stride == 1 path (conv3x3 second stage)
    p1 = init_block_params(kp1, Cin, Cout, stride=1)
    y1 = jax.block_until_ready(fwd(x, p1, stride=1))
    r1 = jax.block_until_ready(reference_forward(x, p1, stride=1))
    assert y1.shape == (N, Cout, H, W), y1.shape
    assert jnp.allclose(y1, r1, rtol=5e-2, atol=5e-2), "stride=1 mismatch"

    # stride != 1 path (ConvTranspose2d 2x2 stride-2 second stage)
    p2 = init_block_params(kp2, Cin, Cout, stride=2)
    y2 = jax.block_until_ready(fwd(x, p2, stride=2))
    r2 = jax.block_until_ready(reference_forward(x, p2, stride=2))
    assert y2.shape == (N, Cout, 2 * H, 2 * W), y2.shape
    assert jnp.allclose(y2, r2, rtol=5e-2, atol=5e-2), "stride=2 mismatch"

    print("KERNEL_OK")
</pallas_src>

<mosaic_0001>
module attributes {stable_mosaic.version = 11 : i64} {
  func.func @_conv3x3_kernel(%arg0: i32, %arg1: memref<1x16x16x128xf32, #tpu.memory_space<vmem>>, %arg2: memref<1x128xf32, #tpu.memory_space<vmem>>, %arg3: memref<1x128xf32, #tpu.memory_space<vmem>>, %arg4: memref<1152x128xbf16, #tpu.memory_space<vmem>>, %arg5: memref<1x16x16x128xf32, #tpu.memory_space<vmem>>, %arg6: memref<1x2x128xf32, #tpu.memory_space<vmem>>, %arg7: memref<18x18x128xf32, #tpu.memory_space<vmem>>) attributes {dimension_semantics = [#tpu.dimension_semantics<parallel>], iteration_bounds = array<i64: 2>, scalar_prefetch = 0 : i64, scratch_operands = 1 : i64, tpu.core_type = #tpu.core_type<tc>, window_params = [{transform_indices = @transform_0, window_bounds = array<i64: 1, 16, 16, 128>}, {pipeline_mode = #tpu.pipeline_mode<synchronous>, transform_indices = @transform_1, window_bounds = array<i64: 1, 128>}, {pipeline_mode = #tpu.pipeline_mode<synchronous>, transform_indices = @transform_2, window_bounds = array<i64: 1, 128>}, {pipeline_mode = #tpu.pipeline_mode<synchronous>, transform_indices = @transform_3, window_bounds = array<i64: 1152, 128>}, {transform_indices = @transform_4, window_bounds = array<i64: 1, 16, 16, 128>}, {transform_indices = @transform_5, window_bounds = array<i64: 1, 2, 128>}]} {
    %c0 = arith.constant 0 : index
    %c0_0 = arith.constant 0 : index
    %c0_1 = arith.constant 0 : index
    %c0_2 = arith.constant 0 : index
    %0 = vector.load %arg1[%c0, %c0_0, %c0_1, %c0_2] : memref<1x16x16x128xf32, #tpu.memory_space<vmem>>, vector<1x16x16x128xf32>
    %1 = vector.shape_cast %0 : vector<1x16x16x128xf32> to vector<16x16x128xf32>
    %c0_3 = arith.constant 0 : index
    %c0_4 = arith.constant 0 : index
    %2 = vector.load %arg2[%c0_3, %c0_4] : memref<1x128xf32, #tpu.memory_space<vmem>>, vector<1x128xf32>
    %3 = vector.shape_cast %2 : vector<1x128xf32> to vector<1x1x128xf32>
    %4 = vector.broadcast %3 : vector<1x1x128xf32> to vector<16x16x128xf32>
    %5 = arith.mulf %1, %4 : vector<16x16x128xf32>
    %c0_5 = arith.constant 0 : index
    %c0_6 = arith.constant 0 : index
    %6 = vector.load %arg3[%c0_5, %c0_6] : memref<1x128xf32, #tpu.memory_space<vmem>>, vector<1x128xf32>
    %7 = vector.shape_cast %6 : vector<1x128xf32> to vector<1x1x128xf32>
    %8 = vector.broadcast %7 : vector<1x1x128xf32> to vector<16x16x128xf32>
    %9 = arith.addf %5, %8 : vector<16x16x128xf32>
    %cst = arith.constant 0.000000e+00 : f32
    %10 = vector.broadcast %cst : f32 to vector<18x18x128xf32>
    %c0_7 = arith.constant 0 : index
    %c0_8 = arith.constant 0 : index
    %c0_9 = arith.constant 0 : index
    %11 = vector.load %arg7[%c0_7, %c0_8, %c0_9] : memref<18x18x128xf32, #tpu.memory_space<vmem>>, vector<18x18x128xf32>
    tpu.vector_store %arg7[%c0_7, %c0_8, %c0_9], %10 {strides = array<i32>} : memref<18x18x128xf32, #tpu.memory_space<vmem>>, vector<18x18x128xf32>,
    %c1 = arith.constant 1 : index
    %c1_10 = arith.constant 1 : index
    %c0_11 = arith.constant 0 : index
    %12 = vector.load %arg7[%c1, %c1_10, %c0_11] : memref<18x18x128xf32, #tpu.memory_space<vmem>>, vector<16x16x128xf32>
    tpu.vector_store %arg7[%c1, %c1_10, %c0_11], %9 {strides = array<i32>} : memref<18x18x128xf32, #tpu.memory_space<vmem>>, vector<16x16x128xf32>,
    %c0_12 = arith.constant 0 : index
    %c0_13 = arith.constant 0 : index
    %c0_14 = arith.constant 0 : index
    %13 = vector.load %arg7[%c0_12, %c0_13, %c0_14] : memref<18x18x128xf32, #tpu.memory_space<vmem>>, vector<16x16x128xf32>
    %14 = vector.shape_cast %13 : vector<16x16x128xf32> to vector<256x128xf32>
    %c0_15 = arith.constant 0 : index
    %c1_16 = arith.constant 1 : index
    %c0_17 = arith.constant 0 : index
    %15 = vector.load %arg7[%c0_15, %c1_16, %c0_17] : memref<18x18x128xf32, #tpu.memory_space<vmem>>, vector<16x16x128xf32>
    %16 = vector.shape_cast %15 : vector<16x16x128xf32> to vector<256x128xf32>
    %c0_18 = arith.constant 0 : index
    %c2 = arith.constant 2 : index
    %c0_19 = arith.constant 0 : index
    %17 = vector.load %arg7[%c0_18, %c2, %c0_19] : memref<18x18x128xf32, #tpu.memory_space<vmem>>, vector<16x16x128xf32>
    %18 = vector.shape_cast %17 : vector<16x16x128xf32> to vector<256x128xf32>
    %c1_20 = arith.constant 1 : index
    %c0_21 = arith.constant 0 : index
    %c0_22 = arith.constant 0 : index
    %19 = vector.load %arg7[%c1_20, %c0_21, %c0_22] : memref<18x18x128xf32, #tpu.memory_space<vmem>>, vector<16x16x128xf32>
    %20 = vector.shape_cast %19 : vector<16x16x128xf32> to vector<256x128xf32>
    %c1_23 = arith.constant 1 : index
    %c1_24 = arith.constant 1 : index
    %c0_25 = arith.constant 0 : index
    %21 = vector.load %arg7[%c1_23, %c1_24, %c0_25] : memref<18x18x128xf32, #tpu.memory_space<vmem>>, vector<16x16x128xf32>
    %22 = vector.shape_cast %21 : vector<16x16x128xf32> to vector<256x128xf32>
    %c1_26 = arith.constant 1 : index
    %c2_27 = arith.constant 2 : index
    %c0_28 = arith.constant 0 : index
    %23 = vector.load %arg7[%c1_26, %c2_27, %c0_28] : memref<18x18x128xf32, #tpu.memory_space<vmem>>, vector<16x16x128xf32>
    %24 = vector.shape_cast %23 : vector<16x16x128xf32> to vector<256x128xf32>
    %c2_29 = arith.constant 2 : index
    %c0_30 = arith.constant 0 : index
    %c0_31 = arith.constant 0 : index
    %25 = vector.load %arg7[%c2_29, %c0_30, %c0_31] : memref<18x18x128xf32, #tpu.memory_space<vmem>>, vector<16x16x128xf32>
    %26 = vector.shape_cast %25 : vector<16x16x128xf32> to vector<256x128xf32>
    %c2_32 = arith.constant 2 : index
    %c1_33 = arith.constant 1 : index
    %c0_34 = arith.constant 0 : index
    %27 = vector.load %arg7[%c2_32, %c1_33, %c0_34] : memref<18x18x128xf32, #tpu.memory_space<vmem>>, vector<16x16x128xf32>
    %28 = vector.shape_cast %27 : vector<16x16x128xf32> to vector<256x128xf32>
    %c2_35 = arith.constant 2 : index
    %c2_36 = arith.constant 2 : index
    %c0_37 = arith.constant 0 : index
    %29 = vector.load %arg7[%c2_35, %c2_36, %c0_37] : memref<18x18x128xf32, #tpu.memory_space<vmem>>, vector<16x16x128xf32>
    %30 = vector.shape_cast %29 : vector<16x16x128xf32> to vector<256x128xf32>
    %31 = tpu.concatenate %14, %16, %18, %20, %22, %24, %26, %28, %30 in 1 : vector<256x128xf32>, vector<256x128xf32>, vector<256x128xf32>, vector<256x128xf32>, vector<256x128xf32>, vector<256x128xf32>, vector<256x128xf32>, vector<256x128xf32>, vector<256x128xf32> -> vector<256x1152xf32>
    %32 = arith.truncf %31 : vector<256x1152xf32> to vector<256x1152xbf16>
    %c0_38 = arith.constant 0 : index
    %c0_39 = arith.constant 0 : index
    %33 = vector.load %arg4[%c0_38, %c0_39] : memref<1152x128xbf16, #tpu.memory_space<vmem>>, vector<1152x128xbf16>
    %cst_40 = arith.constant dense<0.000000e+00> : vector<256x128xf32>
    %34 = tpu.matmul %32, %33, %cst_40 {dimension_numbers = #tpu.dot_dimension_numbers<[1], [0], [0], [1], [0, 0, 1, 1], [], []>} : vector<256x1152xbf16>, vector<1152x128xbf16>, vector<256x128xf32> -> vector<256x128xf32>
    %35 = vector.shape_cast %34 : vector<256x128xf32> to vector<16x16x128xf32>
    %c0_41 = arith.constant 0 : index
    %c0_42 = arith.constant 0 : index
    %c0_43 = arith.constant 0 : index
    %c0_44 = arith.constant 0 : index
    %36 = vector.load %arg5[%c0_41, %c0_42, %c0_43, %c0_44] : memref<1x16x16x128xf32, #tpu.memory_space<vmem>>, vector<1x16x16x128xf32>
    %37 = vector.shape_cast %36 : vector<1x16x16x128xf32> to vector<16x16x128xf32>
    %38 = vector.shape_cast %35 : vector<16x16x128xf32> to vector<1x16x16x128xf32>
    tpu.vector_store %arg5[%c0_41, %c0_42, %c0_43, %c0_44], %38 {strides = array<i32>} : memref<1x16x16x128xf32, #tpu.memory_space<vmem>>, vector<1x16x16x128xf32>,
    %cst_45 = arith.constant dense<0.000000e+00> : vector<128xf32>
    %39 = vector.multi_reduction <add>, %34, %cst_45 [0] : vector<256x128xf32> to vector<128xf32>
    %40 = vector.shape_cast %39 : vector<128xf32> to vector<1x128xf32>
    %c0_46 = arith.constant 0 : index
    %c0_47 = arith.constant 0 : index
    %c0_48 = arith.constant 0 : index
    %41 = vector.load %arg6[%c0_46, %c0_47, %c0_48] : memref<1x2x128xf32, #tpu.memory_space<vmem>>, vector<1x1x128xf32>
    %42 = vector.shape_cast %41 : vector<1x1x128xf32> to vector<1x128xf32>
    %43 = vector.shape_cast %40 : vector<1x128xf32> to vector<1x1x128xf32>
    tpu.vector_store %arg6[%c0_46, %c0_47, %c0_48], %43 {strides = array<i32>} : memref<1x2x128xf32, #tpu.memory_space<vmem>>, vector<1x1x128xf32>,
    %44 = arith.mulf %34, %34 : vector<256x128xf32>
    %cst_49 = arith.constant dense<0.000000e+00> : vector<128xf32>
    %45 = vector.multi_reduction <add>, %44, %cst_49 [0] : vector<256x128xf32> to vector<128xf32>
    %46 = vector.shape_cast %45 : vector<128xf32> to vector<1x128xf32>
    %c0_50 = arith.constant 0 : index
    %c1_51 = arith.constant 1 : index
    %c0_52 = arith.constant 0 : index
    %47 = vector.load %arg6[%c0_50, %c1_51, %c0_52] : memref<1x2x128xf32, #tpu.memory_space<vmem>>, vector<1x1x128xf32>
    %48 = vector.shape_cast %47 : vector<1x1x128xf32> to vector<1x128xf32>
    %49 = vector.shape_cast %46 : vector<1x128xf32> to vector<1x1x128xf32>
    tpu.vector_store %arg6[%c0_50, %c1_51, %c0_52], %49 {strides = array<i32>} : memref<1x2x128xf32, #tpu.memory_space<vmem>>, vector<1x1x128xf32>,
    return
  }
  func.func @transform_0(%arg0: i32) -> (i32, i32, i32, i32) {
    %c0_i32 = arith.constant 0 : i32
    %c0_i32_0 = arith.constant 0 : i32
    %c0_i32_1 = arith.constant 0 : i32
    %c0_i32_2 = arith.constant 0 : i32
    return %arg0, %c0_i32, %c0_i32_0, %c0_i32_1 : i32, i32, i32, i32
  }
  func.func @transform_1(%arg0: i32) -> (i32, i32) {
    %c0_i32 = arith.constant 0 : i32
    %c0_i32_0 = arith.constant 0 : i32
    %c0_i32_1 = arith.constant 0 : i32
    return %c0_i32, %c0_i32_0 : i32, i32
  }
  func.func @transform_2(%arg0: i32) -> (i32, i32) {
    %c0_i32 = arith.constant 0 : i32
    %c0_i32_0 = arith.constant 0 : i32
    %c0_i32_1 = arith.constant 0 : i32
    return %c0_i32, %c0_i32_0 : i32, i32
  }
  func.func @transform_3(%arg0: i32) -> (i32, i32) {
    %c0_i32 = arith.constant 0 : i32
    %c0_i32_0 = arith.constant 0 : i32
    %c0_i32_1 = arith.constant 0 : i32
    return %c0_i32, %c0_i32_0 : i32, i32
  }
  func.func @transform_4(%arg0: i32) -> (i32, i32, i32, i32) {
    %c0_i32 = arith.constant 0 : i32
    %c0_i32_0 = arith.constant 0 : i32
    %c0_i32_1 = arith.constant 0 : i32
    %c0_i32_2 = arith.constant 0 : i32
    return %arg0, %c0_i32, %c0_i32_0, %c0_i32_1 : i32, i32, i32, i32
  }
  func.func @transform_5(%arg0: i32) -> (i32, i32, i32) {
    %c0_i32 = arith.constant 0 : i32
    %c0_i32_0 = arith.constant 0 : i32
    %c0_i32_1 = arith.constant 0 : i32
    return %arg0, %c0_i32, %c0_i32_0 : i32, i32, i32
  }
}

module attributes {stable_mosaic.version = 11 : i64} {
  func.func @_conv3x3_kernel(%arg0: i32, %arg1: memref<1x16x16x128xf32, #tpu.memory_space<vmem>>, %arg2: memref<1x128xf32, #tpu.memory_space<vmem>>, %arg3: memref<1x128xf32, #tpu.memory_space<vmem>>, %arg4: memref<1152x128xbf16, #tpu.memory_space<vmem>>, %arg5: memref<1x16x16x128xf32, #tpu.memory_space<vmem>>, %arg6: memref<1x2x128xf32, #tpu.memory_space<vmem>>, %arg7: memref<18x18x128xf32, #tpu.memory_space<vmem>>) attributes {dimension_semantics = [#tpu.dimension_semantics<parallel>], iteration_bounds = array<i64: 2>, scalar_prefetch = 0 : i64, scratch_operands = 1 : i64, tpu.core_type = #tpu.core_type<tc>, window_params = [{transform_indices = @transform_0, window_bounds = array<i64: 1, 16, 16, 128>}, {pipeline_mode = #tpu.pipeline_mode<synchronous>, transform_indices = @transform_1, window_bounds = array<i64: 1, 128>}, {pipeline_mode = #tpu.pipeline_mode<synchronous>, transform_indices = @transform_2, window_bounds = array<i64: 1, 128>}, {pipeline_mode = #tpu.pipeline_mode<synchronous>, transform_indices = @transform_3, window_bounds = array<i64: 1152, 128>}, {transform_indices = @transform_4, window_bounds = array<i64: 1, 16, 16, 128>}, {transform_indices = @transform_5, window_bounds = array<i64: 1, 2, 128>}]} {
    %c0 = arith.constant 0 : index
    %c0_0 = arith.constant 0 : index
    %c0_1 = arith.constant 0 : index
    %c0_2 = arith.constant 0 : index
    %0 = vector.load %arg1[%c0, %c0_0, %c0_1, %c0_2] : memref<1x16x16x128xf32, #tpu.memory_space<vmem>>, vector<1x16x16x128xf32>
    %1 = vector.shape_cast %0 : vector<1x16x16x128xf32> to vector<16x16x128xf32>
    %c0_3 = arith.constant 0 : index
    %c0_4 = arith.constant 0 : index
    %2 = vector.load %arg2[%c0_3, %c0_4] : memref<1x128xf32, #tpu.memory_space<vmem>>, vector<1x128xf32>
    %3 = vector.shape_cast %2 : vector<1x128xf32> to vector<1x1x128xf32>
    %4 = vector.broadcast %3 : vector<1x1x128xf32> to vector<16x16x128xf32>
    %5 = arith.mulf %1, %4 : vector<16x16x128xf32>
    %c0_5 = arith.constant 0 : index
    %c0_6 = arith.constant 0 : index
    %6 = vector.load %arg3[%c0_5, %c0_6] : memref<1x128xf32, #tpu.memory_space<vmem>>, vector<1x128xf32>
    %7 = vector.shape_cast %6 : vector<1x128xf32> to vector<1x1x128xf32>
    %8 = vector.broadcast %7 : vector<1x1x128xf32> to vector<16x16x128xf32>
    %9 = arith.addf %5, %8 : vector<16x16x128xf32>
    %cst = arith.constant 0.000000e+00 : f32
    %10 = vector.broadcast %cst : f32 to vector<16x16x128xf32>
    %11 = arith.maximumf %9, %10 : vector<16x16x128xf32>
    %cst_7 = arith.constant 0.000000e+00 : f32
    %12 = vector.broadcast %cst_7 : f32 to vector<18x18x128xf32>
    %c0_8 = arith.constant 0 : index
    %c0_9 = arith.constant 0 : index
    %c0_10 = arith.constant 0 : index
    %13 = vector.load %arg7[%c0_8, %c0_9, %c0_10] : memref<18x18x128xf32, #tpu.memory_space<vmem>>, vector<18x18x128xf32>
    tpu.vector_store %arg7[%c0_8, %c0_9, %c0_10], %12 {strides = array<i32>} : memref<18x18x128xf32, #tpu.memory_space<vmem>>, vector<18x18x128xf32>,
    %c1 = arith.constant 1 : index
    %c1_11 = arith.constant 1 : index
    %c0_12 = arith.constant 0 : index
    %14 = vector.load %arg7[%c1, %c1_11, %c0_12] : memref<18x18x128xf32, #tpu.memory_space<vmem>>, vector<16x16x128xf32>
    tpu.vector_store %arg7[%c1, %c1_11, %c0_12], %11 {strides = array<i32>} : memref<18x18x128xf32, #tpu.memory_space<vmem>>, vector<16x16x128xf32>,
    %c0_13 = arith.constant 0 : index
    %c0_14 = arith.constant 0 : index
    %c0_15 = arith.constant 0 : index
    %15 = vector.load %arg7[%c0_13, %c0_14, %c0_15] : memref<18x18x128xf32, #tpu.memory_space<vmem>>, vector<16x16x128xf32>
    %16 = vector.shape_cast %15 : vector<16x16x128xf32> to vector<256x128xf32>
    %c0_16 = arith.constant 0 : index
    %c1_17 = arith.constant 1 : index
    %c0_18 = arith.constant 0 : index
    %17 = vector.load %arg7[%c0_16, %c1_17, %c0_18] : memref<18x18x128xf32, #tpu.memory_space<vmem>>, vector<16x16x128xf32>
    %18 = vector.shape_cast %17 : vector<16x16x128xf32> to vector<256x128xf32>
    %c0_19 = arith.constant 0 : index
    %c2 = arith.constant 2 : index
    %c0_20 = arith.constant 0 : index
    %19 = vector.load %arg7[%c0_19, %c2, %c0_20] : memref<18x18x128xf32, #tpu.memory_space<vmem>>, vector<16x16x128xf32>
    %20 = vector.shape_cast %19 : vector<16x16x128xf32> to vector<256x128xf32>
    %c1_21 = arith.constant 1 : index
    %c0_22 = arith.constant 0 : index
    %c0_23 = arith.constant 0 : index
    %21 = vector.load %arg7[%c1_21, %c0_22, %c0_23] : memref<18x18x128xf32, #tpu.memory_space<vmem>>, vector<16x16x128xf32>
    %22 = vector.shape_cast %21 : vector<16x16x128xf32> to vector<256x128xf32>
    %c1_24 = arith.constant 1 : index
    %c1_25 = arith.constant 1 : index
    %c0_26 = arith.constant 0 : index
    %23 = vector.load %arg7[%c1_24, %c1_25, %c0_26] : memref<18x18x128xf32, #tpu.memory_space<vmem>>, vector<16x16x128xf32>
    %24 = vector.shape_cast %23 : vector<16x16x128xf32> to vector<256x128xf32>
    %c1_27 = arith.constant 1 : index
    %c2_28 = arith.constant 2 : index
    %c0_29 = arith.constant 0 : index
    %25 = vector.load %arg7[%c1_27, %c2_28, %c0_29] : memref<18x18x128xf32, #tpu.memory_space<vmem>>, vector<16x16x128xf32>
    %26 = vector.shape_cast %25 : vector<16x16x128xf32> to vector<256x128xf32>
    %c2_30 = arith.constant 2 : index
    %c0_31 = arith.constant 0 : index
    %c0_32 = arith.constant 0 : index
    %27 = vector.load %arg7[%c2_30, %c0_31, %c0_32] : memref<18x18x128xf32, #tpu.memory_space<vmem>>, vector<16x16x128xf32>
    %28 = vector.shape_cast %27 : vector<16x16x128xf32> to vector<256x128xf32>
    %c2_33 = arith.constant 2 : index
    %c1_34 = arith.constant 1 : index
    %c0_35 = arith.constant 0 : index
    %29 = vector.load %arg7[%c2_33, %c1_34, %c0_35] : memref<18x18x128xf32, #tpu.memory_space<vmem>>, vector<16x16x128xf32>
    %30 = vector.shape_cast %29 : vector<16x16x128xf32> to vector<256x128xf32>
    %c2_36 = arith.constant 2 : index
    %c2_37 = arith.constant 2 : index
    %c0_38 = arith.constant 0 : index
    %31 = vector.load %arg7[%c2_36, %c2_37, %c0_38] : memref<18x18x128xf32, #tpu.memory_space<vmem>>, vector<16x16x128xf32>
    %32 = vector.shape_cast %31 : vector<16x16x128xf32> to vector<256x128xf32>
    %33 = tpu.concatenate %16, %18, %20, %22, %24, %26, %28, %30, %32 in 1 : vector<256x128xf32>, vector<256x128xf32>, vector<256x128xf32>, vector<256x128xf32>, vector<256x128xf32>, vector<256x128xf32>, vector<256x128xf32>, vector<256x128xf32>, vector<256x128xf32> -> vector<256x1152xf32>
    %34 = arith.truncf %33 : vector<256x1152xf32> to vector<256x1152xbf16>
    %c0_39 = arith.constant 0 : index
    %c0_40 = arith.constant 0 : index
    %35 = vector.load %arg4[%c0_39, %c0_40] : memref<1152x128xbf16, #tpu.memory_space<vmem>>, vector<1152x128xbf16>
    %cst_41 = arith.constant dense<0.000000e+00> : vector<256x128xf32>
    %36 = tpu.matmul %34, %35, %cst_41 {dimension_numbers = #tpu.dot_dimension_numbers<[1], [0], [0], [1], [0, 0, 1, 1], [], []>} : vector<256x1152xbf16>, vector<1152x128xbf16>, vector<256x128xf32> -> vector<256x128xf32>
    %37 = vector.shape_cast %36 : vector<256x128xf32> to vector<16x16x128xf32>
    %c0_42 = arith.constant 0 : index
    %c0_43 = arith.constant 0 : index
    %c0_44 = arith.constant 0 : index
    %c0_45 = arith.constant 0 : index
    %38 = vector.load %arg5[%c0_42, %c0_43, %c0_44, %c0_45] : memref<1x16x16x128xf32, #tpu.memory_space<vmem>>, vector<1x16x16x128xf32>
    %39 = vector.shape_cast %38 : vector<1x16x16x128xf32> to vector<16x16x128xf32>
    %40 = vector.shape_cast %37 : vector<16x16x128xf32> to vector<1x16x16x128xf32>
    tpu.vector_store %arg5[%c0_42, %c0_43, %c0_44, %c0_45], %40 {strides = array<i32>} : memref<1x16x16x128xf32, #tpu.memory_space<vmem>>, vector<1x16x16x128xf32>,
    %cst_46 = arith.constant dense<0.000000e+00> : vector<128xf32>
    %41 = vector.multi_reduction <add>, %36, %cst_46 [0] : vector<256x128xf32> to vector<128xf32>
    %42 = vector.shape_cast %41 : vector<128xf32> to vector<1x128xf32>
    %c0_47 = arith.constant 0 : index
    %c0_48 = arith.constant 0 : index
    %c0_49 = arith.constant 0 : index
    %43 = vector.load %arg6[%c0_47, %c0_48, %c0_49] : memref<1x2x128xf32, #tpu.memory_space<vmem>>, vector<1x1x128xf32>
    %44 = vector.shape_cast %43 : vector<1x1x128xf32> to vector<1x128xf32>
    %45 = vector.shape_cast %42 : vector<1x128xf32> to vector<1x1x128xf32>
    tpu.vector_store %arg6[%c0_47, %c0_48, %c0_49], %45 {strides = array<i32>} : memref<1x2x128xf32, #tpu.memory_space<vmem>>, vector<1x1x128xf32>,
    %46 = arith.mulf %36, %36 : vector<256x128xf32>
    %cst_50 = arith.constant dense<0.000000e+00> : vector<128xf32>
    %47 = vector.multi_reduction <add>, %46, %cst_50 [0] : vector<256x128xf32> to vector<128xf32>
    %48 = vector.shape_cast %47 : vector<128xf32> to vector<1x128xf32>
    %c0_51 = arith.constant 0 : index
    %c1_52 = arith.constant 1 : index
    %c0_53 = arith.constant 0 : index
    %49 = vector.load %arg6[%c0_51, %c1_52, %c0_53] : memref<1x2x128xf32, #tpu.memory_space<vmem>>, vector<1x1x128xf32>
    %50 = vector.shape_cast %49 : vector<1x1x128xf32> to vector<1x128xf32>
    %51 = vector.shape_cast %48 : vector<1x128xf32> to vector<1x1x128xf32>
    tpu.vector_store %arg6[%c0_51, %c1_52, %c0_53], %51 {strides = array<i32>} : memref<1x2x128xf32, #tpu.memory_space<vmem>>, vector<1x1x128xf32>,
    return
  }
  func.func @transform_0(%arg0: i32) -> (i32, i32, i32, i32) {
    %c0_i32 = arith.constant 0 : i32
    %c0_i32_0 = arith.constant 0 : i32
    %c0_i32_1 = arith.constant 0 : i32
    %c0_i32_2 = arith.constant 0 : i32
    return %arg0, %c0_i32, %c0_i32_0, %c0_i32_1 : i32, i32, i32, i32
  }
  func.func @transform_1(%arg0: i32) -> (i32, i32) {
    %c0_i32 = arith.constant 0 : i32
    %c0_i32_0 = arith.constant 0 : i32
    %c0_i32_1 = arith.constant 0 : i32
    return %c0_i32, %c0_i32_0 : i32, i32
  }
  func.func @transform_2(%arg0: i32) -> (i32, i32) {
    %c0_i32 = arith.constant 0 : i32
    %c0_i32_0 = arith.constant 0 : i32
    %c0_i32_1 = arith.constant 0 : i32
    return %c0_i32, %c0_i32_0 : i32, i32
  }
  func.func @transform_3(%arg0: i32) -> (i32, i32) {
    %c0_i32 = arith.constant 0 : i32
    %c0_i32_0 = arith.constant 0 : i32
    %c0_i32_1 = arith.constant 0 : i32
    return %c0_i32, %c0_i32_0 : i32, i32
  }
  func.func @transform_4(%arg0: i32) -> (i32, i32, i32, i32) {
    %c0_i32 = arith.constant 0 : i32
    %c0_i32_0 = arith.constant 0 : i32
    %c0_i32_1 = arith.constant 0 : i32
    %c0_i32_2 = arith.constant 0 : i32
    return %arg0, %c0_i32, %c0_i32_0, %c0_i32_1 : i32, i32, i32, i32
  }
  func.func @transform_5(%arg0: i32) -> (i32, i32, i32) {
    %c0_i32 = arith.constant 0 : i32
    %c0_i32_0 = arith.constant 0 : i32
    %c0_i32_1 = arith.constant 0 : i32
    return %arg0, %c0_i32, %c0_i32_0 : i32, i32, i32
  }
}

module attributes {stable_mosaic.version = 11 : i64} {
  func.func @_bn_relu_kernel(%arg0: i32, %arg1: memref<1x256x128xf32, #tpu.memory_space<vmem>>, %arg2: memref<1x128xf32, #tpu.memory_space<vmem>>, %arg3: memref<1x128xf32, #tpu.memory_space<vmem>>, %arg4: memref<1x256x128xf32, #tpu.memory_space<vmem>>) attributes {dimension_semantics = [#tpu.dimension_semantics<parallel>], iteration_bounds = array<i64: 2>, scalar_prefetch = 0 : i64, scratch_operands = 0 : i64, tpu.core_type = #tpu.core_type<tc>, window_params = [{transform_indices = @transform_0, window_bounds = array<i64: 1, 256, 128>}, {pipeline_mode = #tpu.pipeline_mode<synchronous>, transform_indices = @transform_1, window_bounds = array<i64: 1, 128>}, {pipeline_mode = #tpu.pipeline_mode<synchronous>, transform_indices = @transform_2, window_bounds = array<i64: 1, 128>}, {transform_indices = @transform_3, window_bounds = array<i64: 1, 256, 128>}]} {
    %c0 = arith.constant 0 : index
    %c0_0 = arith.constant 0 : index
    %c0_1 = arith.constant 0 : index
    %0 = vector.load %arg1[%c0, %c0_0, %c0_1] : memref<1x256x128xf32, #tpu.memory_space<vmem>>, vector<1x256x128xf32>
    %1 = vector.shape_cast %0 : vector<1x256x128xf32> to vector<256x128xf32>
    %c0_2 = arith.constant 0 : index
    %c0_3 = arith.constant 0 : index
    %2 = vector.load %arg2[%c0_2, %c0_3] : memref<1x128xf32, #tpu.memory_space<vmem>>, vector<1x128xf32>
    %3 = vector.broadcast %2 : vector<1x128xf32> to vector<256x128xf32>
    %4 = arith.mulf %1, %3 : vector<256x128xf32>
    %c0_4 = arith.constant 0 : index
    %c0_5 = arith.constant 0 : index
    %5 = vector.load %arg3[%c0_4, %c0_5] : memref<1x128xf32, #tpu.memory_space<vmem>>, vector<1x128xf32>
    %6 = vector.broadcast %5 : vector<1x128xf32> to vector<256x128xf32>
    %7 = arith.addf %4, %6 : vector<256x128xf32>
    %cst = arith.constant 0.000000e+00 : f32
    %8 = vector.broadcast %cst : f32 to vector<256x128xf32>
    %9 = arith.maximumf %7, %8 : vector<256x128xf32>
    %c0_6 = arith.constant 0 : index
    %c0_7 = arith.constant 0 : index
    %c0_8 = arith.constant 0 : index
    %10 = vector.load %arg4[%c0_6, %c0_7, %c0_8] : memref<1x256x128xf32, #tpu.memory_space<vmem>>, vector<1x256x128xf32>
    %11 = vector.shape_cast %10 : vector<1x256x128xf32> to vector<256x128xf32>
    %12 = vector.shape_cast %9 : vector<256x128xf32> to vector<1x256x128xf32>
    tpu.vector_store %arg4[%c0_6, %c0_7, %c0_8], %12 {strides = array<i32>} : memref<1x256x128xf32, #tpu.memory_space<vmem>>, vector<1x256x128xf32>,
    return
  }
  func.func @transform_0(%arg0: i32) -> (i32, i32, i32) {
    %c0_i32 = arith.constant 0 : i32
    %c0_i32_0 = arith.constant 0 : i32
    %c0_i32_1 = arith.constant 0 : i32
    return %arg0, %c0_i32, %c0_i32_0 : i32, i32, i32
  }
  func.func @transform_1(%arg0: i32) -> (i32, i32) {
    %c0_i32 = arith.constant 0 : i32
    %c0_i32_0 = arith.constant 0 : i32
    %c0_i32_1 = arith.constant 0 : i32
    return %c0_i32, %c0_i32_0 : i32, i32
  }
  func.func @transform_2(%arg0: i32) -> (i32, i32) {
    %c0_i32 = arith.constant 0 : i32
    %c0_i32_0 = arith.constant 0 : i32
    %c0_i32_1 = arith.constant 0 : i32
    return %c0_i32, %c0_i32_0 : i32, i32
  }
  func.func @transform_3(%arg0: i32) -> (i32, i32, i32) {
    %c0_i32 = arith.constant 0 : i32
    %c0_i32_0 = arith.constant 0 : i32
    %c0_i32_1 = arith.constant 0 : i32
    return %arg0, %c0_i32, %c0_i32_0 : i32, i32, i32
  }
}

</mosaic_0001>

<bundles_post_ra>
// kernel: plain_decoder_block_forward.5
= control target key start
LH: loop header
LB: loop body
LE: loop exit
PB: predicated region body
PF: predicated region fallthrough
CT: control target
= control target key end

     0   :  { %s451_s12 = smov 0   ;;  %s610_s0 = inlined_call_operand.vmem [shape: f32[2,256,128], index: 0, kind: input, shape index: {}]   ;;  %s611_s1 = inlined_call_operand.vmem [shape: f32[1,128], index: 1, kind: input, shape index: {}]   ;;  %s612_s2 = inlined_call_operand.vmem [shape: f32[1,128], index: 2, kind: input, shape index: {}]   ;;  %s613_s3 = inlined_call_operand.vmem [shape: f32[2,256,128], index: 3, kind: output, shape index: {}]  }
   0x1 LB: > { %s400_s13 = sadd.s32 4294967295, %s429_s12   ;;  %p404_p0 = scmp.ge.s32.totalorder %s429_s12, 1  ;;  %s429_s12 = sphi %s451_s12, %s13_s12  }
   0x2   : > { %p137_p1 = scmp.lt.s32.totalorder %s429_s12, 3 }
   0x4   : > { %p138_p2 = pnand %p404_p0, %p137_p1 }
   0x5   : > { %p161_p3 = scmp.lt.s32.totalorder (!%p138_p2), %s400_s13, 1 }
   0x6   : > { %141 = sbr.rel (%p138_p2) target bundleno = 44 (0x2c), region = 32 }
   0xb   : > { %s615_s13 = smov (!%p161_p3, %s400_s13), 1  ;;  %v462_v0 = vld [vmem:[%s611_s1] ss:$0 sm:$0xff] }
   0xc   : > { %s413_s14 = sshll.u32 %s615_s13, 8  ;;  %v472_v1 = vld [vmem:[%s612_s2] ss:$0 sm:$0xff] }
   0xd   : > { %s467_s19 = scalar_lea.vmem %s610_s0, %s413_s14  ;;  %s495_s24 = scalar_lea.vmem %s613_s3, %s413_s14 }
   0xe   : > { %v171_v2 = vld [vmem:[%s467_s19] sm:$0xff]  ;;  %v172_v3 = vld [vmem:[%s467_s19 + $0x8] sm:$0xff]  ;;  %v173_v4 = vld [vmem:[%s467_s19 + $0x10] sm:$0xff] }
   0xf   : > { %v210_v5 = vmul.f32 %v462_v0, %v171_v2  ;;  %v211_v6 = vmul.f32 %v462_v0, %v172_v3  ;;  %v212_v7 = vmul.f32 %v462_v0, %v173_v4  ;;  %v174_v8 = vld [vmem:[%s467_s19 + $0x18] sm:$0xff]  ;;  %v175_v9 = vld [vmem:[%s467_s19 + $0x20] sm:$0xff]  ;;  %v176_v10 = vld [vmem:[%s467_s19 + $0x28] sm:$0xff] }
  0x10   : > { %v213_v11 = vmul.f32 %v462_v0, %v174_v8  ;;  %v214_v12 = vmul.f32 %v462_v0, %v175_v9  ;;  %v215_v13 = vmul.f32 %v462_v0, %v176_v10  ;;  %v177_v14 = vld [vmem:[%s467_s19 + $0x30] sm:$0xff]  ;;  %v178_v15 = vld [vmem:[%s467_s19 + $0x38] sm:$0xff]  ;;  %v179_v24 = vld [vmem:[%s467_s19 + $0x40] sm:$0xff] }
  0x11   : > { %v249_v16 = vadd.f32 %v472_v1, %v210_v5  ;;  %v250_v17 = vadd.f32 %v472_v1, %v211_v6  ;;  %v251_v18 = vadd.f32 %v472_v1, %v212_v7  ;;  %v216_v19 = vmul.f32 %v462_v0, %v177_v14  ;;  %v180_v25 = vld [vmem:[%s467_s19 + $0x48] sm:$0xff]  ;;  %v181_v26 = vld [vmem:[%s467_s19 + $0x50] sm:$0xff]  ;;  %v182_v31 = vld [vmem:[%s467_s19 + $0x58] sm:$0xff] }
  0x12   : > { %v252_v20 = vadd.f32 %v472_v1, %v213_v11  ;;  %v253_v21 = vadd.f32 %v472_v1, %v214_v12  ;;  %v254_v22 = vadd.f32 %v472_v1, %v215_v13  ;;  %v217_v23 = vmul.f32 %v462_v0, %v178_v15  ;;  %v183_v32 = vld [vmem:[%s467_s19 + $0x60] sm:$0xff]  ;;  %v184_v33 = vld [vmem:[%s467_s19 + $0x68] sm:$0xff]  ;;  %v185_v38 = vld [vmem:[%s467_s19 + $0x70] sm:$0xff] }
  0x13   : > { %v281_v27 = vmax.f32 %v249_v16, 0.0  ;;  %v282_v28 = vmax.f32 %v250_v17, 0.0  ;;  %v283_v29 = vmax.f32 %v251_v18, 0.0  ;;  %v255_v30 = vadd.f32 %v472_v1, %v216_v19  ;;  %v186_v43 = vld [vmem:[%s467_s19 + $0x78] sm:$0xff]  ;;  %v187_v56 = vld [vmem:[%s467_s19 + $0x80] sm:$0xff]  ;;  %v188_v57 = vld [vmem:[%s467_s19 + $0x88] sm:$0xff] }
  0x14   : > { %v284_v34 = vmax.f32 %v252_v20, 0.0  ;;  %v285_v35 = vmax.f32 %v253_v21, 0.0  ;;  %v286_v36 = vmax.f32 %v254_v22, 0.0  ;;  %v256_v37 = vadd.f32 %v472_v1, %v217_v23  ;;  %v189_v58 = vld [vmem:[%s467_s19 + $0x90] sm:$0xff]  ;;  %v190_v63 = vld [vmem:[%s467_s19 + $0x98] sm:$0xff]  ;;  %v191_v2 = vld [vmem:[%s467_s19 + $0xa0] sm:$0xff] }
  0x15   : > { %313 = vst [vmem:[%s495_s24] sm:$0xff] %v281_v27  ;;  %314 = vst [vmem:[%s495_s24 + $0x8] sm:$0xff] %v282_v28  ;;  %v287_v39 = vmax.f32 %v255_v30, 0.0  ;;  %v218_v40 = vmul.f32 %v462_v0, %v179_v24  ;;  %v219_v41 = vmul.f32 %v462_v0, %v180_v25  ;;  %v220_v42 = vmul.f32 %v462_v0, %v181_v26  ;;  %v192_v3 = vld [vmem:[%s467_s19 + $0xa8] sm:$0xff]  ;;  %v193_v8 = vld [vmem:[%s467_s19 + $0xb0] sm:$0xff] }
  0x16   : > { %315 = vst [vmem:[%s495_s24 + $0x10] sm:$0xff] %v283_v29  ;;  %316 = vst [vmem:[%s495_s24 + $0x18] sm:$0xff] %v284_v34  ;;  %v288_v44 = vmax.f32 %v256_v37, 0.0  ;;  %v221_v45 = vmul.f32 %v462_v0, %v182_v31  ;;  %v222_v46 = vmul.f32 %v462_v0, %v183_v32  ;;  %v223_v47 = vmul.f32 %v462_v0, %v184_v33  ;;  %v194_v13 = vld [vmem:[%s467_s19 + $0xb8] sm:$0xff]  ;;  %v195_v26 = vld [vmem:[%s467_s19 + $0xc0] sm:$0xff] }
  0x17   : > { %317 = vst [vmem:[%s495_s24 + $0x20] sm:$0xff] %v285_v35  ;;  %318 = vst [vmem:[%s495_s24 + $0x28] sm:$0xff] %v286_v36  ;;  %v257_v48 = vadd.f32 %v472_v1, %v218_v40  ;;  %v258_v49 = vadd.f32 %v472_v1, %v219_v41  ;;  %v259_v50 = vadd.f32 %v472_v1, %v220_v42  ;;  %v196_v27 = vld [vmem:[%s467_s19 + $0xc8] sm:$0xff]  ;;  %v197_v28 = vld [vmem:[%s467_s19 + $0xd0] sm:$0xff] }
  0x18   : > { %319 = vst [vmem:[%s495_s24 + $0x30] sm:$0xff] %v287_v39  ;;  %v224_v51 = vmul.f32 %v462_v0, %v185_v38  ;;  %320 = vst [vmem:[%s495_s24 + $0x38] sm:$0xff] %v288_v44  ;;  %v260_v52 = vadd.f32 %v472_v1, %v221_v45  ;;  %v261_v53 = vadd.f32 %v472_v1, %v222_v46  ;;  %v198_v33 = vld [vmem:[%s467_s19 + $0xd8] sm:$0xff]  ;;  %v199_v34 = vld [vmem:[%s467_s19 + $0xe0] sm:$0xff] }
  0x19   : > { %v262_v54 = vadd.f32 %v472_v1, %v223_v47  ;;  %v225_v55 = vmul.f32 %v462_v0, %v186_v43  ;;  %v289_v59 = vmax.f32 %v257_v48, 0.0  ;;  %v290_v60 = vmax.f32 %v258_v49, 0.0  ;;  %v200_v35 = vld [vmem:[%s467_s19 + $0xe8] sm:$0xff]  ;;  %v201_v40 = vld [vmem:[%s467_s19 + $0xf0] sm:$0xff]  ;;  %v202_v45 = vld [vmem:[%s467_s19 + $0xf8] sm:$0xff] }
  0x1a   : > { %v291_v61 = vmax.f32 %v259_v50, 0.0  ;;  %v263_v62 = vadd.f32 %v472_v1, %v224_v51  ;;  %v292_v4 = vmax.f32 %v260_v52, 0.0  ;;  %v293_v5 = vmax.f32 %v261_v53, 0.0 }
  0x1b   : > { %v294_v6 = vmax.f32 %v262_v54, 0.0  ;;  %v264_v7 = vadd.f32 %v472_v1, %v225_v55  ;;  %321 = vst [vmem:[%s495_s24 + $0x40] sm:$0xff] %v289_v59  ;;  %322 = vst [vmem:[%s495_s24 + $0x48] sm:$0xff] %v290_v60  ;;  %v226_v10 = vmul.f32 %v462_v0, %v187_v56  ;;  %v227_v11 = vmul.f32 %v462_v0, %v188_v57 }
  0x1c   : > { %323 = vst [vmem:[%s495_s24 + $0x50] sm:$0xff] %v291_v61  ;;  %v295_v9 = vmax.f32 %v263_v62, 0.0  ;;  %v228_v12 = vmul.f32 %v462_v0, %v189_v58  ;;  %324 = vst [vmem:[%s495_s24 + $0x58] sm:$0xff] %v292_v4  ;;  %v229_v15 = vmul.f32 %v462_v0, %v190_v63  ;;  %v230_v16 = vmul.f32 %v462_v0, %v191_v2 }
  0x1d   : > { %325 = vst [vmem:[%s495_s24 + $0x60] sm:$0xff] %v293_v5  ;;  %326 = vst [vmem:[%s495_s24 + $0x68] sm:$0xff] %v294_v6  ;;  %v296_v14 = vmax.f32 %v264_v7, 0.0  ;;  %v231_v17 = vmul.f32 %v462_v0, %v192_v3  ;;  %v265_v18 = vadd.f32 %v472_v1, %v226_v10  ;;  %v266_v19 = vadd.f32 %v472_v1, %v227_v11 }
  0x1e   : > { %327 = vst [vmem:[%s495_s24 + $0x70] sm:$0xff] %v295_v9  ;;  %v267_v20 = vadd.f32 %v472_v1, %v228_v12  ;;  %v232_v21 = vmul.f32 %v462_v0, %v193_v8  ;;  %v268_v22 = vadd.f32 %v472_v1, %v229_v15  ;;  %v269_v23 = vadd.f32 %v472_v1, %v230_v16 }
  0x1f   : > { %328 = vst [vmem:[%s495_s24 + $0x78] sm:$0xff] %v296_v14  ;;  %v270_v24 = vadd.f32 %v472_v1, %v231_v17  ;;  %v233_v25 = vmul.f32 %v462_v0, %v194_v13  ;;  %v297_v29 = vmax.f32 %v265_v18, 0.0  ;;  %v298_v30 = vmax.f32 %v266_v19, 0.0 }
  0x20   : > { %v299_v31 = vmax.f32 %v267_v20, 0.0  ;;  %v271_v32 = vadd.f32 %v472_v1, %v232_v21  ;;  %v300_v36 = vmax.f32 %v268_v22, 0.0  ;;  %v301_v37 = vmax.f32 %v269_v23, 0.0 }
  0x21   : > { %v302_v38 = vmax.f32 %v270_v24, 0.0  ;;  %v272_v39 = vadd.f32 %v472_v1, %v233_v25  ;;  %329 = vst [vmem:[%s495_s24 + $0x80] sm:$0xff] %v297_v29  ;;  %330 = vst [vmem:[%s495_s24 + $0x88] sm:$0xff] %v298_v30  ;;  %v234_v42 = vmul.f32 %v462_v0, %v195_v26  ;;  %v235_v43 = vmul.f32 %v462_v0, %v196_v27 }
  0x22   : > { %331 = vst [vmem:[%s495_s24 + $0x90] sm:$0xff] %v299_v31  ;;  %v303_v41 = vmax.f32 %v271_v32, 0.0  ;;  %v236_v44 = vmul.f32 %v462_v0, %v197_v28  ;;  %332 = vst [vmem:[%s495_s24 + $0x98] sm:$0xff] %v300_v36  ;;  %v237_v47 = vmul.f32 %v462_v0, %v198_v33  ;;  %v238_v48 = vmul.f32 %v462_v0, %v199_v34 }
  0x23   : > { %333 = vst [vmem:[%s495_s24 + $0xa0] sm:$0xff] %v301_v37  ;;  %334 = vst [vmem:[%s495_s24 + $0xa8] sm:$0xff] %v302_v38  ;;  %v304_v46 = vmax.f32 %v272_v39, 0.0  ;;  %v239_v49 = vmul.f32 %v462_v0, %v200_v35  ;;  %v273_v50 = vadd.f32 %v472_v1, %v234_v42  ;;  %v274_v51 = vadd.f32 %v472_v1, %v235_v43 }
  0x24   : > { %335 = vst [vmem:[%s495_s24 + $0xb0] sm:$0xff] %v303_v41  ;;  %v275_v52 = vadd.f32 %v472_v1, %v236_v44  ;;  %v240_v53 = vmul.f32 %v462_v0, %v201_v40  ;;  %v276_v54 = vadd.f32 %v472_v1, %v237_v47  ;;  %v277_v55 = vadd.f32 %v472_v1, %v238_v48 }
  0x25   : > { %336 = vst [vmem:[%s495_s24 + $0xb8] sm:$0xff] %v304_v46  ;;  %v278_v56 = vadd.f32 %v472_v1, %v239_v49  ;;  %v241_v57 = vmul.f32 %v462_v0, %v202_v45  ;;  %v305_v58 = vmax.f32 %v273_v50, 0.0  ;;  %v306_v59 = vmax.f32 %v274_v51, 0.0 }
  0x26   : > { %v307_v60 = vmax.f32 %v275_v52, 0.0  ;;  %v279_v61 = vadd.f32 %v472_v1, %v240_v53  ;;  %v308_v62 = vmax.f32 %v276_v54, 0.0  ;;  %v309_v63 = vmax.f32 %v277_v55, 0.0 }
  0x27   : > { %v310_v2 = vmax.f32 %v278_v56, 0.0  ;;  %v280_v3 = vadd.f32 %v472_v1, %v241_v57  ;;  %337 = vst [vmem:[%s495_s24 + $0xc0] sm:$0xff] %v305_v58  ;;  %338 = vst [vmem:[%s495_s24 + $0xc8] sm:$0xff] %v306_v59 }
  0x28   : > { %339 = vst [vmem:[%s495_s24 + $0xd0] sm:$0xff] %v307_v60  ;;  %v311_v4 = vmax.f32 %v279_v61, 0.0  ;;  %340 = vst [vmem:[%s495_s24 + $0xd8] sm:$0xff] %v308_v62 }
  0x29   : > { %341 = vst [vmem:[%s495_s24 + $0xe0] sm:$0xff] %v309_v63  ;;  %342 = vst [vmem:[%s495_s24 + $0xe8] sm:$0xff] %v310_v2  ;;  %v312_v0 = vmax.f32 %v280_v3, 0.0 }
  0x2a   : > { %343 = vst [vmem:[%s495_s24 + $0xf0] sm:$0xff] %v311_v4 }
  0x2b   : > { %344 = vst [vmem:[%s495_s24 + $0xf8] sm:$0xff] %v312_v0 }
  0x2c PF: > { %s13_s12 = sadd.s32 1, %s429_s12  }
  0x2d   : > { %p10_p4 = scmp.ge.s32.totalorder %s13_s12, 4  }
  0x2f   :  { %12 = sbr.rel (!%p10_p4) target bundleno = 1 (0x1), region = 62 }

// kernel: plain_decoder_block_forward.3
= control target key start
LH: loop header
LB: loop body
LE: loop exit
PB: predicated region body
PF: predicated region fallthrough
CT: control target
= control target key end

     0   :  { %s3220_s18 = smov 0   ;;  %s4293_s0 = inlined_call_operand.vmem [shape: f32[2,16,16,128], index: 0, kind: input, shape index: {}]   ;;  %s4294_s1 = inlined_call_operand.vmem [shape: f32[1,128], index: 1, kind: input, shape index: {}]   ;;  %s4295_s2 = inlined_call_operand.vmem [shape: f32[1,128], index: 2, kind: input, shape index: {}]   ;;  %s4296_s3 = inlined_call_operand.vmem [shape: bf16[1152,128], index: 3, kind: input, shape index: {}]   ;;  %s4297_s4 = inlined_call_operand.vmem [shape: f32[2,16,16,128], index: 4, kind: output, shape index: {0}]   ;;  %s4298_s5 = inlined_call_operand.vmem [shape: f32[2,2,128], index: 5, kind: output, shape index: {1}]  }
   0x1 LB: > { %s2474_s19 = sadd.s32 4294967295, %s3186_s18   ;;  %p2478_p0 = scmp.ge.s32.totalorder %s3186_s18, 1  ;;  %s3186_s18 = sphi %s3220_s18, %s16_s18  }
   0x2   : > { %p190_p1 = scmp.lt.s32.totalorder %s3186_s18, 3 }
   0x4   : > { %p191_p2 = pnand %p2478_p0, %p190_p1 }
   0x6   : > { %194 = sbr.rel (%p191_p2) target bundleno = 551 (0x227), region = 36 }
   0xb   : > { %v3107_v0 = vld [vmem:[%s4296_s3 + $0x78] sm:$0xff]   ;;  %v3188_v2 = vmov 0.0   ;;  %v3109_v3 = vld [vmem:[%s4296_s3 + $0x70] sm:$0xff]   ;;  %p222_p3 = scmp.lt.s32.totalorder %s2474_s19, 1  ;;  %v3111_v5 = vld [vmem:[%s4296_s3 + $0x68] sm:$0xff]   ;;  %v3189_v60 = vmov 0.0|0.0  }
   0xc   : > { %v3108_v1 = vld [vmem:[%s4296_s3 + $0x38] sm:$0xff]   ;;  %347 = vst [vmem:[#allocation2] sm:$0xff] %v3188_v2  ;;  %348 = vst [vmem:[#allocation2 + $0x8] sm:$0xff] %v3188_v2  ;;  %2562 = vmatprep.subr.bf16.mxu0 %v3107_v0  ;;  %3082 = vmatprep.subr.bf16.mxu1 %v3107_v0  ;;  %v3110_v4 = vld [vmem:[%s4296_s3 + $0x30] sm:$0xff]  }
   0xd   : > { %349 = vst [vmem:[#allocation2 + $0x10] sm:$0x3] %v3188_v2  ;;  %350 = vst [vmem:[#allocation2 + $0x18] sm:$0xff] %v3188_v2  ;;  %2563 = vmatpush3.bf16.msra.mxu0 %v3108_v1  ;;  %3090 = vmatpush3.bf16.msra.mxu1 %v3108_v1  ;;  %s4322_s19 = smov (!%p222_p3, %s2474_s19), 1  ;;  %v3112_v6 = vld [vmem:[%s4296_s3 + $0x28] sm:$0xff]   ;;  %v3113_v7 = vld [vmem:[%s4296_s3 + $0x60] sm:$0xff]  }
   0xe   : > { %351 = vst [vmem:[#allocation2 + $0x20] sm:$0xff] %v3188_v2  ;;  %352 = vst [vmem:[#allocation2 + $0x28] sm:$0x3] %v3188_v2  ;;  %2564 = vmatprep.subr.bf16.mxu0 %v3109_v3  ;;  %3083 = vmatprep.subr.bf16.mxu1 %v3109_v3  ;;  %s2560_s9 = sshll.u32 %s4322_s19, 8  ;;  %v3114_v8 = vld [vmem:[%s4296_s3 + $0x20] sm:$0xff]   ;;  %v3115_v9 = vld [vmem:[%s4296_s3 + $0x58] sm:$0xff]  }
   0xf   : > { %353 = vst [vmem:[#allocation2 + $0x30] sm:$0xff] %v3188_v2  ;;  %354 = vst [vmem:[#allocation2 + $0x38] sm:$0xff] %v3188_v2  ;;  %s3267_s16 = scalar_lea.vmem %s4293_s0, %s2560_s9  ;;  %v3116_v10 = vld [vmem:[%s4296_s3 + $0x18] sm:$0xff]   ;;  %v3117_v11 = vld [vmem:[%s4296_s3 + $0x50] sm:$0xff]   ;;  %s4158_s24 = scalar_lea.vmem %s4297_s4, %s2560_s9 }
  0x10   : > { %355 = vst [vmem:[#allocation2 + $0x40] sm:$0x3] %v3188_v2  ;;  %356 = vst [vmem:[#allocation2 + $0x48] sm:$0xff] %v3188_v2  ;;  %v259_v14 = vld [vmem:[%s3267_s16 + $0xb0] sm:$0xff]  ;;  %v260_v16 = vld [vmem:[%s3267_s16 + $0xb8] sm:$0xff]  ;;  %s2483_s9 = sshll.u32 %s4322_s19, 1 }
  0x11   : > { %357 = vst [vmem:[#allocation2 + $0x50] sm:$0xff] %v3188_v2  ;;  %358 = vst [vmem:[#allocation2 + $0x58] sm:$0x3] %v3188_v2  ;;  %2565 = vmatpush3.bf16.msra.mxu0 %v3110_v4  ;;  %3091 = vmatpush3.bf16.msra.mxu1 %v3110_v4  ;;  %v3280_v17 = vld [vmem:[%s4294_s1] ss:$0 sm:$0xff]  ;;  %v3118_v21 = vld [vmem:[%s4296_s3 + $0x10] sm:$0xff]   ;;  %s235_s27 = scalar_lea.vmem %s4298_s5, %s2483_s9 }
  0x12   : > { %359 = vst [vmem:[#allocation2 + $0x60] sm:$0xff] %v3188_v2  ;;  %360 = vst [vmem:[#allocation2 + $0x68] sm:$0xff] %v3188_v2  ;;  %2566 = vmatprep.subr.bf16.mxu0 %v3111_v5  ;;  %3084 = vmatprep.subr.bf16.mxu1 %v3111_v5  ;;  %v3285_v18 = vld [vmem:[%s4295_s2] ss:$0 sm:$0xff]  ;;  %v298_v19 = vmul.f32 %v3280_v17, %v259_v14  ;;  %v299_v20 = vmul.f32 %v3280_v17, %v260_v16  ;;  %v3119_v22 = vld [vmem:[%s4296_s3 + $0x48] sm:$0xff]  }
  0x13   : > { %361 = vst [vmem:[#allocation2 + $0x70] sm:$0x3] %v3188_v2  ;;  %362 = vst [vmem:[#allocation2 + $0x78] sm:$0xff] %v3188_v2  ;;  %v466_v12 = vld [vmem:[#allocation2 + $0x1] sm:$0xff]  ;;  %v3123_v37 = vld [vmem:[%s4296_s3 + $0xf8] sm:$0xff]  }
  0x14   : > { %363 = vst [vmem:[#allocation2 + $0x80] sm:$0xff] %v3188_v2  ;;  %364 = vst [vmem:[#allocation2 + $0x88] sm:$0x3] %v3188_v2  ;;  %v467_v13 = vld [vmem:[#allocation2 + $0x9] sm:$0xff]  ;;  %v337_v23 = vadd.f32 %v3285_v18, %v298_v19  ;;  %v338_v24 = vadd.f32 %v3285_v18, %v299_v20  ;;  %v3121_v27 = vld [vmem:[%s4296_s3 + $0x40] sm:$0xff]  }
  0x15   : > { %365 = vst [vmem:[#allocation2 + $0x90] sm:$0xff] %v3188_v2  ;;  %366 = vst [vmem:[#allocation2 + $0x98] sm:$0xff] %v3188_v2  ;;  %2567 = vmatpush3.bf16.msra.mxu0 %v3112_v6  ;;  %3092 = vmatpush3.bf16.msra.mxu1 %v3112_v6  ;;  %v724_v15 = vpack.c.bf16 %v467_v13, %v466_v12  ;;  %v3120_v25 = vld [vmem:[%s4296_s3 + $0x8] sm:$0xff]   ;;  %v237_v28 = vld [vmem:[%s3267_s16] sm:$0xff] }
  0x16   : > { %367 = vst [vmem:[#allocation2 + $0xa0] sm:$0x3] %v3188_v2  ;;  %368 = vst [vmem:[#allocation2 + $0xa8] sm:$0xff] %v3188_v2  ;;  %2568 = vmatprep.subr.bf16.mxu0 %v3113_v7  ;;  %3085 = vmatprep.subr.bf16.mxu1 %v3113_v7  ;;  %v832_v26 = vpack.c.bf16 %v338_v24, %v337_v23  ;;  %v238_v29 = vld [vmem:[%s3267_s16 + $0x8] sm:$0xff]  ;;  %v261_v30 = vld [vmem:[%s3267_s16 + $0xc0] sm:$0xff]  ;;  %v276_v31 = vmul.f32 %v3280_v17, %v237_v28 }
  0x17   : > { %369 = vst [vmem:[#allocation2 + $0xb0] sm:$0xff] %v3188_v2  ;;  %370 = vst [vmem:[#allocation2 + $0xb8] sm:$0x3] %v3188_v2  ;;  %1475 = vmatprep.mubr.bf16.mxu0 %v724_v15  ;;  %v277_v32 = vmul.f32 %v3280_v17, %v238_v29  ;;  %v262_v33 = vld [vmem:[%s3267_s16 + $0xc8] sm:$0xff]  ;;  %v300_v34 = vmul.f32 %v3280_v17, %v261_v30  ;;  %v3122_v35 = vld [vmem:[%s4296_s3] sm:$0xff]  }
  0x18   : > { %371 = vst [vmem:[#allocation2 + $0xc0] sm:$0xff] %v3188_v2  ;;  %372 = vst [vmem:[#allocation2 + $0xc8] sm:$0xff] %v3188_v2  ;;  %1571 = vmatprep.mubr.bf16.mxu1 %v832_v26  ;;  %v301_v36 = vmul.f32 %v3280_v17, %v262_v33  ;;  %v315_v38 = vadd.f32 %v3285_v18, %v276_v31  ;;  %v3124_v41 = vld [vmem:[%s4296_s3 + $0x178] sm:$0xff]   ;;  %v3127_v48 = vld [vmem:[%s4296_s3 + $0xf0] sm:$0xff]  }
  0x19   : > { %373 = vst [vmem:[#allocation2 + $0xd0] sm:$0x3] %v3188_v2  ;;  %374 = vst [vmem:[#allocation2 + $0xd8] sm:$0xff] %v3188_v2  ;;  %2569 = vmatpush3.bf16.msra.mxu0 %v3114_v8  ;;  %3093 = vmatpush3.bf16.msra.mxu1 %v3114_v8  ;;  %v316_v39 = vadd.f32 %v3285_v18, %v277_v32  ;;  %v339_v40 = vadd.f32 %v3285_v18, %v300_v34  ;;  %v3125_v45 = vld [vmem:[%s4296_s3 + $0xb8] sm:$0xff]   ;;  %v3132_v49 = vld [vmem:[%s4296_s3 + $0x170] sm:$0xff]  }
  0x1a   : > { %375 = vst [vmem:[#allocation2 + $0xe0] sm:$0xff] %v3188_v2  ;;  %376 = vst [vmem:[#allocation2 + $0xe8] sm:$0x3] %v3188_v2  ;;  %2570 = vmatprep.subr.bf16.mxu0 %v3115_v9  ;;  %3086 = vmatprep.subr.bf16.mxu1 %v3115_v9  ;;  %v340_v42 = vadd.f32 %v3285_v18, %v301_v36  ;;  %v3126_v46 = vld [vmem:[%s4296_s3 + $0x138] sm:$0xff]   ;;  %v239_v51 = vld [vmem:[%s3267_s16 + $0x10] sm:$0xff] }
  0x1b   : > { %377 = vst [vmem:[#allocation2 + $0xf0] sm:$0xff] %v3188_v2  ;;  %378 = vst [vmem:[#allocation2 + $0xf8] sm:$0xff] %v3188_v2  ;;  %v3336_v50 = vpack.c.bf16 %v316_v39, %v315_v38  ;;  %v240_v52 = vld [vmem:[%s3267_s16 + $0x18] sm:$0xff]  ;;  %v263_v53 = vld [vmem:[%s3267_s16 + $0xd0] sm:$0xff]  ;;  %v278_v56 = vmul.f32 %v3280_v17, %v239_v51 }
  0x1c   : > { %379 = vst [vmem:[#allocation2 + $0x100] sm:$0x3] %v3188_v2  ;;  %380 = vst [vmem:[#allocation2 + $0x108] sm:$0xff] %v3188_v2  ;;  %v3128_v54 = vld [vmem:[%s4296_s3 + $0xb0] sm:$0xff]   ;;  %v841_v55 = vpack.c.bf16 %v340_v42, %v339_v40  ;;  %v279_v57 = vmul.f32 %v3280_v17, %v240_v52  ;;  %v264_v58 = vld [vmem:[%s3267_s16 + $0xd8] sm:$0xff]  ;;  %v302_v59 = vmul.f32 %v3280_v17, %v263_v53 }
  0x1d   : > { %381 = vst [vmem:[#allocation2 + $0x110] sm:$0xff] %v3188_v2  ;;  %382 = vst [vmem:[#allocation2 + $0x118] sm:$0x3] %v3188_v2  ;;  %2571 = vmatpush3.bf16.msra.mxu0 %v3116_v10  ;;  %3094 = vmatpush3.bf16.msra.mxu1 %v3116_v10  ;;  %v3129_v61 = vld [vmem:[%s4296_s3 + $0xe8] sm:$0xff]   ;;  %v303_v62 = vmul.f32 %v3280_v17, %v264_v58  ;;  %v3134_v63 = vld [vmem:[%s4296_s3 + $0x130] sm:$0xff]   ;;  %v317_v0 = vadd.f32 %v3285_v18, %v278_v56 }
  0x1e   : > { %383 = vst [vmem:[#allocation2 + $0x120] sm:$0xff] %v3188_v2  ;;  %384 = vst [vmem:[#allocation2 + $0x128] sm:$0xff] %v3188_v2  ;;  %2572 = vmatprep.subr.bf16.mxu0 %v3117_v11  ;;  %3087 = vmatprep.subr.bf16.mxu1 %v3117_v11  ;;  %v318_v1 = vadd.f32 %v3285_v18, %v279_v57  ;;  %v3130_v10 = vld [vmem:[%s4296_s3 + $0xa8] sm:$0xff]   ;;  %v241_v11 = vld [vmem:[%s3267_s16 + $0x20] sm:$0xff] }
  0x1f   : > { %385 = vst [vmem:[#allocation2 + $0x130] sm:$0x3] %v3188_v2  ;;  %386 = vst [vmem:[#allocation2 + $0x138] sm:$0xff] %v3188_v2  ;;  %v342_v6 = vadd.f32 %v3285_v18, %v303_v62  ;;  %v242_v13 = vld [vmem:[%s3267_s16 + $0x28] sm:$0xff]  ;;  %v280_v14 = vmul.f32 %v3280_v17, %v241_v11  ;;  %v265_v15 = vld [vmem:[%s3267_s16 + $0xe0] sm:$0xff] }
  0x20   : > { %387 = vst [vmem:[#allocation2 + $0x140] sm:$0xff] %v3188_v2  ;;  %388 = vst [vmem:[#allocation2 + $0x148] sm:$0x3] %v3188_v2  ;;  %v3368_v12 = vpack.c.bf16 %v318_v1, %v317_v0  ;;  %v266_v16 = vld [vmem:[%s3267_s16 + $0xe8] sm:$0xff]  ;;  %v3131_v19 = vld [vmem:[%s4296_s3 + $0xe0] sm:$0xff]  }
  0x21   : > { %389 = vst [vmem:[#allocation2 + $0x150] sm:$0xff] %v3188_v2  ;;  %390 = vst [vmem:[#allocation2 + $0x158] sm:$0xff] %v3188_v2  ;;  %2573 = vmatpush3.bf16.msra.mxu0 %v3118_v21  ;;  %3095 = vmatpush3.bf16.msra.mxu1 %v3118_v21  ;;  %v281_v21 = vmul.f32 %v3280_v17, %v242_v13  ;;  %v3140_v26 = vld [vmem:[%s4296_s3 + $0x168] sm:$0xff]   ;;  %v3148_v56 = vld [vmem:[%s4296_s3 + $0x120] sm:$0xff]  }
  0x22   : > { %391 = vst [vmem:[#allocation2 + $0x160] sm:$0x3] %v3188_v2  ;;  %392 = vst [vmem:[#allocation2 + $0x168] sm:$0xff] %v3188_v2  ;;  %2574 = vmatprep.subr.bf16.mxu0 %v3119_v22  ;;  %3088 = vmatprep.subr.bf16.mxu1 %v3119_v22  ;;  %v304_v22 = vmul.f32 %v3280_v17, %v265_v15  ;;  %v3142_v31 = vld [vmem:[%s4296_s3 + $0x128] sm:$0xff]   ;;  %v3145_v15 = vld [vmem:[%s4296_s3 + $0x1f8] sm:$0xff]  }
  0x23   : > { %393 = vst [vmem:[#allocation2 + $0x170] sm:$0xff] %v3188_v2  ;;  %394 = vst [vmem:[#allocation2 + $0x178] sm:$0x3] %v3188_v2  ;;  %v320_v28 = vadd.f32 %v3285_v18, %v281_v21 }
  0x24   : > { %395 = vst [vmem:[#allocation2 + $0x180] sm:$0xff] %v3188_v2  ;;  %396 = vst [vmem:[#allocation2 + $0x188] sm:$0xff] %v3188_v2  ;;  %v343_v29 = vadd.f32 %v3285_v18, %v304_v22  ;;  %v3151_v22 = vld [vmem:[%s4296_s3 + $0x118] sm:$0xff]  }
  0x25   : > { %397 = vst [vmem:[#allocation2 + $0x190] sm:$0x3] %v3188_v2  ;;  %398 = vst [vmem:[#allocation2 + $0x198] sm:$0xff] %v3188_v2  ;;  %2575 = vmatpush3.bf16.msra.mxu0 %v3120_v25  ;;  %3096 = vmatpush3.bf16.msra.mxu1 %v3120_v25  ;;  %v319_v25 = vadd.f32 %v3285_v18, %v280_v14  ;;  %v3149_v14 = vld [vmem:[%s4296_s3 + $0x158] sm:$0xff]  }
  0x26   : > { %399 = vst [vmem:[#allocation2 + $0x1a0] sm:$0xff] %v3188_v2  ;;  %400 = vst [vmem:[#allocation2 + $0x1a8] sm:$0x3] %v3188_v2  ;;  %2576 = vmatprep.subr.bf16.mxu0 %v3121_v27  ;;  %3089 = vmatprep.subr.bf16.mxu1 %v3121_v27  ;;  %v341_v2 = vadd.f32 %v3285_v18, %v302_v59  ;;  %v3135_v27 = vld [vmem:[%s4296_s3 + $0xd8] sm:$0xff]   ;;  %v245_v59 = vld [vmem:[%s3267_s16 + $0x40] sm:$0xff] }
  0x27   : > { %424 = vst [vmem:[#allocation2 + $0x121] sm:$0xff] %v337_v23  ;;  %425 = vst [vmem:[#allocation2 + $0x129] sm:$0xff] %v338_v24  ;;  %v305_v23 = vmul.f32 %v3280_v17, %v266_v16  ;;  %v3133_v24 = vld [vmem:[%s4296_s3 + $0xa0] sm:$0xff]  }
  0x28   : > { %402 = vst [vmem:[#allocation2 + $0x19] sm:$0xff] %v315_v38  ;;  %403 = vst [vmem:[#allocation2 + $0x21] sm:$0xff] %v316_v39  ;;  %v850_v20 = vpack.c.bf16 %v342_v6, %v341_v2  ;;  %v3136_v38 = vld [vmem:[%s4296_s3 + $0x98] sm:$0xff]   ;;  %v3406_v39 = vpack.c.bf16 %v320_v28, %v319_v25 }
  0x29   : > { %426 = vst [vmem:[#allocation2 + $0x139] sm:$0xff] %v339_v40  ;;  %427 = vst [vmem:[#allocation2 + $0x141] sm:$0xff] %v340_v42  ;;  %2577 = vmatpush3.bf16.msra.mxu0 %v3122_v35  ;;  %3097 = vmatpush3.bf16.msra.mxu1 %v3122_v35  ;;  %v344_v30 = vadd.f32 %v3285_v18, %v305_v23  ;;  %v243_v40 = vld [vmem:[%s3267_s16 + $0x30] sm:$0xff]  ;;  %v249_v23 = vld [vmem:[%s3267_s16 + $0x60] sm:$0xff] }
  0x2a   : > { %2674 = vmatprep.subr.bf16.mxu1 %v3123_v37  ;;  %2786 = vmatprep.subr.bf16.mxu0 %v3124_v41  ;;  %404 = vst [vmem:[#allocation2 + $0x31] sm:$0xff] %v317_v0  ;;  %405 = vst [vmem:[#allocation2 + $0x39] sm:$0xff] %v318_v1  ;;  %v244_v41 = vld [vmem:[%s3267_s16 + $0x38] sm:$0xff]  ;;  %v3137_v42 = vld [vmem:[%s4296_s3 + $0xd0] sm:$0xff]  }
  0x2b   : > { %428 = vst [vmem:[#allocation2 + $0x151] sm:$0xff] %v341_v2  ;;  %429 = vst [vmem:[#allocation2 + $0x159] sm:$0xff] %v342_v6  ;;  %v247_v1 = vld [vmem:[%s3267_s16 + $0x50] sm:$0xff]  ;;  %v248_v2 = vld [vmem:[%s3267_s16 + $0x58] sm:$0xff] }
  0x2c   : > { %1476 = vmatmul.mubr.bf16.vlgmr.msra.gmra.mxu0 %v3189_v60  ;;  %406 = vst [vmem:[#allocation2 + $0x49] sm:$0xff] %v319_v25  ;;  %407 = vst [vmem:[#allocation2 + $0x51] sm:$0xff] %v320_v28  ;;  %v246_v60 = vld [vmem:[%s3267_s16 + $0x48] sm:$0xff]  ;;  %v3144_v6 = vld [vmem:[%s4296_s3 + $0x80] sm:$0xff]  }
  0x2d   : > { %2787 = vmatpush3.bf16.msra.mxu0 %v3126_v46  ;;  %1483 = vmatprep.mubr.bf16.mxu0 %v3336_v50  ;;  %430 = vst [vmem:[#allocation2 + $0x169] sm:$0xff] %v343_v29  ;;  %431 = vst [vmem:[#allocation2 + $0x171] sm:$0xff] %v344_v30  ;;  %v3138_v46 = vld [vmem:[%s4296_s3 + $0x90] sm:$0xff]   ;;  %v285_v0 = vmul.f32 %v3280_v17, %v246_v60  ;;  %v3157_v60 = vld [vmem:[%s4296_s3 + $0x148] sm:$0xff]  }
  0x2e   : > { %v458_v43 = vld [vmem:[#allocation2 + $0x120] sm:$0xff]  ;;  %v459_v44 = vld [vmem:[#allocation2 + $0x128] sm:$0xff]  ;;  %2788 = vmatprep.subr.bf16.mxu0 %v3132_v49 }
  0x2f   : > { %v831_v47 = vpack.c.bf16 %v459_v44, %v458_v43  ;;  %v436_v3 = vld [vmem:[#allocation2 + $0x18] sm:$0xff]  ;;  %v437_v4 = vld [vmem:[#allocation2 + $0x20] sm:$0xff]  ;;  %v859_v43 = vpack.c.bf16 %v344_v30, %v343_v29  ;;  %v282_v44 = vmul.f32 %v3280_v17, %v243_v40  ;;  %v324_v13 = vadd.f32 %v3285_v18, %v285_v0  ;;  %v3153_v30 = vld [vmem:[%s4296_s3 + $0x150] sm:$0xff]  }
  0x30   : > { %v460_v5 = vld [vmem:[#allocation2 + $0x138] sm:$0xff]  ;;  %v461_v7 = vld [vmem:[#allocation2 + $0x140] sm:$0xff]  ;;  %v3360_v8 = vpack.c.bf16 %v437_v4, %v436_v3  ;;  %v286_v4 = vmul.f32 %v3280_v17, %v247_v1  ;;  %v3158_v0 = vld [vmem:[%s4296_s3 + $0x108] sm:$0xff]  }
  0x31   : > { %1572 = vmatmul.mubr.bf16.vlgmr.msra.gmra.mxu1 %v831_v47  ;;  %v3362_v9 = vpack.c.bf16 %v461_v7, %v460_v5  ;;  %2789 = vmatpush3.bf16.msra.mxu0 %v3134_v63  ;;  %v438_v32 = vld [vmem:[#allocation2 + $0x30] sm:$0xff]  ;;  %v439_v33 = vld [vmem:[#allocation2 + $0x38] sm:$0xff]  ;;  %v321_v49 = vadd.f32 %v3285_v18, %v282_v44  ;;  %v284_v63 = vmul.f32 %v3280_v17, %v245_v59  ;;  %v3143_v3 = vld [vmem:[%s4296_s3 + $0xc0] sm:$0xff]  }
  0x32   : > { %2675 = vmatpush3.bf16.msra.mxu1 %v3125_v45  ;;  %1579 = vmatprep.mubr.bf16.mxu1 %v841_v55  ;;  %v462_v34 = vld [vmem:[#allocation2 + $0x150] sm:$0xff]  ;;  %v463_v35 = vld [vmem:[#allocation2 + $0x158] sm:$0xff]  ;;  %v3399_v36 = vpack.c.bf16 %v439_v33, %v438_v32  ;;  %v283_v45 = vmul.f32 %v3280_v17, %v244_v41  ;;  %v3147_v55 = vld [vmem:[%s4296_s3 + $0x160] sm:$0xff]   ;;  %v287_v5 = vmul.f32 %v3280_v17, %v248_v2 }
  0x33   : > { %2676 = vmatprep.subr.bf16.mxu1 %v3127_v48  ;;  %2790 = vmatprep.subr.bf16.mxu0 %v3140_v26  ;;  %v3401_v37 = vpack.c.bf16 %v463_v35, %v462_v34  ;;  %v440_v47 = vld [vmem:[#allocation2 + $0x48] sm:$0xff]  ;;  %v441_v52 = vld [vmem:[#allocation2 + $0x50] sm:$0xff]  ;;  %408 = vst [vmem:[#allocation2 + $0x61] sm:$0xff] %v321_v49  ;;  %v323_v11 = vadd.f32 %v3285_v18, %v284_v63  ;;  %411 = vst [vmem:[#allocation2 + $0x81] sm:$0xff] %v324_v13 }
  0x34   : > { %1484 = vmatmul.mubr.bf16.gmra.mxu0 %v3360_v8  ;;  %v3139_v48 = vld [vmem:[%s4296_s3 + $0xc8] sm:$0xff]   ;;  %v322_v51 = vadd.f32 %v3285_v18, %v283_v45  ;;  %v3432_v57 = vpack.c.bf16 %v441_v52, %v440_v47  ;;  %v325_v16 = vadd.f32 %v3285_v18, %v286_v4  ;;  %v251_v34 = vld [vmem:[%s3267_s16 + $0x70] sm:$0xff]  ;;  %v500_v35 = vld [vmem:[#allocation2 + $0x1a] sm:$0xff] }
  0x35   : > { %1491 = vmatprep.mubr.bf16.mxu0 %v3368_v12  ;;  %2791 = vmatpush3.bf16.msra.mxu0 %v3142_v31  ;;  %v464_v53 = vld [vmem:[#allocation2 + $0x168] sm:$0xff]  ;;  %410 = vst [vmem:[#allocation2 + $0x79] sm:$0xff] %v323_v11  ;;  %v3481_v29 = vpack.c.bf16 %v324_v13, %v323_v11  ;;  %v3150_v31 = vld [vmem:[%s4296_s3 + $0x1f0] sm:$0xff]   ;;  %v252_v40 = vld [vmem:[%s3267_s16 + $0x78] sm:$0xff]  ;;  %v290_v41 = vmul.f32 %v3280_v17, %v251_v34 }
  0x36   : > { %2677 = vmatpush3.bf16.msra.mxu1 %v3128_v54  ;;  %v465_v54 = vld [vmem:[#allocation2 + $0x170] sm:$0xff]  ;;  %409 = vst [vmem:[#allocation2 + $0x69] sm:$0xff] %v322_v51  ;;  %2792 = vmatprep.subr.bf16.mxu0 %v3147_v55  ;;  %v3441_v62 = vpack.c.bf16 %v322_v51, %v321_v49  ;;  %v498_v7 = vld [vmem:[#allocation2 + $0x2] sm:$0xff]  ;;  %412 = vst [vmem:[#allocation2 + $0x91] sm:$0xff] %v325_v16  ;;  %v291_v44 = vmul.f32 %v3280_v17, %v252_v40 }
  0x37   : > { %2678 = vmatprep.subr.bf16.mxu1 %v3129_v61  ;;  %v3434_v58 = vpack.c.bf16 %v465_v54, %v464_v53  ;;  %v3141_v61 = vld [vmem:[%s4296_s3 + $0x88] sm:$0xff]   ;;  %v3510_v47 = vadd.f32 %v3285_v18, %v290_v41  ;;  %v253_v51 = vld [vmem:[%s3267_s16 + $0x80] sm:$0xff]  ;;  %v255_v1 = vld [vmem:[%s3267_s16 + $0x90] sm:$0xff] }
  0x38   : > { %v3155_v49 = vld [vmem:[%s4296_s3 + $0x1e8] sm:$0xff]   ;;  %v292_v55 = vmul.f32 %v3280_v17, %v253_v51  ;;  %v502_v2 = vld [vmem:[#allocation2 + $0x32] sm:$0xff]  ;;  %v3159_v13 = vld [vmem:[%s4296_s3 + $0x1e0] sm:$0xff]  }
  0x39   : > { %1580 = vmatmul.mubr.bf16.gmra.mxu1 %v3362_v9  ;;  %2793 = vmatpush3.bf16.msra.mxu0 %v3148_v56  ;;  %416 = vst [vmem:[#allocation2 + $0xc1] sm:$0xff] %v3510_v47  ;;  %v254_v52 = vld [vmem:[%s3267_s16 + $0x88] sm:$0xff]  ;;  %v256_v4 = vld [vmem:[%s3267_s16 + $0x98] sm:$0xff] }
  0x3a   : > { %2679 = vmatpush3.bf16.msra.mxu1 %v3130_v10  ;;  %1587 = vmatprep.mubr.bf16.mxu1 %v850_v20  ;;  %v499_v10 = vld [vmem:[#allocation2 + $0xa] sm:$0xff]  ;;  %v442_v20 = vld [vmem:[#allocation2 + $0x60] sm:$0xff]  ;;  %v293_v56 = vmul.f32 %v3280_v17, %v254_v52  ;;  %v3604_v34 = vld [vmem:[%s4296_s3 + $0x238] sm:$0xff]  }
  0x3b   : > { %2680 = vmatprep.subr.bf16.mxu1 %v3131_v19  ;;  %v326_v19 = vadd.f32 %v3285_v18, %v287_v5  ;;  %2794 = vmatprep.subr.bf16.mxu0 %v3149_v14  ;;  %v725_v26 = vpack.c.bf16 %v499_v10, %v498_v7  ;;  %v294_v5 = vmul.f32 %v3280_v17, %v255_v1  ;;  %v267_v1 = vld [vmem:[%s3267_s16 + $0xf0] sm:$0xff] }
  0x3c   : > { %1492 = vmatmul.mubr.bf16.gmra.mxu0 %v3399_v36  ;;  %v444_v45 = vld [vmem:[#allocation2 + $0x78] sm:$0xff]  ;;  %v3541_v63 = vadd.f32 %v3285_v18, %v293_v56  ;;  %v295_v10 = vmul.f32 %v3280_v17, %v256_v4 }
  0x3d   : > { %1499 = vmatprep.mubr.bf16.mxu0 %v3406_v39  ;;  %v443_v21 = vld [vmem:[#allocation2 + $0x68] sm:$0xff]  ;;  %413 = vst [vmem:[#allocation2 + $0x99] sm:$0xff] %v326_v19  ;;  %2795 = vmatpush3.bf16.msra.mxu0 %v3151_v22  ;;  %v3532_v59 = vpack.c.bf16 %v326_v19, %v325_v16  ;;  %v3557_v11 = vadd.f32 %v3285_v18, %v294_v5  ;;  %v3161_v19 = vld [vmem:[%s4296_s3 + $0x140] sm:$0xff]  }
  0x3e   : > { %2681 = vmatpush3.bf16.msra.mxu1 %v3133_v24  ;;  %v250_v24 = vld [vmem:[%s3267_s16 + $0x68] sm:$0xff]  ;;  %v3474_v25 = vpack.c.bf16 %v443_v21, %v442_v20  ;;  %2796 = vmatprep.subr.bf16.mxu0 %v3153_v30  ;;  %419 = vst [vmem:[#allocation2 + $0xe1] sm:$0xff] %v3541_v63  ;;  %v3563_v14 = vadd.f32 %v3285_v18, %v295_v10  ;;  %v3162_v21 = vld [vmem:[%s4296_s3 + $0x100] sm:$0xff]   ;;  %v505_v30 = vld [vmem:[#allocation2 + $0x52] sm:$0xff] }
  0x3f   : > { %2682 = vmatprep.subr.bf16.mxu1 %v3135_v27  ;;  %v3146_v27 = vld [vmem:[%s4296_s3 + $0x1b8] sm:$0xff]   ;;  %v289_v28 = vmul.f32 %v3280_v17, %v250_v24  ;;  %420 = vst [vmem:[#allocation2 + $0xf1] sm:$0xff] %v3557_v11  ;;  %v257_v22 = vld [vmem:[%s3267_s16 + $0xa0] sm:$0xff] }
  0x40   : > { %421 = vst [vmem:[#allocation2 + $0xf9] sm:$0xff] %v3563_v14  ;;  %v296_v24 = vmul.f32 %v3280_v17, %v257_v22  ;;  %v508_v56 = vld [vmem:[#allocation2 + $0x7a] sm:$0xff] }
  0x41   : > { %1588 = vmatmul.mubr.bf16.gmra.mxu1 %v3401_v37  ;;  %v3493_v33 = vadd.f32 %v3285_v18, %v289_v28  ;;  %v504_v28 = vld [vmem:[#allocation2 + $0x4a] sm:$0xff] }
  0x42   : > { %2683 = vmatpush3.bf16.msra.mxu1 %v3136_v38  ;;  %1595 = vmatprep.mubr.bf16.mxu1 %v859_v43  ;;  %v3154_v38 = vld [vmem:[%s4296_s3 + $0x110] sm:$0xff]   ;;  %v3614_v40 = vpack.c.bf16 %v505_v30, %v504_v28 }
  0x43   : > { %2684 = vmatprep.subr.bf16.mxu1 %v3137_v42  ;;  %v501_v42 = vld [vmem:[#allocation2 + $0x22] sm:$0xff]  ;;  %v3152_v43 = vld [vmem:[%s4296_s3 + $0x1b0] sm:$0xff]   ;;  %415 = vst [vmem:[#allocation2 + $0xb1] sm:$0xff] %v3493_v33  ;;  %2797 = vmatpush3.bf16.msra.mxu0 %v3154_v38 }
  0x44   : > { %1500 = vmatmul.mubr.bf16.gmra.mxu0 %v3432_v57  ;;  %v3524_v54 = vpack.c.bf16 %v501_v42, %v500_v35  ;;  %2798 = vmatprep.subr.bf16.mxu0 %v3157_v60  ;;  %v447_v7 = vld [vmem:[#allocation2 + $0x98] sm:$0xff]  ;;  %v3166_v42 = vld [vmem:[%s4296_s3 + $0x1d0] sm:$0xff]   ;;  %v509_v60 = vld [vmem:[#allocation2 + $0x82] sm:$0xff] }
  0x45   : > { %1507 = vmatprep.mubr.bf16.mxu0 %v3441_v62  ;;  %v3165_v35 = vld [vmem:[%s4296_s3 + $0x198] sm:$0xff]  }
  0x46   : > { %2685 = vmatpush3.bf16.msra.mxu1 %v3138_v46  ;;  %v445_v46 = vld [vmem:[#allocation2 + $0x80] sm:$0xff] }
  0x47   : > { %2686 = vmatprep.subr.bf16.mxu1 %v3139_v48  ;;  %v3514_v48 = vadd.f32 %v3285_v18, %v291_v44  ;;  %v3522_v53 = vpack.c.bf16 %v445_v46, %v444_v45  ;;  %2799 = vmatpush3.bf16.msra.mxu0 %v3158_v0  ;;  %v506_v44 = vld [vmem:[#allocation2 + $0x62] sm:$0xff] }
  0x48   : > { %2800 = vmatprep.subr.bf16.mxu0 %v3161_v19  ;;  %v450_v45 = vld [vmem:[#allocation2 + $0xc0] sm:$0xff] }
  0x49   : > { %1596 = vmatmul.mubr.bf16.gmra.mxu1 %v3434_v58  ;;  %417 = vst [vmem:[#allocation2 + $0xc9] sm:$0xff] %v3514_v48  ;;  %v3618_v41 = vpack.c.bf16 %v3514_v48, %v3510_v47  ;;  %v507_v47 = vld [vmem:[#allocation2 + $0x6a] sm:$0xff]  ;;  %v3172_v0 = vld [vmem:[%s4296_s3 + $0x1c0] sm:$0xff]  }
  0x4a   : > { %2687 = vmatpush3.bf16.msra.mxu1 %v3141_v61  ;;  %1636 = vmatprep.mubr.bf16.mxu1 %v3360_v8  ;;  %v288_v8 = vmul.f32 %v3280_v17, %v249_v23  ;;  %v3538_v61 = vadd.f32 %v3285_v18, %v292_v55  ;;  %v258_v23 = vld [vmem:[%s3267_s16 + $0xa8] sm:$0xff]  ;;  %v3635_v51 = vpack.c.bf16 %v507_v47, %v506_v44  ;;  %v511_v19 = vld [vmem:[#allocation2 + $0x9a] sm:$0xff] }
  0x4b   : > { %2688 = vmatprep.subr.bf16.mxu1 %v3143_v3  ;;  %v503_v3 = vld [vmem:[#allocation2 + $0x3a] sm:$0xff]  ;;  %2801 = vmatpush3.bf16.msra.mxu0 %v3162_v21  ;;  %v3169_v48 = vld [vmem:[%s4296_s3 + $0x1c8] sm:$0xff]  }
  0x4c   : > { %v3490_v32 = vadd.f32 %v3285_v18, %v288_v8  ;;  %1508 = vmatmul.mubr.bf16.gmra.mxu0 %v3474_v25  ;;  %418 = vst [vmem:[#allocation2 + $0xd9] sm:$0xff] %v3538_v61  ;;  %v3571_v16 = vpack.c.bf16 %v503_v3, %v502_v2  ;;  %3034 = vmatprep.subr.bf16.mxu0 %v3604_v34  ;;  %v268_v2 = vld [vmem:[%s3267_s16 + $0xf8] sm:$0xff]  ;;  %v552_v44 = vld [vmem:[#allocation2 + $0x120] sm:$0xff] }
  0x4d   : > { %1515 = vmatprep.mubr.bf16.mxu0 %v3481_v29  ;;  %v3639_v52 = vpack.c.bf16 %v3541_v63, %v3538_v61  ;;  %v3174_v63 = vld [vmem:[%s4296_s3 + $0x180] sm:$0xff]   ;;  %v306_v3 = vmul.f32 %v3280_v17, %v267_v1  ;;  %v307_v4 = vmul.f32 %v3280_v17, %v268_v2  ;;  %v455_v21 = vld [vmem:[#allocation2 + $0xf8] sm:$0xff] }
  0x4e   : > { %2689 = vmatpush3.bf16.msra.mxu1 %v3144_v6  ;;  %414 = vst [vmem:[#allocation2 + $0xa9] sm:$0xff] %v3490_v32  ;;  %v446_v6 = vld [vmem:[#allocation2 + $0x90] sm:$0xff]  ;;  %v3579_v20 = vpack.c.bf16 %v3493_v33, %v3490_v32  ;;  %v3163_v33 = vld [vmem:[%s4296_s3 + $0x1d8] sm:$0xff]  }
  0x4f   : > { %2898 = vmatprep.subr.bf16.mxu1 %v3145_v15  ;;  %v3160_v15 = vld [vmem:[%s4296_s3 + $0x1a0] sm:$0xff]   ;;  %v345_v10 = vadd.f32 %v3285_v18, %v306_v3  ;;  %v526_v1 = vld [vmem:[#allocation2 + $0x152] sm:$0xff] }
  0x50   : > { %v451_v46 = vld [vmem:[#allocation2 + $0xc8] sm:$0xff]  ;;  %v527_v2 = vld [vmem:[#allocation2 + $0x15a] sm:$0xff] }
  0x51   : > { %1637 = vmatmul.mubr.bf16.vlgmr.msra.gmra.mxu1 %v725_v26  ;;  %v297_v26 = vmul.f32 %v3280_v17, %v258_v23  ;;  %432 = vst [vmem:[#allocation2 + $0x181] sm:$0xff] %v345_v10  ;;  %v510_v17 = vld [vmem:[#allocation2 + $0x92] sm:$0xff]  ;;  %v514_v30 = vld [vmem:[#allocation2 + $0xc2] sm:$0xff] }
  0x52   : > { %2899 = vmatpush3.bf16.msra.mxu1 %v3146_v27  ;;  %1644 = vmatprep.mubr.bf16.mxu1 %v3399_v36  ;;  %v3156_v36 = vld [vmem:[%s4296_s3 + $0x1a8] sm:$0xff]  }
  0x53   : > { %2900 = vmatprep.subr.bf16.mxu1 %v3150_v31  ;;  %v3591_v31 = vadd.f32 %v3285_v18, %v296_v24  ;;  %v3594_v32 = vadd.f32 %v3285_v18, %v297_v26  ;;  %v452_v55 = vld [vmem:[#allocation2 + $0xd8] sm:$0xff]  ;;  %v453_v61 = vld [vmem:[#allocation2 + $0xe0] sm:$0xff] }
  0x54   : > { %1516 = vmatmul.mubr.bf16.gmra.mxu0 %v3522_v53  ;;  %v3658_v5 = vpack.c.bf16 %v453_v61, %v452_v55  ;;  %v513_v26 = vld [vmem:[#allocation2 + $0xb2] sm:$0xff]  ;;  %v3177_v55 = vld [vmem:[%s4296_s3 + $0x208] sm:$0xff]   ;;  %v524_v61 = vld [vmem:[#allocation2 + $0x13a] sm:$0xff] }
  0x55   : > { %1523 = vmatprep.mubr.bf16.mxu0 %v3532_v59  ;;  %v448_v27 = vld [vmem:[#allocation2 + $0xa8] sm:$0xff]  ;;  %v449_v8 = vld [vmem:[#allocation2 + $0xb0] sm:$0xff]  ;;  %422 = vst [vmem:[#allocation2 + $0x109] sm:$0xff] %v3591_v31  ;;  %423 = vst [vmem:[#allocation2 + $0x111] sm:$0xff] %v3594_v32 }
  0x56   : > { %2901 = vmatpush3.bf16.msra.mxu1 %v3152_v43  ;;  %v3612_v38 = vpack.c.bf16 %v449_v8, %v448_v27  ;;  %v3168_v43 = vld [vmem:[%s4296_s3 + $0x190] sm:$0xff]  }
  0x57   : > { %2902 = vmatprep.subr.bf16.mxu1 %v3155_v49  ;;  %v3633_v49 = vpack.c.bf16 %v451_v46, %v450_v45  ;;  %v512_v22 = vld [vmem:[#allocation2 + $0xaa] sm:$0xff]  ;;  %v3175_v46 = vld [vmem:[%s4296_s3 + $0x218] sm:$0xff]  }
  0x58   : > { %v3686_v8 = vpack.c.bf16 %v513_v26, %v512_v22  ;;  %v553_v45 = vld [vmem:[#allocation2 + $0x128] sm:$0xff]  ;;  %v560_v3 = vld [vmem:[#allocation2 + $0x180] sm:$0xff]  ;;  %v627_v22 = vld [vmem:[#allocation2 + $0x30] sm:$0xff] }
  0x59   : > { %1645 = vmatmul.mubr.bf16.gmra.mxu1 %v3524_v54  ;;  %v662_v26 = vld [vmem:[#allocation2 + $0x51] sm:$0xff] }
  0x5a   : > { %1652 = vmatprep.mubr.bf16.mxu1 %v3432_v57  ;;  %2903 = vmatpush3.bf16.msra.mxu1 %v3156_v36  ;;  %v3569_v57 = vpack.c.bf16 %v447_v7, %v446_v6  ;;  %v3171_v36 = vld [vmem:[%s4296_s3 + $0x188] sm:$0xff]   ;;  %v3660_v6 = vpack.c.bf16 %v509_v60, %v508_v56  ;;  %v3664_v7 = vpack.c.bf16 %v3563_v14, %v3557_v11 }
  0x5b   : > { %2904 = vmatprep.subr.bf16.mxu1 %v3159_v13  ;;  %v346_v13 = vadd.f32 %v3285_v18, %v307_v4  ;;  %v3674_v14 = vpack.c.bf16 %v511_v19, %v510_v17  ;;  %v3678_v18 = vpack.c.bf16 %v3594_v32, %v3591_v31  ;;  %v515_v31 = vld [vmem:[#allocation2 + $0xca] sm:$0xff]  ;;  %v660_v17 = vld [vmem:[#allocation2 + $0x39] sm:$0xff] }
  0x5c   : > { %1524 = vmatmul.mubr.bf16.gmra.mxu0 %v3569_v57  ;;  %v456_v23 = vld [vmem:[#allocation2 + $0x108] sm:$0xff]  ;;  %v457_v24 = vld [vmem:[#allocation2 + $0x110] sm:$0xff]  ;;  %v3694_v32 = vpack.c.bf16 %v515_v31, %v514_v30 }
  0x5d   : > { %1531 = vmatprep.mubr.bf16.mxu0 %v3579_v20  ;;  %433 = vst [vmem:[#allocation2 + $0x189] sm:$0xff] %v346_v13  ;;  %v3684_v27 = vpack.c.bf16 %v457_v24, %v456_v23  ;;  %v3688_v28 = vpack.c.bf16 %v346_v13, %v345_v10  ;;  %v523_v60 = vld [vmem:[#allocation2 + $0x12a] sm:$0xff]  ;;  %v3754_v10 = vpack.c.bf16 %v527_v2, %v526_v1  ;;  %v628_v23 = vld [vmem:[#allocation2 + $0x38] sm:$0xff] }
  0x5e   : > { %2905 = vmatpush3.bf16.msra.mxu1 %v3160_v15  ;;  %v454_v15 = vld [vmem:[#allocation2 + $0xf0] sm:$0xff]  ;;  %v729_v30 = vpack.c.bf16 %v628_v23, %v627_v22 }
  0x5f   : > { %2906 = vmatprep.subr.bf16.mxu1 %v3163_v33  ;;  %v3672_v11 = vpack.c.bf16 %v455_v21, %v454_v15  ;;  %v3167_v33 = vld [vmem:[%s4296_s3 + $0x230] sm:$0xff]  }
  0x60   : > { %v528_v13 = vld [vmem:[#allocation2 + $0x16a] sm:$0xff] }
  0x61   : > { %1653 = vmatmul.mubr.bf16.gmra.mxu1 %v3571_v16  ;;  %v659_v15 = vld [vmem:[#allocation2 + $0x31] sm:$0xff]  ;;  %v661_v24 = vld [vmem:[#allocation2 + $0x49] sm:$0xff] }
  0x62   : > { %1660 = vmatprep.mubr.bf16.mxu1 %v3474_v25  ;;  %2907 = vmatpush3.bf16.msra.mxu1 %v3165_v35  ;;  %v516_v35 = vld [vmem:[#allocation2 + $0xda] sm:$0xff]  ;;  %v730_v21 = vpack.c.bf16 %v660_v17, %v659_v15  ;;  %v739_v31 = vpack.c.bf16 %v662_v26, %v661_v24  ;;  %v590_v1 = vld [vmem:[#allocation2 + $0x169] sm:$0xff]  ;;  %v591_v2 = vld [vmem:[#allocation2 + $0x171] sm:$0xff] }
  0x63   : > { %2908 = vmatprep.subr.bf16.mxu1 %v3166_v42  ;;  %v517_v42 = vld [vmem:[#allocation2 + $0xe2] sm:$0xff]  ;;  %v3806_v23 = vpack.c.bf16 %v591_v2, %v590_v1  ;;  %v696_v1 = vld [vmem:[#allocation2 + $0x6a] sm:$0xff] }
  0x64   : > { %1532 = vmatmul.mubr.bf16.gmra.mxu0 %v3612_v38  ;;  %v561_v4 = vld [vmem:[#allocation2 + $0x188] sm:$0xff] }
  0x65   : > { %1539 = vmatprep.mubr.bf16.mxu0 %v3618_v41 }
  0x66   : > { %2909 = vmatpush3.bf16.msra.mxu1 %v3168_v43  ;;  %v3707_v43 = vpack.c.bf16 %v517_v42, %v516_v35  ;;  %v630_v35 = vld [vmem:[#allocation2 + $0x50] sm:$0xff] }
  0x67   : > { %2910 = vmatprep.subr.bf16.mxu1 %v3169_v48  ;;  %v3721_v48 = vpack.c.bf16 %v553_v45, %v552_v44 }
  0x69   : > { %1661 = vmatmul.mubr.bf16.gmra.mxu1 %v3614_v40 }
  0x6a   : > { %1668 = vmatprep.mubr.bf16.mxu1 %v3522_v53  ;;  %2911 = vmatpush3.bf16.msra.mxu1 %v3171_v36  ;;  %v521_v36 = vld [vmem:[#allocation2 + $0x112] sm:$0xff] }
  0x6b   : > { %2912 = vmatprep.subr.bf16.mxu1 %v3172_v0 }
  0x6c   : > { %1540 = vmatmul.mubr.bf16.gmra.mxu0 %v3633_v49 }
  0x6d   : > { %1547 = vmatprep.mubr.bf16.mxu0 %v3639_v52 }
  0x6e   : > { %2913 = vmatpush3.bf16.msra.mxu1 %v3174_v63  ;;  %v525_v63 = vld [vmem:[#allocation2 + $0x142] sm:$0xff] }
  0x71   : > { %1669 = vmatmul.mubr.bf16.gmra.mxu1 %v3635_v51 }
  0x72   : > { %1676 = vmatprep.mubr.bf16.mxu1 %v3569_v57 }
  0x74   : > { %1548 = vmatmul.mubr.bf16.gmra.mxu0 %v3658_v5 }
  0x75   : > { %1555 = vmatprep.mubr.bf16.mxu0 %v3664_v7 }
  0x79   : > { %1677 = vmatmul.mubr.bf16.gmra.mxu1 %v3660_v6 }
  0x7a   : > { %1684 = vmatprep.mubr.bf16.mxu1 %v3612_v38 }
  0x7c   : > { %1556 = vmatmul.mubr.bf16.gmra.mxu0 %v3672_v11 }
  0x7d   : > { %1563 = vmatprep.mubr.bf16.mxu0 %v3678_v18 }
  0x81   : > { %1685 = vmatmul.mubr.bf16.gmra.mxu1 %v3674_v14 }
  0x82   : > { %1692 = vmatprep.mubr.bf16.mxu1 %v3633_v49 }
  0x84   : > { %1564 = vmatmul.mubr.bf16.gmra.mxu0 %v3684_v27 }
  0x85   : > { %1797 = vmatprep.mubr.bf16.mxu0 %v3524_v54  ;;  %v3170_v54 = vld [vmem:[%s4296_s3 + $0x228] sm:$0xff]  }
  0x89   : > { %1693 = vmatmul.mubr.bf16.gmra.mxu1 %v3686_v8 }
  0x8a   : > { %1700 = vmatprep.mubr.bf16.mxu1 %v3658_v5 }
  0x8c   : > { %1798 = vmatmul.mubr.bf16.vlgmr.msra.gmra.mxu0 %v3336_v50  ;;  %v3173_v50 = vld [vmem:[%s4296_s3 + $0x220] sm:$0xff]  }
  0x8d   : > { %3035 = vmatpush3.bf16.msra.mxu0 %v3604_v34  ;;  %1805 = vmatprep.mubr.bf16.mxu0 %v3571_v16  ;;  %v518_v16 = vld [vmem:[#allocation2 + $0xf2] sm:$0xff]  ;;  %v519_v34 = vld [vmem:[#allocation2 + $0xfa] sm:$0xff] }
  0x8e   : > { %3036 = vmatprep.subr.bf16.mxu0 %v3167_v33  ;;  %v3719_v47 = vpack.c.bf16 %v519_v34, %v518_v16  ;;  %v587_v34 = vld [vmem:[#allocation2 + $0x141] sm:$0xff] }
  0x91   : > { %1701 = vmatmul.mubr.bf16.gmra.mxu1 %v3694_v32  ;;  %3037 = vmatpush3.bf16.msra.mxu0 %v3167_v33  ;;  %v629_v33 = vld [vmem:[#allocation2 + $0x48] sm:$0xff] }
  0x92   : > { %1708 = vmatprep.mubr.bf16.mxu1 %v3672_v11  ;;  %3038 = vmatprep.subr.bf16.mxu0 %v3170_v54  ;;  %v738_v42 = vpack.c.bf16 %v630_v35, %v629_v33 }
  0x94   : > { %1806 = vmatmul.mubr.bf16.gmra.mxu0 %v3368_v12  ;;  %v3176_v12 = vld [vmem:[%s4296_s3 + $0x210] sm:$0xff]  }
  0x95   : > { %1813 = vmatprep.mubr.bf16.mxu0 %v3614_v40  ;;  %3039 = vmatpush3.bf16.msra.mxu0 %v3170_v54  ;;  %v520_v40 = vld [vmem:[#allocation2 + $0x10a] sm:$0xff]  ;;  %v584_v54 = vld [vmem:[#allocation2 + $0x121] sm:$0xff] }
  0x96   : > { %3040 = vmatprep.subr.bf16.mxu0 %v3173_v50  ;;  %v3733_v56 = vpack.c.bf16 %v521_v36, %v520_v40 }
  0x99   : > { %1709 = vmatmul.mubr.bf16.gmra.mxu1 %v3707_v43  ;;  %3041 = vmatpush3.bf16.msra.mxu0 %v3173_v50  ;;  %v585_v50 = vld [vmem:[#allocation2 + $0x129] sm:$0xff] }
  0x9a   : > { %1716 = vmatprep.mubr.bf16.mxu1 %v3684_v27  ;;  %3042 = vmatprep.subr.bf16.mxu0 %v3175_v46  ;;  %v3776_v16 = vpack.c.bf16 %v585_v50, %v584_v54  ;;  %v691_v54 = vld [vmem:[#allocation2 + $0x32] sm:$0xff]  ;;  %v692_v50 = vld [vmem:[#allocation2 + $0x3a] sm:$0xff] }
  0x9c   : > { %1814 = vmatmul.mubr.bf16.gmra.mxu0 %v3406_v39  ;;  %v3178_v39 = vld [vmem:[%s4296_s3 + $0x200] sm:$0xff]  }
  0x9d   : > { %1821 = vmatprep.mubr.bf16.mxu0 %v3635_v51  ;;  %3043 = vmatpush3.bf16.msra.mxu0 %v3175_v46  ;;  %v522_v51 = vld [vmem:[#allocation2 + $0x122] sm:$0xff] }
  0x9e   : > { %3044 = vmatprep.subr.bf16.mxu0 %v3176_v12  ;;  %v3742_v0 = vpack.c.bf16 %v523_v60, %v522_v51 }
  0xa1   : > { %1717 = vmatmul.mubr.bf16.gmra.mxu1 %v3719_v47  ;;  %3045 = vmatpush3.bf16.msra.mxu0 %v3176_v12 }
  0xa2   : > { %1724 = vmatprep.mubr.bf16.mxu1 %v3721_v48  ;;  %3046 = vmatprep.subr.bf16.mxu0 %v3177_v55 }
  0xa4   : > { %1822 = vmatmul.mubr.bf16.gmra.mxu0 %v3441_v62 }
  0xa5   : > { %1829 = vmatprep.mubr.bf16.mxu0 %v3660_v6  ;;  %3047 = vmatpush3.bf16.msra.mxu0 %v3177_v55 }
  0xa6   : > { %3048 = vmatprep.subr.bf16.mxu0 %v3178_v39 }
  0xa9   : > { %1725 = vmatmul.mubr.bf16.gmra.mxu1 %v3733_v56  ;;  %3049 = vmatpush3.bf16.msra.mxu0 %v3178_v39 }
  0xaa   : > { %1732 = vmatprep.mubr.bf16.mxu1 %v3362_v9  ;;  %v3748_v9 = vpack.c.bf16 %v525_v63, %v524_v61 }
  0xac   : > { %1830 = vmatmul.mubr.bf16.gmra.mxu0 %v3481_v29 }
  0xad   : > { %1837 = vmatprep.mubr.bf16.mxu0 %v3674_v14 }
  0xb1   : > { %1733 = vmatmul.mubr.bf16.gmra.mxu1 %v3742_v0 }
  0xb2   : > { %1740 = vmatprep.mubr.bf16.mxu1 %v3401_v37  ;;  %v3756_v37 = vpack.c.bf16 %v561_v4, %v560_v3 }
  0xb4   : > { %1838 = vmatmul.mubr.bf16.gmra.mxu0 %v3532_v59 }
  0xb5   : > { %1845 = vmatprep.mubr.bf16.mxu0 %v3686_v8 }
  0xb9   : > { %1741 = vmatmul.mubr.bf16.gmra.mxu1 %v3748_v9 }
  0xba   : > { %1748 = vmatprep.mubr.bf16.mxu1 %v3434_v58  ;;  %v529_v58 = vld [vmem:[#allocation2 + $0x172] sm:$0xff] }
  0xbb   : > { %v3762_v19 = vpack.c.bf16 %v529_v58, %v528_v13  ;;  %v624_v13 = vld [vmem:[#allocation2 + $0x182] sm:$0xff]  ;;  %v625_v58 = vld [vmem:[#allocation2 + $0x18a] sm:$0xff] }
  0xbc   : > { %1846 = vmatmul.mubr.bf16.gmra.mxu0 %v3579_v20  ;;  %v3808_v24 = vpack.c.bf16 %v625_v58, %v624_v13 }
  0xbd   : > { %1853 = vmatprep.mubr.bf16.mxu0 %v3694_v32 }
  0xc1   : > { %1749 = vmatmul.mubr.bf16.gmra.mxu1 %v3754_v10 }
  0xc2   : > { %1756 = vmatprep.mubr.bf16.mxu1 %v3756_v37 }
  0xc4   : > { %1854 = vmatmul.mubr.bf16.gmra.mxu0 %v3618_v41 }
  0xc5   : > { %1861 = vmatprep.mubr.bf16.mxu0 %v3707_v43 }
  0xc9   : > { %1757 = vmatmul.mubr.bf16.gmra.mxu1 %v3762_v19 }
  0xca   : > { %1958 = vmatprep.mubr.bf16.mxu1 %v730_v21 }
  0xcc   : > { %1862 = vmatmul.mubr.bf16.gmra.mxu0 %v3639_v52 }
  0xcd   : > { %1869 = vmatprep.mubr.bf16.mxu0 %v3719_v47 }
  0xd1   : > { %1959 = vmatmul.mubr.bf16.vlgmr.msra.gmra.mxu1 %v729_v30 }
  0xd2   : > { %1966 = vmatprep.mubr.bf16.mxu1 %v739_v31 }
  0xd4   : > { %1870 = vmatmul.mubr.bf16.gmra.mxu0 %v3664_v7 }
  0xd5   : > { %1877 = vmatprep.mubr.bf16.mxu0 %v3733_v56 }
  0xd9   : > { %1967 = vmatmul.mubr.bf16.gmra.mxu1 %v738_v42 }
  0xda   : > { %1974 = vmatprep.mubr.bf16.mxu1 %v3441_v62  ;;  %v586_v62 = vld [vmem:[#allocation2 + $0x139] sm:$0xff] }
  0xdb   : > { %v3782_v44 = vpack.c.bf16 %v587_v34, %v586_v62 }
  0xdc   : > { %1878 = vmatmul.mubr.bf16.gmra.mxu0 %v3678_v18 }
  0xdd   : > { %1885 = vmatprep.mubr.bf16.mxu0 %v3742_v0 }
  0xe1   : > { %1975 = vmatmul.mubr.bf16.gmra.mxu1 %v3474_v25 }
  0xe2   : > { %1982 = vmatprep.mubr.bf16.mxu1 %v3481_v29  ;;  %v588_v29 = vld [vmem:[#allocation2 + $0x151] sm:$0xff] }
  0xe4   : > { %1886 = vmatmul.mubr.bf16.gmra.mxu0 %v3776_v16 }
  0xe5   : > { %1893 = vmatprep.mubr.bf16.mxu0 %v3748_v9 }
  0xe9   : > { %1983 = vmatmul.mubr.bf16.gmra.mxu1 %v3522_v53  ;;  %v589_v53 = vld [vmem:[#allocation2 + $0x159] sm:$0xff] }
  0xea   : > { %1990 = vmatprep.mubr.bf16.mxu1 %v3532_v59  ;;  %v3792_v39 = vpack.c.bf16 %v589_v53, %v588_v29  ;;  %v731_v29 = vpack.c.bf16 %v692_v50, %v691_v54 }
  0xec   : > { %v2578_v25 = vpop.f32.mrf.mxu0  ;;  %1894 = vmatmul.mubr.bf16.gmra.mxu0 %v3782_v44 }
  0xed   : > { %1901 = vmatprep.mubr.bf16.mxu0 %v3754_v10 }
  0xee   : > { %v2579_v46 = vpop.f32.mrf.mxu0 }
  0xef   : > { %v3788_v40 = vadd.f32 %v2579_v46, %v2578_v25 }
  0xf0   : > { %v2581_v36 = vpop.f32.mrf.mxu0 }
  0xf1   : > { %v2650_v45 = vpop.f32.mrf.mxu1  ;;  %1991 = vmatmul.mubr.bf16.gmra.mxu1 %v3569_v57 }
  0xf2   : > { %1998 = vmatprep.mubr.bf16.mxu1 %v3579_v20  ;;  %v2582_v51 = vpop.f32.mrf.mxu0 }
  0xf3   : > { %v2651_v12 = vpop.f32.mrf.mxu1  ;;  %v3794_v61 = vadd.f32 %v2582_v51, %v2581_v36  ;;  %v694_v51 = vld [vmem:[#allocation2 + $0x52] sm:$0xff] }
  0xf4   : > { %v3790_v59 = vadd.f32 %v2651_v12, %v2650_v45  ;;  %v2584_v63 = vpop.f32.mrf.mxu0  ;;  %1902 = vmatmul.mubr.bf16.gmra.mxu0 %v3792_v39 }
  0xf5   : > { %v2653_v55 = vpop.f32.mrf.mxu1  ;;  %1909 = vmatprep.mubr.bf16.mxu0 %v3762_v19 }
  0xf6   : > { %v2585_v3 = vpop.f32.mrf.mxu0 }
  0xf7   : > { %v2654_v60 = vpop.f32.mrf.mxu1  ;;  %v3802_v15 = vadd.f32 %v2585_v3, %v2584_v63 }
  0xf8   : > { %v3796_v57 = vadd.f32 %v2654_v60, %v2653_v55  ;;  %v2587_v21 = vpop.f32.mrf.mxu0 }
  0xf9   : > { %v2656_v20 = vpop.f32.mrf.mxu1  ;;  %1999 = vmatmul.mubr.bf16.gmra.mxu1 %v3612_v38 }
  0xfa   : > { %2006 = vmatprep.mubr.bf16.mxu1 %v3618_v41  ;;  %v2588_v38 = vpop.f32.mrf.mxu0 }
  0xfb   : > { %v2657_v4 = vpop.f32.mrf.mxu1  ;;  %v3810_v30 = vadd.f32 %v2588_v38, %v2587_v21 }
  0xfc   : > { %v3804_v17 = vadd.f32 %v2657_v4, %v2656_v20  ;;  %v2590_v31 = vpop.f32.mrf.mxu0  ;;  %1910 = vmatmul.mubr.bf16.gmra.mxu0 %v3806_v23  ;;  %v695_v20 = vld [vmem:[#allocation2 + $0x62] sm:$0xff] }
  0xfd   : > { %v2659_v22 = vpop.f32.mrf.mxu1  ;;  %1917 = vmatprep.mubr.bf16.mxu0 %v3808_v24  ;;  %v749_v21 = vpack.c.bf16 %v696_v1, %v695_v20 }
  0xfe   : > { %v2591_v35 = vpop.f32.mrf.mxu0 }
  0xff   : > { %v2660_v26 = vpop.f32.mrf.mxu1  ;;  %v3818_v62 = vadd.f32 %v2591_v35, %v2590_v31 }
 0x100   : > { %v3812_v41 = vadd.f32 %v2660_v26, %v2659_v22  ;;  %v2593_v25 = vpop.f32.mrf.mxu0 }
 0x101   : > { %v2662_v33 = vpop.f32.mrf.mxu1  ;;  %2007 = vmatmul.mubr.bf16.gmra.mxu1 %v3633_v49 }
 0x102   : > { %2014 = vmatprep.mubr.bf16.mxu1 %v3639_v52  ;;  %v2594_v53 = vpop.f32.mrf.mxu0  ;;  %v693_v52 = vld [vmem:[#allocation2 + $0x4a] sm:$0xff] }
 0x103   : > { %v2663_v42 = vpop.f32.mrf.mxu1  ;;  %v3822_v12 = vadd.f32 %v2594_v53, %v2593_v25  ;;  %v740_v58 = vpack.c.bf16 %v694_v51, %v693_v52 }
 0x104   : > { %v3820_v34 = vadd.f32 %v2663_v42, %v2662_v33  ;;  %v2596_v36 = vpop.f32.mrf.mxu0  ;;  %1918 = vmatmul.mubr.bf16.gmra.mxu0 %v3688_v28 }
 0x105   : > { %v2665_v45 = vpop.f32.mrf.mxu1  ;;  %3050 = vmatprep.mubr.bf16.mxu0 %v731_v29 }
 0x106   : > { %v2597_v60 = vpop.f32.mrf.mxu0 }
 0x107   : > { %v2666_v46 = vpop.f32.mrf.mxu1  ;;  %v3829_v2 = vadd.f32 %v2597_v60, %v2596_v36 }
 0x108   : > { %v3824_v49 = vadd.f32 %v2666_v46, %v2665_v45  ;;  %v2599_v4 = vpop.f32.mrf.mxu0 }
 0x109   : > { %v2668_v55 = vpop.f32.mrf.mxu1  ;;  %2015 = vmatmul.mubr.bf16.gmra.mxu1 %v3658_v5 }
 0x10a   : > { %2022 = vmatprep.mubr.bf16.mxu1 %v3664_v7  ;;  %v2600_v22 = vpop.f32.mrf.mxu0 }
 0x10b   : > { %v2669_v63 = vpop.f32.mrf.mxu1  ;;  %v3833_v5 = vadd.f32 %v2600_v22, %v2599_v4 }
 0x10c   : > { %v3831_v3 = vadd.f32 %v2669_v63, %v2668_v55  ;;  %v2602_v26 = vpop.f32.mrf.mxu0  ;;  %3051 = vmatmul.mubr.bf16.vlgmr.msra.gmra.mxu0 %v740_v58 }
 0x10d   : > { %v2671_v13 = vpop.f32.mrf.mxu1  ;;  %3054 = vmatprep.mubr.bf16.mxu0 %v749_v21 }
 0x10e   : > { %v2603_v33 = vpop.f32.mrf.mxu0 }
 0x10f   : > { %v2672_v38 = vpop.f32.mrf.mxu1  ;;  %v3839_v42 = vadd.f32 %v2603_v33, %v2602_v26 }
 0x110   : > { %v3835_v7 = vadd.f32 %v2672_v38, %v2671_v13  ;;  %v2605_v50 = vpop.f32.mrf.mxu0 }
 0x111   : > { %v2690_v31 = vpop.f32.mrf.mxu1  ;;  %2023 = vmatmul.mubr.bf16.gmra.mxu1 %v3672_v11 }
 0x112   : > { %2030 = vmatprep.mubr.bf16.mxu1 %v3678_v18  ;;  %v2606_v29 = vpop.f32.mrf.mxu0 }
 0x113   : > { %v2691_v35 = vpop.f32.mrf.mxu1  ;;  %v3844_v46 = vadd.f32 %v2606_v29, %v2605_v50  ;;  %v651_v29 = vld [vmem:[#allocation2 + $0x150] sm:$0xff] }
 0x114   : > { %v2692_v54 = vadd.f32 %v2691_v35, %v2690_v31  ;;  %v2608_v11 = vpop.f32.mrf.mxu0  ;;  %3055 = vmatmul.mubr.bf16.gmra.mxu0 %v3660_v6 }
 0x115   : > { %v2693_v25 = vpop.f32.mrf.mxu1  ;;  %3058 = vmatprep.mubr.bf16.mxu0 %v3674_v14 }
 0x116   : > { %v3842_v45 = vadd.f32 %v2692_v54, %v3788_v40  ;;  %v2609_v40 = vpop.f32.mrf.mxu0 }
 0x117   : > { %v2694_v53 = vpop.f32.mrf.mxu1  ;;  %v3853_v51 = vadd.f32 %v2609_v40, %v2608_v11 }
 0x118   : > { %v2695_v36 = vadd.f32 %v2694_v53, %v2693_v25  ;;  %v2611_v63 = vpop.f32.mrf.mxu0 }
 0x119   : > { %v2696_v55 = vpop.f32.mrf.mxu1  ;;  %2031 = vmatmul.mubr.bf16.gmra.mxu1 %v3684_v27 }
 0x11a   : > { %v3849_v18 = vadd.f32 %v2695_v36, %v3794_v61  ;;  %2038 = vmatprep.mubr.bf16.mxu1 %v3776_v16  ;;  %v2612_v27 = vpop.f32.mrf.mxu0  ;;  %v649_v16 = vld [vmem:[#allocation2 + $0x138] sm:$0xff] }
 0x11b   : > { %v2697_v52 = vpop.f32.mrf.mxu1  ;;  %v3858_v6 = vadd.f32 %v2612_v27, %v2611_v63 }
 0x11c   : > { %v2698_v60 = vadd.f32 %v2697_v52, %v2696_v55  ;;  %v2614_v13 = vpop.f32.mrf.mxu0  ;;  %3059 = vmatmul.mubr.bf16.gmra.mxu0 %v3686_v8 }
 0x11d   : > { %v2699_v20 = vpop.f32.mrf.mxu1  ;;  %3062 = vmatprep.mubr.bf16.mxu0 %v3694_v32 }
 0x11e   : > { %v3856_v1 = vadd.f32 %v2698_v60, %v3802_v15  ;;  %v650_v15 = vld [vmem:[#allocation2 + $0x140] sm:$0xff]  ;;  %v2615_v21 = vpop.f32.mrf.mxu0 }
 0x11f   : > { %v2700_v4 = vpop.f32.mrf.mxu1  ;;  %v3867_v38 = vadd.f32 %v2615_v21, %v2614_v13  ;;  %v828_v35 = vpack.c.bf16 %v650_v15, %v649_v16 }
 0x120   : > { %v2701_v61 = vadd.f32 %v2700_v4, %v2699_v20  ;;  %v2617_v31 = vpop.f32.mrf.mxu0 }
 0x121   : > { %v2702_v58 = vpop.f32.mrf.mxu1  ;;  %2039 = vmatmul.mubr.bf16.gmra.mxu1 %v3721_v48 }
 0x122   : > { %v3863_v14 = vadd.f32 %v2701_v61, %v3810_v30  ;;  %2046 = vmatprep.mubr.bf16.mxu1 %v3782_v44  ;;  %v2618_v8 = vpop.f32.mrf.mxu0  ;;  %v653_v61 = vld [vmem:[#allocation2 + $0x168] sm:$0xff] }
 0x123   : > { %v2703_v22 = vpop.f32.mrf.mxu1  ;;  %v3872_v54 = vadd.f32 %v2618_v8, %v2617_v31 }
 0x124   : > { %v2704_v26 = vadd.f32 %v2703_v22, %v2702_v58  ;;  %v2620_v50 = vpop.f32.mrf.mxu0  ;;  %3063 = vmatmul.mubr.bf16.gmra.mxu0 %v3707_v43 }
 0x125   : > { %v2705_v33 = vpop.f32.mrf.mxu1  ;;  %3066 = vmatprep.mubr.bf16.mxu0 %v3719_v47 }
 0x126   : > { %v3870_v48 = vadd.f32 %v2704_v26, %v3818_v62  ;;  %v652_v62 = vld [vmem:[#allocation2 + $0x158] sm:$0xff]  ;;  %v2621_v53 = vpop.f32.mrf.mxu0 }
 0x127   : > { %v2706_v30 = vpop.f32.mrf.mxu1  ;;  %v3880_v11 = vadd.f32 %v2621_v53, %v2620_v50  ;;  %v837_v60 = vpack.c.bf16 %v652_v62, %v651_v29  ;;  %v690_v50 = vld [vmem:[#allocation2 + $0x1a1] sm:$0xff] }
 0x128   : > { %v2707_v44 = vadd.f32 %v2706_v30, %v2705_v33  ;;  %v2623_v40 = vpop.f32.mrf.mxu0 }
 0x129   : > { %v2708_v32 = vpop.f32.mrf.mxu1  ;;  %2047 = vmatmul.mubr.bf16.gmra.mxu1 %v828_v35 }
 0x12a   : > { %v3876_v25 = vadd.f32 %v2707_v44, %v3822_v12  ;;  %2054 = vmatprep.mubr.bf16.mxu1 %v3792_v39  ;;  %v2624_v43 = vpop.f32.mrf.mxu0  ;;  %v689_v44 = vld [vmem:[#allocation2 + $0x199] sm:$0xff] }
 0x12b   : > { %v2709_v36 = vpop.f32.mrf.mxu1  ;;  %v3885_v20 = vadd.f32 %v2624_v43, %v2623_v40  ;;  %v722_v43 = vld [vmem:[#allocation2 + $0x1a2] sm:$0xff] }
 0x12c   : > { %v2710_v55 = vadd.f32 %v2709_v36, %v2708_v32  ;;  %v2626_v27 = vpop.f32.mrf.mxu0  ;;  %3067 = vmatmul.mubr.bf16.gmra.mxu0 %v3733_v56 }
 0x12d   : > { %v2711_v52 = vpop.f32.mrf.mxu1  ;;  %3070 = vmatprep.mubr.bf16.mxu0 %v3742_v0 }
 0x12e   : > { %v3883_v63 = vadd.f32 %v2710_v55, %v3829_v2  ;;  %v654_v2 = vld [vmem:[#allocation2 + $0x170] sm:$0xff]  ;;  %v2627_v13 = vpop.f32.mrf.mxu0 }
 0x12f   : > { %v2712_v12 = vpop.f32.mrf.mxu1  ;;  %v3893_v16 = vadd.f32 %v2627_v13, %v2626_v27  ;;  %v846_v26 = vpack.c.bf16 %v654_v2, %v653_v61  ;;  %v3179_v13 = vld [vmem:[#allocation2] sm:$0xff] }
 0x130   : > { %v2713_v39 = vadd.f32 %v2712_v12, %v2711_v52  ;;  %v2629_v21 = vpop.f32.mrf.mxu0 }
 0x131   : > { %v2714_v47 = vpop.f32.mrf.mxu1  ;;  %2055 = vmatmul.mubr.bf16.gmra.mxu1 %v837_v60 }
 0x132   : > { %v3889_v4 = vadd.f32 %v2713_v39, %v3833_v5  ;;  %2062 = vmatprep.mubr.bf16.mxu1 %v3806_v23  ;;  %v2630_v56 = vpop.f32.mrf.mxu0 }
 0x133   : > { %v2715_v58 = vpop.f32.mrf.mxu1  ;;  %v3898_v33 = vadd.f32 %v2630_v56, %v2629_v21 }
 0x134   : > { %v2716_v15 = vadd.f32 %v2715_v58, %v2714_v47  ;;  %v2632_v35 = vpop.f32.mrf.mxu0  ;;  %3071 = vmatmul.mubr.bf16.gmra.mxu0 %v3748_v9  ;;  %v865_v9 = vpack.c.bf16 %v690_v50, %v689_v44  ;;  %v864_v58 = vpack.c.bf16 %v3179_v13, %v3179_v13 }
 0x135   : > { %v2717_v22 = vpop.f32.mrf.mxu1  ;;  %3074 = vmatprep.mubr.bf16.mxu0 %v3754_v10 }
 0x136   : > { %v3896_v31 = vadd.f32 %v2716_v15, %v3839_v42  ;;  %v2633_v30 = vpop.f32.mrf.mxu0 }
 0x137   : > { %v2718_v5 = vpop.f32.mrf.mxu1  ;;  %v3906_v32 = vadd.f32 %v2633_v30, %v2632_v35 }
 0x138   : > { %v2719_v23 = vadd.f32 %v2718_v5, %v2717_v22  ;;  %v2635_v62 = vpop.f32.mrf.mxu0 }
 0x139   : > { %v2720_v0 = vpop.f32.mrf.mxu1  ;;  %2063 = vmatmul.mubr.bf16.gmra.mxu1 %v846_v26 }
 0x13a   : > { %v3902_v8 = vadd.f32 %v2719_v23, %v3844_v46  ;;  %2070 = vmatprep.mubr.bf16.mxu1 %v3688_v28  ;;  %v2636_v55 = vpop.f32.mrf.mxu0 }
 0x13b   : > { %v2721_v42 = vpop.f32.mrf.mxu1  ;;  %v3911_v40 = vadd.f32 %v2636_v55, %v2635_v62 }
 0x13c   : > { %v2722_v29 = vadd.f32 %v2721_v42, %v2720_v0  ;;  %v2638_v52 = vpop.f32.mrf.mxu0  ;;  %3075 = vmatmul.mubr.bf16.gmra.mxu0 %v3762_v19 }
 0x13d   : > { %v2723_v53 = vpop.f32.mrf.mxu1  ;;  %3078 = vmatprep.mubr.bf16.mxu0 %v3808_v24 }
 0x13e   : > { %v3909_v36 = vadd.f32 %v2722_v29, %v3853_v51  ;;  %v721_v51 = vld [vmem:[#allocation2 + $0x19a] sm:$0xff]  ;;  %v2639_v12 = vpop.f32.mrf.mxu0 }
 0x13f   : > { %v2724_v46 = vpop.f32.mrf.mxu1  ;;  %v3919_v27 = vadd.f32 %v2639_v12, %v2638_v52 }
 0x140   : > { %v2725_v28 = vadd.f32 %v2724_v46, %v2723_v53  ;;  %v2641_v61 = vpop.f32.mrf.mxu0 }
 0x141   : > { %v2726_v10 = vpop.f32.mrf.mxu1  ;;  %2071 = vmatmul.mubr.bf16.gmra.mxu1 %v3756_v37  ;;  %v866_v37 = vpack.c.bf16 %v722_v43, %v721_v51 }
 0x142   : > { %v3916_v60 = vadd.f32 %v2725_v28, %v3858_v6  ;;  %2078 = vmatprep.mubr.bf16.mxu1 %v865_v9  ;;  %v2642_v6 = vpop.f32.mrf.mxu0 }
 0x143   : > { %v2727_v39 = vpop.f32.mrf.mxu1  ;;  %v3924_v21 = vadd.f32 %v2642_v6, %v2641_v61 }
 0x144   : > { %v2728_v47 = vadd.f32 %v2727_v39, %v2726_v10  ;;  %v2644_v22 = vpop.f32.mrf.mxu0  ;;  %3079 = vmatmul.mubr.bf16.gmra.mxu0 %v866_v37 }
 0x145   : > { %v2729_v2 = vpop.f32.mrf.mxu1 }
 0x146   : > { %v3922_v19 = vadd.f32 %v2728_v47, %v3867_v38  ;;  %v2645_v5 = vpop.f32.mrf.mxu0 }
 0x147   : > { %v2730_v15 = vpop.f32.mrf.mxu1  ;;  %v3929_v35 = vadd.f32 %v2645_v5, %v2644_v22 }
 0x148   : > { %v2731_v24 = vadd.f32 %v2730_v15, %v2729_v2  ;;  %v2647_v30 = vpop.f32.mrf.mxu0 }
 0x149   : > { %v2732_v26 = vpop.f32.mrf.mxu1  ;;  %2079 = vmatmul.mubr.bf16.gmra.mxu1 %v864_v58 }
 0x14a   : > { %v3927_v56 = vadd.f32 %v2731_v24, %v3872_v54  ;;  %v2648_v44 = vpop.f32.mrf.mxu0 }
 0x14b   : > { %v2733_v23 = vpop.f32.mrf.mxu1  ;;  %v3934_v29 = vadd.f32 %v2648_v44, %v2647_v30 }
 0x14c   : > { %v2734_v0 = vadd.f32 %v2733_v23, %v2732_v26  ;;  %v2802_v9 = vpop.f32.mrf.mxu0 }
 0x14d   : > { %v2735_v38 = vpop.f32.mrf.mxu1 }
 0x14e   : > { %v3932_v42 = vadd.f32 %v2734_v0, %v3880_v11  ;;  %v2803_v46 = vpop.f32.mrf.mxu0 }
 0x14f   : > { %v2736_v50 = vpop.f32.mrf.mxu1  ;;  %v2804_v52 = vadd.f32 %v2803_v46, %v2802_v9 }
 0x150   : > { %v2737_v62 = vadd.f32 %v2736_v50, %v2735_v38  ;;  %v2805_v51 = vpop.f32.mrf.mxu0 }
 0x151   : > { %v2738_v53 = vpop.f32.mrf.mxu1  ;;  %v3943_v11 = vadd.f32 %v2804_v52, %v3842_v45 }
 0x152   : > { %v3937_v54 = vadd.f32 %v2737_v62, %v3885_v20  ;;  %v2806_v39 = vpop.f32.mrf.mxu0 }
 0x153   : > { %v2739_v55 = vpop.f32.mrf.mxu1  ;;  %v2807_v61 = vadd.f32 %v2806_v39, %v2805_v51 }
 0x154   : > { %v2740_v28 = vadd.f32 %v2739_v55, %v2738_v53  ;;  %v2808_v13 = vpop.f32.mrf.mxu0 }
 0x155   : > { %v2741_v10 = vpop.f32.mrf.mxu1  ;;  %v3949_v58 = vadd.f32 %v2807_v61, %v3849_v18 }
 0x156   : > { %v3940_v43 = vadd.f32 %v2740_v28, %v3893_v16  ;;  %v2809_v6 = vpop.f32.mrf.mxu0 }
 0x157   : > { %v2742_v12 = vpop.f32.mrf.mxu1  ;;  %v2810_v16 = vadd.f32 %v2809_v6, %v2808_v13 }
 0x158   : > { %v2743_v47 = vadd.f32 %v2742_v12, %v2741_v10  ;;  %v2811_v22 = vpop.f32.mrf.mxu0 }
 0x159   : > { %v2744_v2 = vpop.f32.mrf.mxu1  ;;  %v3955_v26 = vadd.f32 %v2810_v16, %v3856_v1 }
 0x15a   : > { %v3946_v20 = vadd.f32 %v2743_v47, %v3898_v33  ;;  %v2812_v23 = vpop.f32.mrf.mxu0 }
 0x15b   : > { %v2745_v37 = vpop.f32.mrf.mxu1  ;;  %v2813_v33 = vadd.f32 %v2812_v23, %v2811_v22 }
 0x15c   : > { %v2746_v15 = vadd.f32 %v2745_v37, %v2744_v2  ;;  %v2814_v38 = vpop.f32.mrf.mxu0 }
 0x15d   : > { %v2747_v24 = vpop.f32.mrf.mxu1  ;;  %v3961_v44 = vadd.f32 %v2813_v33, %v3863_v14 }
 0x15e   : > { %v3952_v45 = vadd.f32 %v2746_v15, %v3906_v32  ;;  %v2815_v62 = vpop.f32.mrf.mxu0 }
 0x15f   : > { %v2748_v5 = vpop.f32.mrf.mxu1  ;;  %v2816_v32 = vadd.f32 %v2815_v62, %v2814_v38 }
 0x160   : > { %v2749_v0 = vadd.f32 %v2748_v5, %v2747_v24  ;;  %v2817_v55 = vpop.f32.mrf.mxu0 }
 0x161   : > { %v2750_v30 = vpop.f32.mrf.mxu1  ;;  %v3967_v46 = vadd.f32 %v2816_v32, %v3870_v48 }
 0x162   : > { %v3958_v18 = vadd.f32 %v2749_v0, %v3911_v40  ;;  %v2818_v52 = vpop.f32.mrf.mxu0 }
 0x163   : > { %v2751_v50 = vpop.f32.mrf.mxu1  ;;  %v2819_v40 = vadd.f32 %v2818_v52, %v2817_v55 }
 0x164   : > { %v2752_v53 = vadd.f32 %v2751_v50, %v2750_v30  ;;  %v2820_v12 = vpop.f32.mrf.mxu0 }
 0x165   : > { %v2753_v9 = vpop.f32.mrf.mxu1  ;;  %v3973_v39 = vadd.f32 %v2819_v40, %v3876_v25 }
 0x166   : > { %v3964_v1 = vadd.f32 %v2752_v53, %v3919_v27  ;;  %v2821_v61 = vpop.f32.mrf.mxu0 }
 0x167   : > { %v2754_v28 = vpop.f32.mrf.mxu1  ;;  %v2822_v27 = vadd.f32 %v2821_v61, %v2820_v12 }
 0x168   : > { %v2755_v10 = vadd.f32 %v2754_v28, %v2753_v9  ;;  %v2823_v37 = vpop.f32.mrf.mxu0 }
 0x169   : > { %v2756_v51 = vpop.f32.mrf.mxu1  ;;  %v3979_v6 = vadd.f32 %v2822_v27, %v3883_v63 }
 0x16a   : > { %v3970_v14 = vadd.f32 %v2755_v10, %v3924_v21  ;;  %v2824_v16 = vpop.f32.mrf.mxu0 }
 0x16b   : > { %v2757_v47 = vpop.f32.mrf.mxu1  ;;  %v2825_v21 = vadd.f32 %v2824_v16, %v2823_v37 }
 0x16c   : > { %v2758_v2 = vadd.f32 %v2757_v47, %v2756_v51  ;;  %v2826_v5 = vpop.f32.mrf.mxu0 }
 0x16d   : > { %v2759_v13 = vpop.f32.mrf.mxu1  ;;  %v3985_v23 = vadd.f32 %v2825_v21, %v3889_v4 }
 0x16e   : > { %v3976_v48 = vadd.f32 %v2758_v2, %v3929_v35  ;;  %v2827_v33 = vpop.f32.mrf.mxu0 }
 0x16f   : > { %v2760_v15 = vpop.f32.mrf.mxu1  ;;  %v2828_v35 = vadd.f32 %v2827_v33, %v2826_v5 }
 0x170   : > { %v2761_v24 = vadd.f32 %v2760_v15, %v2759_v13  ;;  %v2829_v50 = vpop.f32.mrf.mxu0 }
 0x171   : > { %v2762_v22 = vpop.f32.mrf.mxu1  ;;  %v3991_v62 = vadd.f32 %v2828_v35, %v3896_v31 }
 0x172   : > { %v3982_v25 = vadd.f32 %v2761_v24, %v3934_v29  ;;  %v2830_v32 = vpop.f32.mrf.mxu0 }
 0x173   : > { %v2763_v0 = vpop.f32.mrf.mxu1  ;;  %v2831_v29 = vadd.f32 %v2830_v32, %v2829_v50 }
 0x174   : > { %v2764_v30 = vadd.f32 %v2763_v0, %v2762_v22  ;;  %v2832_v28 = vpop.f32.mrf.mxu0 }
 0x175   : > { %v2765_v38 = vpop.f32.mrf.mxu1  ;;  %v3997_v52 = vadd.f32 %v2831_v29, %v3902_v8 }
 0x176   : > { %v3988_v63 = vadd.f32 %v2764_v30, %v3790_v59  ;;  %v2833_v40 = vpop.f32.mrf.mxu0 }
 0x177   : > { %v2766_v53 = vpop.f32.mrf.mxu1  ;;  %v2834_v59 = vadd.f32 %v2833_v40, %v2832_v28 }
 0x178   : > { %v2767_v9 = vadd.f32 %v2766_v53, %v2765_v38  ;;  %v2835_v47 = vpop.f32.mrf.mxu0 }
 0x179   : > { %v2768_v55 = vpop.f32.mrf.mxu1  ;;  %v4003_v61 = vadd.f32 %v2834_v59, %v3909_v36 }
 0x17a   : > { %v3994_v4 = vadd.f32 %v2767_v9, %v3796_v57  ;;  %v2836_v27 = vpop.f32.mrf.mxu0 }
 0x17b   : > { %v2769_v10 = vpop.f32.mrf.mxu1  ;;  %v2837_v57 = vadd.f32 %v2836_v27, %v2835_v47 }
 0x17c   : > { %v2770_v51 = vadd.f32 %v2769_v10, %v2768_v55  ;;  %v2838_v15 = vpop.f32.mrf.mxu0 }
 0x17d   : > { %v2771_v12 = vpop.f32.mrf.mxu1  ;;  %v4009_v16 = vadd.f32 %v2837_v57, %v3916_v60 }
 0x17e   : > { %v4000_v31 = vadd.f32 %v2770_v51, %v3804_v17  ;;  %v2839_v21 = vpop.f32.mrf.mxu0 }
 0x17f   : > { %v2772_v2 = vpop.f32.mrf.mxu1  ;;  %v2840_v17 = vadd.f32 %v2839_v21, %v2838_v15 }
 0x180   : > { %v2773_v13 = vadd.f32 %v2772_v2, %v2771_v12  ;;  %v2841_v0 = vpop.f32.mrf.mxu0 }
 0x181   : > { %v2774_v37 = vpop.f32.mrf.mxu1  ;;  %v4015_v33 = vadd.f32 %v2840_v17, %v3922_v19 }
 0x182   : > { %v4006_v8 = vadd.f32 %v2773_v13, %v3812_v41  ;;  %v2842_v35 = vpop.f32.mrf.mxu0 }
 0x183   : > { %v2775_v24 = vpop.f32.mrf.mxu1  ;;  %v2843_v41 = vadd.f32 %v2842_v35, %v2841_v0 }
 0x184   : > { %v2776_v22 = vadd.f32 %v2775_v24, %v2774_v37  ;;  %v2844_v53 = vpop.f32.mrf.mxu0 }
 0x185   : > { %v2777_v5 = vpop.f32.mrf.mxu1  ;;  %v4021_v32 = vadd.f32 %v2843_v41, %v3927_v56 }
 0x186   : > { %v4012_v36 = vadd.f32 %v2776_v22, %v3820_v34  ;;  %v2845_v29 = vpop.f32.mrf.mxu0 }
 0x187   : > { %v2778_v30 = vpop.f32.mrf.mxu1  ;;  %v2846_v34 = vadd.f32 %v2845_v29, %v2844_v53 }
 0x188   : > { %v2779_v38 = vadd.f32 %v2778_v30, %v2777_v5  ;;  %v2847_v10 = vpop.f32.mrf.mxu0 }
 0x189   : > { %v2780_v50 = vpop.f32.mrf.mxu1  ;;  %v4027_v40 = vadd.f32 %v2846_v34, %v3932_v42 }
 0x18a   : > { %v4018_v60 = vadd.f32 %v2779_v38, %v3824_v49  ;;  %v2848_v59 = vpop.f32.mrf.mxu0 }
 0x18b   : > { %v2781_v9 = vpop.f32.mrf.mxu1  ;;  %v2849_v49 = vadd.f32 %v2848_v59, %v2847_v10 }
 0x18c   : > { %v2782_v55 = vadd.f32 %v2781_v9, %v2780_v50  ;;  %v2850_v47 = vpop.f32.mrf.mxu0 }
 0x18d   : > { %v2783_v28 = vpop.f32.mrf.mxu1  ;;  %v4035_v27 = vadd.f32 %v2849_v49, %v3937_v54 }
 0x18e   : > { %v4024_v19 = vadd.f32 %v2782_v55, %v3831_v3  ;;  %v2851_v13 = vpop.f32.mrf.mxu0 }
 0x18f   : > { %v2784_v51 = vpop.f32.mrf.mxu1  ;;  %v2852_v3 = vadd.f32 %v2851_v13, %v2850_v47 }
 0x190   : > { %v2785_v12 = vadd.f32 %v2784_v51, %v2783_v28  ;;  %v2853_v37 = vpop.f32.mrf.mxu0 }
 0x191   : > { %v4029_v2 = vpop.f32.mrf.mxu1  ;;  %v4042_v15 = vadd.f32 %v2852_v3, %v3940_v43 }
 0x192   : > { %v4032_v56 = vadd.f32 %v2785_v12, %v3835_v7  ;;  %v2854_v24 = vpop.f32.mrf.mxu0 }
 0x193   : > { %v4037_v57 = vpop.f32.mrf.mxu1  ;;  %v2855_v22 = vadd.f32 %v2854_v24, %v2853_v37 }
 0x194   : > { %v2856_v17 = vpop.f32.mrf.mxu0 }
 0x195   : > { %v4039_v42 = vpop.f32.mrf.mxu1  ;;  %v4049_v54 = vadd.f32 %v2855_v22, %v3946_v20 }
 0x196   : > { %v2857_v5 = vpop.f32.mrf.mxu0 }
 0x197   : > { %v4044_v21 = vpop.f32.mrf.mxu1  ;;  %4299 = vst [vmem:[#allocation3_spill] sm:$0xff] %v4049_v54  ;;  %v2858_v30 = vadd.f32 %v2857_v5, %v2856_v17 }
 0x198   : > { %v2859_v35 = vpop.f32.mrf.mxu0 }
 0x199   : > { %v4046_v7 = vpop.f32.mrf.mxu1  ;;  %v4056_v43 = vadd.f32 %v2858_v30, %v3952_v45 }
 0x19a   : > { %v2860_v41 = vpop.f32.mrf.mxu0 }
 0x19b   : > { %v4051_v0 = vpop.f32.mrf.mxu1  ;;  %v2861_v53 = vadd.f32 %v2860_v41, %v2859_v35 }
 0x19c   : > { %v2862_v9 = vpop.f32.mrf.mxu0 }
 0x19d   : > { %v4053_v38 = vpop.f32.mrf.mxu1  ;;  %v4063_v20 = vadd.f32 %v2861_v53, %v3958_v18 }
 0x19e   : > { %v2863_v55 = vpop.f32.mrf.mxu0 }
 0x19f   : > { %v4058_v50 = vpop.f32.mrf.mxu1  ;;  %v2864_v28 = vadd.f32 %v2863_v55, %v2862_v9 }
 0x1a0   : > { %v2865_v10 = vpop.f32.mrf.mxu0 }
 0x1a1   : > { %v4060_v29 = vpop.f32.mrf.mxu1  ;;  %v4070_v45 = vadd.f32 %v2864_v28, %v3964_v1 }
 0x1a2   : > { %v2866_v59 = vpop.f32.mrf.mxu0 }
 0x1a3   : > { %v4065_v34 = vpop.f32.mrf.mxu1  ;;  %4300 = vst [vmem:[#allocation4_spill] sm:$0xff] %v4070_v45  ;;  %v2867_v49 = vadd.f32 %v2866_v59, %v2865_v10 }
 0x1a4   : > { %v2868_v47 = vpop.f32.mrf.mxu0 }
 0x1a5   : > { %v4067_v51 = vpop.f32.mrf.mxu1  ;;  %v4077_v18 = vadd.f32 %v2867_v49, %v3970_v14 }
 0x1a6   : > { %v2869_v3 = vpop.f32.mrf.mxu0 }
 0x1a7   : > { %v4072_v12 = vpop.f32.mrf.mxu1  ;;  %4301 = vst [vmem:[#allocation5_spill] sm:$0xff] %v4077_v18  ;;  %v2870_v24 = vadd.f32 %v2869_v3, %v2868_v47 }
 0x1a8   : > { %v2871_v22 = vpop.f32.mrf.mxu0 }
 0x1a9   : > { %v4074_v13 = vpop.f32.mrf.mxu1  ;;  %v4084_v1 = vadd.f32 %v2870_v24, %v3976_v48 }
 0x1aa   : > { %v2872_v5 = vpop.f32.mrf.mxu0 }
 0x1ab   : > { %v4079_v37 = vpop.f32.mrf.mxu1  ;;  %4302 = vst [vmem:[#allocation6_spill] sm:$0xff] %v4084_v1  ;;  %v2873_v35 = vadd.f32 %v2872_v5, %v2871_v22 }
 0x1ac   : > { %v2874_v41 = vpop.f32.mrf.mxu0 }
 0x1ad   : > { %v4081_v17 = vpop.f32.mrf.mxu1  ;;  %v4091_v14 = vadd.f32 %v2873_v35, %v3982_v25 }
 0x1ae   : > { %v2875_v9 = vpop.f32.mrf.mxu0 }
 0x1af   : > { %v4086_v30 = vpop.f32.mrf.mxu1  ;;  %4303 = vst [vmem:[#allocation7_spill] sm:$0xff] %v4091_v14  ;;  %v2876_v28 = vadd.f32 %v2875_v9, %v2874_v41 }
 0x1b0   : > { %v2877_v10 = vpop.f32.mrf.mxu0 }
 0x1b1   : > { %v4088_v53 = vpop.f32.mrf.mxu1  ;;  %v4098_v48 = vadd.f32 %v2876_v28, %v3988_v63 }
 0x1b2   : > { %v2878_v49 = vpop.f32.mrf.mxu0 }
 0x1b3   : > { %v4093_v55 = vpop.f32.mrf.mxu1  ;;  %4304 = vst [vmem:[#allocation8_spill] sm:$0xff] %v4098_v48  ;;  %v2879_v3 = vadd.f32 %v2878_v49, %v2877_v10 }
 0x1b4   : > { %v2880_v24 = vpop.f32.mrf.mxu0 }
 0x1b5   : > { %v4095_v59 = vpop.f32.mrf.mxu1  ;;  %v4105_v25 = vadd.f32 %v2879_v3, %v3994_v4 }
 0x1b6   : > { %v2881_v5 = vpop.f32.mrf.mxu0 }
 0x1b7   : > { %v4100_v47 = vpop.f32.mrf.mxu1  ;;  %4305 = vst [vmem:[#allocation9_spill] sm:$0xff] %v4105_v25  ;;  %v2882_v41 = vadd.f32 %v2881_v5, %v2880_v24 }
 0x1b8   : > { %v2883_v9 = vpop.f32.mrf.mxu0 }
 0x1b9   : > { %v4102_v22 = vpop.f32.mrf.mxu1  ;;  %v4112_v63 = vadd.f32 %v2882_v41, %v4000_v31 }
 0x1ba   : > { %v2884_v28 = vpop.f32.mrf.mxu0 }
 0x1bb   : > { %v4107_v35 = vpop.f32.mrf.mxu1  ;;  %4306 = vst [vmem:[#allocation10_spill] sm:$0xff] %v4112_v63  ;;  %v2885_v10 = vadd.f32 %v2884_v28, %v2883_v9 }
 0x1bc   : > { %v2886_v49 = vpop.f32.mrf.mxu0 }
 0x1bd   : > { %v4109_v18 = vpop.f32.mrf.mxu1  ;;  %v4119_v4 = vadd.f32 %v2885_v10, %v4006_v8 }
 0x1be   : > { %v2887_v3 = vpop.f32.mrf.mxu0 }
 0x1bf   : > { %v4114_v48 = vpop.f32.mrf.mxu1  ;;  %4307 = vst [vmem:[#allocation11_spill] sm:$0xff] %v4119_v4  ;;  %v2888_v24 = vadd.f32 %v2887_v3, %v2886_v49  ;;  %v2922_v49 = vadd.f32 %v4051_v0, %v4046_v7 }
 0x1c0   : > { %v2889_v5 = vpop.f32.mrf.mxu0 }
 0x1c1   : > { %v4116_v14 = vpop.f32.mrf.mxu1  ;;  %v4126_v31 = vadd.f32 %v2888_v24, %v4012_v36 }
 0x1c2   : > { %v2890_v41 = vpop.f32.mrf.mxu0 }
 0x1c3   : > { %v4121_v25 = vpop.f32.mrf.mxu1  ;;  %4308 = vst [vmem:[#allocation12_spill] sm:$0xff] %v4126_v31  ;;  %v2891_v9 = vadd.f32 %v2890_v41, %v2889_v5  ;;  %v2916_v5 = vadd.f32 %v4037_v57, %v4029_v2  ;;  %v2919_v2 = vadd.f32 %v4044_v21, %v4039_v42 }
 0x1c4   : > { %v2892_v28 = vpop.f32.mrf.mxu0 }
 0x1c5   : > { %v4123_v45 = vpop.f32.mrf.mxu1  ;;  %v4133_v8 = vadd.f32 %v2891_v9, %v4018_v60  ;;  %v2925_v60 = vadd.f32 %v4058_v50, %v4053_v38  ;;  %v1964_v21 = vadd.f32 %v2919_v2, %v3949_v58 }
 0x1c6   : > { %v2893_v10 = vpop.f32.mrf.mxu0 }
 0x1c7   : > { %v4128_v63 = vpop.f32.mrf.mxu1  ;;  %4309 = vst [vmem:[#allocation13_spill] sm:$0xff] %v4133_v8  ;;  %v2894_v3 = vadd.f32 %v2893_v10, %v2892_v28  ;;  %v1969_v8 = vadd.f32 %v2922_v49, %v3955_v26  ;;  %v1961_v26 = vadd.f32 %v2916_v5, %v3943_v11  ;;  %v1972_v10 = vadd.f32 %v2925_v60, %v3961_v44 }
 0x1c8   : > { %v2895_v36 = vpop.f32.mrf.mxu0  ;;  %v2928_v11 = vadd.f32 %v4065_v34, %v4060_v29  ;;  %v2931_v29 = vadd.f32 %v4072_v12, %v4067_v51  ;;  %v2946_v34 = vadd.f32 %v4107_v35, %v4102_v22 }
 0x1c9   : > { %v4130_v1 = vpop.f32.mrf.mxu1  ;;  %v4144_v41 = vadd.f32 %v2894_v3, %v4024_v19 }
 0x1ca   : > { %v2896_v31 = vpop.f32.mrf.mxu0 }
 0x1cb   : > { %v4135_v4 = vpop.f32.mrf.mxu1  ;;  %v2897_v9 = vadd.f32 %v2896_v31, %v2895_v36  ;;  %v2934_v31 = vadd.f32 %v4079_v37, %v4074_v13  ;;  %v2937_v13 = vadd.f32 %v4086_v30, %v4081_v17 }
 0x1cc   : > { %v3052_v19 = vpop.f32.mrf.mxu0 }
 0x1cd   : > { %v4139_v24 = vpop.f32.mrf.mxu1  ;;  %v4163_v57 = vadd.f32 %v2897_v9, %v4032_v56  ;;  %v2130_v0 = vadd.f32 %v3052_v19, %v1969_v8  ;;  %v1985_v44 = vadd.f32 %v2934_v31, %v3979_v6  ;;  %v1977_v6 = vadd.f32 %v2928_v11, %v3967_v46 }
 0x1ce   : > { %v2121_v50 = vpop.f32.mrf.mxu0  ;;  %v1988_v31 = vadd.f32 %v2937_v13, %v3985_v23  ;;  %v2001_v23 = vadd.f32 %v2946_v34, %v4003_v61 }
 0x1cf   : > { %v4146_v54 = vpop.f32.mrf.mxu1  ;;  %2250 = vst [vmem:[%s4158_s24 + $0x10] sm:$0xff] %v2130_v0  ;;  %v2122_v28 = vadd.f32 %v2121_v50, %v1961_v26  ;;  %v2320_v2 = vmul.f32 %v2130_v0, %v2130_v0 }
 0x1d0   : > { %v3053_v42 = vpop.f32.mrf.mxu0 }
 0x1d1   : > { %v4151_v7 = vpop.f32.mrf.mxu1  ;;  %2248 = vst [vmem:[%s4158_s24] sm:$0xff] %v2122_v28  ;;  %v2133_v56 = vadd.f32 %v3053_v42, %v1972_v10  ;;  %v2318_v60 = vmul.f32 %v2122_v28, %v2122_v28 }
 0x1d2   : > { %v2124_v3 = vpop.f32.mrf.mxu0 }
 0x1d3   : > { %v4166_v38 = vpop.f32.mrf.mxu1  ;;  %2251 = vst [vmem:[%s4158_s24 + $0x18] sm:$0xff] %v2133_v56  ;;  %v2125_v37 = vadd.f32 %v2124_v3, %v1964_v21  ;;  %v2321_v22 = vmul.f32 %v2133_v56, %v2133_v56 }
 0x1d4   : > { %v3056_v5 = vpop.f32.mrf.mxu0 }
 0x1d5   : > { %v4172_v49 = vpop.f32.mrf.mxu1  ;;  %2249 = vst [vmem:[%s4158_s24 + $0x8] sm:$0xff] %v2125_v37  ;;  %v2280_v58 = vadd.f32 %v2125_v37, %v2122_v28  ;;  %v2319_v9 = vmul.f32 %v2125_v37, %v2125_v37  ;;  %v2146_v19 = vadd.f32 %v3056_v5, %v1985_v44  ;;  %v2940_v28 = vadd.f32 %v4093_v55, %v4088_v53 }
 0x1d6   : > { %v2137_v30 = vpop.f32.mrf.mxu0  ;;  %v2949_v53 = vadd.f32 %v4114_v48, %v4109_v18  ;;  %v2943_v5 = vadd.f32 %v4100_v47, %v4095_v59 }
 0x1d7   : > { %v4178_v8 = vpop.f32.mrf.mxu1  ;;  %v2281_v26 = vadd.f32 %v2280_v58, %v2130_v0  ;;  %v2350_v50 = vadd.f32 %v2319_v9, %v2318_v60  ;;  %2254 = vst [vmem:[%s4158_s24 + $0x30] sm:$0xff] %v2146_v19  ;;  %v2138_v10 = vadd.f32 %v2137_v30, %v1977_v6  ;;  %v1980_v0 = vadd.f32 %v2931_v29, %v3973_v39 }
 0x1d8   : > { %v3057_v12 = vpop.f32.mrf.mxu0  ;;  %v1993_v58 = vadd.f32 %v2940_v28, %v3991_v62  ;;  %v2958_v29 = vadd.f32 %v4135_v4, %v4130_v1  ;;  %v2004_v6 = vadd.f32 %v2949_v53, %v4009_v16  ;;  %v2324_v59 = vmul.f32 %v2146_v19, %v2146_v19 }
 0x1d9   : > { %v4184_v36 = vpop.f32.mrf.mxu1  ;;  %v2351_v35 = vadd.f32 %v2350_v50, %v2320_v2  ;;  %v2282_v42 = vadd.f32 %v2281_v26, %v2133_v56  ;;  %v2149_v21 = vadd.f32 %v3057_v12, %v1988_v31  ;;  %2252 = vst [vmem:[%s4158_s24 + $0x20] sm:$0xff] %v2138_v10  ;;  %v2322_v3 = vmul.f32 %v2138_v10, %v2138_v10 }
 0x1da   : > { %v2140_v11 = vpop.f32.mrf.mxu0  ;;  %v2952_v26 = vadd.f32 %v4121_v25, %v4116_v14  ;;  %v1996_v31 = vadd.f32 %v2943_v5, %v3997_v52 }
 0x1db   : > { %v4191_v17 = vpop.f32.mrf.mxu1  ;;  %v2283_v55 = vadd.f32 %v2282_v42, %v2138_v10  ;;  %v2352_v13 = vadd.f32 %v2351_v35, %v2321_v22  ;;  %2255 = vst [vmem:[%s4158_s24 + $0x38] sm:$0xff] %v2149_v21  ;;  %v2141_v37 = vadd.f32 %v2140_v11, %v1980_v0  ;;  %v2325_v1 = vmul.f32 %v2149_v21, %v2149_v21 }
 0x1dc   : > { %v3060_v44 = vpop.f32.mrf.mxu0  ;;  %v2017_v22 = vadd.f32 %v2958_v29, %v4027_v40  ;;  %v2955_v0 = vadd.f32 %v4128_v63, %v4123_v45  ;;  %v2970_v40 = vadd.f32 %v4191_v17, %v4184_v36 }
 0x1dd   : > { %v4198_v51 = vpop.f32.mrf.mxu1  ;;  %v2353_v60 = vadd.f32 %v2352_v13, %v2322_v3  ;;  %v2162_v39 = vadd.f32 %v3060_v44, %v2001_v23  ;;  %2253 = vst [vmem:[%s4158_s24 + $0x28] sm:$0xff] %v2141_v37  ;;  %v2284_v61 = vadd.f32 %v2283_v55, %v2141_v37  ;;  %v2323_v18 = vmul.f32 %v2141_v37, %v2141_v37 }
 0x1de   : > { %v2153_v9 = vpop.f32.mrf.mxu0  ;;  %v2009_v23 = vadd.f32 %v2952_v26, %v4015_v33  ;;  %v2964_v33 = vadd.f32 %v4166_v38, %v4151_v7  ;;  %v2033_v29 = vadd.f32 %v2970_v40, %v4056_v43 }
 0x1df   : > { %v4201_v46 = vpop.f32.mrf.mxu1  ;;  %2258 = vst [vmem:[%s4158_s24 + $0x50] sm:$0xff] %v2162_v39  ;;  %v2154_v34 = vadd.f32 %v2153_v9, %v1993_v58  ;;  %v2285_v47 = vadd.f32 %v2284_v61, %v2146_v19  ;;  %v2354_v30 = vadd.f32 %v2353_v60, %v2323_v18  ;;  %v2961_v19 = vadd.f32 %v4146_v54, %v4139_v24 }
 0x1e0   : > { %v3061_v62 = vpop.f32.mrf.mxu0  ;;  %v2328_v37 = vmul.f32 %v2162_v39, %v2162_v39  ;;  %v2012_v58 = vadd.f32 %v2955_v0, %v4021_v32  ;;  %v2967_v32 = vadd.f32 %v4178_v8, %v4172_v49 }
 0x1e1   : > { %v4208_v56 = vpop.f32.mrf.mxu1  ;;  %2256 = vst [vmem:[%s4158_s24 + $0x40] sm:$0xff] %v2154_v34  ;;  %v2165_v50 = vadd.f32 %v3061_v62, %v2004_v6  ;;  %v2355_v4 = vadd.f32 %v2354_v30, %v2324_v59  ;;  %v2286_v28 = vadd.f32 %v2285_v47, %v2149_v21  ;;  %v2326_v25 = vmul.f32 %v2154_v34, %v2154_v34 }
 0x1e2   : > { %v2156_v16 = vpop.f32.mrf.mxu0  ;;  %v2020_v13 = vadd.f32 %v2961_v19, %v4035_v27  ;;  %v2973_v27 = vadd.f32 %v4201_v46, %v4198_v51  ;;  %v2025_v62 = vadd.f32 %v2964_v33, %v4042_v15 }
 0x1e3   : > { %v4214_v48 = vpop.f32.mrf.mxu1  ;;  %2259 = vst [vmem:[%s4158_s24 + $0x58] sm:$0xff] %v2165_v50  ;;  %v2157_v12 = vadd.f32 %v2156_v16, %v1996_v31  ;;  %v2287_v14 = vadd.f32 %v2286_v28, %v2154_v34  ;;  %v2356_v35 = vadd.f32 %v2355_v4, %v2325_v1  ;;  %v2329_v61 = vmul.f32 %v2165_v50, %v2165_v50 }
 0x1e4   : > { %v3064_v52 = vpop.f32.mrf.mxu0  ;;  %v2036_v1 = vadd.f32 %v2973_v27, %v4063_v20  ;;  %v2976_v19 = vadd.f32 %v4214_v48, %v4208_v56  ;;  %v4314_v27 = vld [vmem:[#allocation5_spill] sm:$0xff] }
 0x1e5   : > { %v4220_v2 = vpop.f32.mrf.mxu1  ;;  %2257 = vst [vmem:[%s4158_s24 + $0x48] sm:$0xff] %v2157_v12  ;;  %v2327_v21 = vmul.f32 %v2157_v12, %v2157_v12  ;;  %v2178_v11 = vadd.f32 %v3064_v52, %v2017_v22  ;;  %v2357_v54 = vadd.f32 %v2356_v35, %v2326_v25  ;;  %v2288_v24 = vadd.f32 %v2287_v14, %v2157_v12  ;;  %v4310_v12 = vld [vmem:[#allocation3_spill] sm:$0xff] }
 0x1e6   : > { %v2169_v55 = vpop.f32.mrf.mxu0  ;;  %v2028_v22 = vadd.f32 %v2967_v32, %v4310_v12 }
 0x1e7   : > { %v4226_v10 = vpop.f32.mrf.mxu1  ;;  %2262 = vst [vmem:[%s4158_s24 + $0x70] sm:$0xff] %v2178_v11  ;;  %v2170_v3 = vadd.f32 %v2169_v55, %v2009_v23  ;;  %v2289_v45 = vadd.f32 %v2288_v24, %v2162_v39  ;;  %v2358_v63 = vadd.f32 %v2357_v54, %v2327_v21  ;;  %v2332_v4 = vmul.f32 %v2178_v11, %v2178_v11  ;;  %v4311_v21 = vld [vmem:[#allocation6_spill] sm:$0xff] }
 0x1e8   : > { %v3065_v5 = vpop.f32.mrf.mxu0 }
 0x1e9   : > { %v2980_v42 = vpop.f32.mrf.mxu1  ;;  %2260 = vst [vmem:[%s4158_s24 + $0x60] sm:$0xff] %v2170_v3  ;;  %v2181_v60 = vadd.f32 %v3065_v5, %v2020_v13  ;;  %v2359_v36 = vadd.f32 %v2358_v63, %v2328_v37  ;;  %v2290_v17 = vadd.f32 %v2289_v45, %v2165_v50  ;;  %v2330_v7 = vmul.f32 %v2170_v3, %v2170_v3 }
 0x1ea   : > { %v2172_v9 = vpop.f32.mrf.mxu0 }
 0x1eb   : > { %v2981_v53 = vpop.f32.mrf.mxu1  ;;  %2263 = vst [vmem:[%s4158_s24 + $0x78] sm:$0xff] %v2181_v60  ;;  %v2173_v39 = vadd.f32 %v2172_v9, %v2012_v58  ;;  %v2291_v34 = vadd.f32 %v2290_v17, %v2170_v3  ;;  %v2360_v38 = vadd.f32 %v2359_v36, %v2329_v61  ;;  %v2333_v14 = vmul.f32 %v2181_v60, %v2181_v60  ;;  %v4312_v3 = vld [vmem:[#allocation4_spill] sm:$0xff] }
 0x1ec   : > { %v3068_v59 = vpop.f32.mrf.mxu0  ;;  %v2982_v43 = vadd.f32 %v2981_v53, %v2980_v42  ;;  %v2979_v53 = vadd.f32 %v4226_v10, %v4220_v2  ;;  %v2041_v13 = vadd.f32 %v2976_v19, %v4312_v3 }
 0x1ed   : > { %v2983_v44 = vpop.f32.mrf.mxu1  ;;  %2261 = vst [vmem:[%s4158_s24 + $0x68] sm:$0xff] %v2173_v39  ;;  %v2331_v47 = vmul.f32 %v2173_v39, %v2173_v39  ;;  %v2194_v30 = vadd.f32 %v3068_v59, %v2033_v29  ;;  %v2361_v51 = vadd.f32 %v2360_v38, %v2330_v7  ;;  %v2292_v46 = vadd.f32 %v2291_v34, %v2173_v39 }
 0x1ee   : > { %v2185_v50 = vpop.f32.mrf.mxu0  ;;  %v2044_v39 = vadd.f32 %v2979_v53, %v4314_v27 }
 0x1ef   : > { %v2984_v18 = vpop.f32.mrf.mxu1  ;;  %2266 = vst [vmem:[%s4158_s24 + $0x90] sm:$0xff] %v2194_v30  ;;  %v2186_v31 = vadd.f32 %v2185_v50, %v2025_v62  ;;  %v2293_v28 = vadd.f32 %v2292_v46, %v2178_v11  ;;  %v2362_v16 = vadd.f32 %v2361_v51, %v2331_v47  ;;  %v2049_v11 = vadd.f32 %v2982_v43, %v4311_v21  ;;  %v4315_v62 = vld [vmem:[#allocation10_spill] sm:$0xff]  ;;  %v4318_v21 = vld [vmem:[#allocation9_spill] sm:$0xff] }
 0x1f0   : > { %v3069_v8 = vpop.f32.mrf.mxu0  ;;  %v2985_v20 = vadd.f32 %v2984_v18, %v2983_v44  ;;  %v2336_v61 = vmul.f32 %v2194_v30, %v2194_v30 }
 0x1f1   : > { %v2986_v6 = vpop.f32.mrf.mxu1  ;;  %2264 = vst [vmem:[%s4158_s24 + $0x80] sm:$0xff] %v2186_v31  ;;  %v2197_v15 = vadd.f32 %v3069_v8, %v2036_v1  ;;  %v2363_v25 = vadd.f32 %v2362_v16, %v2332_v4  ;;  %v2294_v35 = vadd.f32 %v2293_v28, %v2181_v60  ;;  %v2334_v54 = vmul.f32 %v2186_v31, %v2186_v31  ;;  %v4313_v60 = vld [vmem:[#allocation7_spill] sm:$0xff]  ;;  %v4316_v4 = vld [vmem:[#allocation8_spill] sm:$0xff] }
 0x1f2   : > { %v2188_v52 = vpop.f32.mrf.mxu0  ;;  %v2052_v58 = vadd.f32 %v2985_v20, %v4313_v60 }
 0x1f3   : > { %v2987_v26 = vpop.f32.mrf.mxu1  ;;  %2267 = vst [vmem:[%s4158_s24 + $0x98] sm:$0xff] %v2197_v15  ;;  %v2189_v0 = vadd.f32 %v2188_v52, %v2028_v22  ;;  %v2295_v23 = vadd.f32 %v2294_v35, %v2186_v31  ;;  %v2364_v24 = vadd.f32 %v2363_v25, %v2333_v14  ;;  %v2337_v29 = vmul.f32 %v2197_v15, %v2197_v15  ;;  %v4317_v22 = vld [vmem:[#allocation11_spill] sm:$0xff] }
 0x1f4   : > { %v3072_v48 = vpop.f32.mrf.mxu0  ;;  %v2988_v18 = vadd.f32 %v2987_v26, %v2986_v6 }
 0x1f5   : > { %v2989_v49 = vpop.f32.mrf.mxu1  ;;  %2265 = vst [vmem:[%s4158_s24 + $0x88] sm:$0xff] %v2189_v0  ;;  %v2335_v55 = vmul.f32 %v2189_v0, %v2189_v0  ;;  %v2210_v40 = vadd.f32 %v3072_v48, %v2049_v11  ;;  %v2365_v37 = vadd.f32 %v2364_v24, %v2334_v54  ;;  %v2296_v45 = vadd.f32 %v2295_v23, %v2189_v0 }
 0x1f6   : > { %v2201_v44 = vpop.f32.mrf.mxu0  ;;  %v2057_v28 = vadd.f32 %v2988_v18, %v4316_v4 }
 0x1f7   : > { %v2990_v42 = vpop.f32.mrf.mxu1  ;;  %2270 = vst [vmem:[%s4158_s24 + $0xb0] sm:$0xff] %v2210_v40  ;;  %v2202_v33 = vadd.f32 %v2201_v44, %v2041_v13  ;;  %v2297_v36 = vadd.f32 %v2296_v45, %v2194_v30  ;;  %v2366_v17 = vadd.f32 %v2365_v37, %v2335_v55  ;;  %v2340_v25 = vmul.f32 %v2210_v40, %v2210_v40  ;;  %v4319_v44 = vld [vmem:[#allocation12_spill] sm:$0xff] }
 0x1f8   : > { %v3073_v10 = vpop.f32.mrf.mxu0  ;;  %v2991_v43 = vadd.f32 %v2990_v42, %v2989_v49 }
 0x1f9   : > { %v2992_v56 = vpop.f32.mrf.mxu1  ;;  %2268 = vst [vmem:[%s4158_s24 + $0xa0] sm:$0xff] %v2202_v33  ;;  %v2213_v9 = vadd.f32 %v3073_v10, %v2052_v58  ;;  %v2367_v34 = vadd.f32 %v2366_v17, %v2336_v61  ;;  %v2298_v7 = vadd.f32 %v2297_v36, %v2197_v15  ;;  %v2338_v46 = vmul.f32 %v2202_v33, %v2202_v33 }
 0x1fa   : > { %v2204_v59 = vpop.f32.mrf.mxu0  ;;  %v2060_v11 = vadd.f32 %v2991_v43, %v4318_v21 }
 0x1fb   : > { %v2993_v63 = vpop.f32.mrf.mxu1  ;;  %2271 = vst [vmem:[%s4158_s24 + $0xb8] sm:$0xff] %v2213_v9  ;;  %v2205_v47 = vadd.f32 %v2204_v59, %v2044_v39  ;;  %v2299_v51 = vadd.f32 %v2298_v7, %v2202_v33  ;;  %v2368_v50 = vadd.f32 %v2367_v34, %v2337_v29  ;;  %v2341_v23 = vmul.f32 %v2213_v9, %v2213_v9  ;;  %v4320_v29 = vld [vmem:[#allocation13_spill] sm:$0xff] }
 0x1fc   : > { %v2994_v5 = vadd.f32 %v2993_v63, %v2992_v56  ;;  %v3076_v26 = vpop.f32.mrf.mxu0 }
 0x1fd   : > { %v2995_v2 = vpop.f32.mrf.mxu1  ;;  %2269 = vst [vmem:[%s4158_s24 + $0xa8] sm:$0xff] %v2205_v47  ;;  %v2339_v31 = vmul.f32 %v2205_v47, %v2205_v47  ;;  %v2369_v16 = vadd.f32 %v2368_v50, %v2338_v46  ;;  %v2300_v8 = vadd.f32 %v2299_v51, %v2205_v47 }
 0x1fe   : > { %v2065_v30 = vadd.f32 %v2994_v5, %v4315_v62  ;;  %v2217_v15 = vpop.f32.mrf.mxu0 }
 0x1ff   : > { %v2996_v38 = vpop.f32.mrf.mxu1  ;;  %v2218_v12 = vadd.f32 %v2217_v15, %v2057_v28  ;;  %v2301_v35 = vadd.f32 %v2300_v8, %v2210_v40  ;;  %v2370_v52 = vadd.f32 %v2369_v16, %v2339_v31 }
 0x200   : > { %v2997_v32 = vadd.f32 %v2996_v38, %v2995_v2  ;;  %v2226_v1 = vadd.f32 %v3076_v26, %v2065_v30  ;;  %v3077_v49 = vpop.f32.mrf.mxu0 }
 0x201   : > { %v2998_v6 = vpop.f32.mrf.mxu1  ;;  %2272 = vst [vmem:[%s4158_s24 + $0xc0] sm:$0xff] %v2218_v12  ;;  %v2371_v54 = vadd.f32 %v2370_v52, %v2340_v25  ;;  %v2302_v24 = vadd.f32 %v2301_v35, %v2213_v9  ;;  %v2342_v3 = vmul.f32 %v2218_v12, %v2218_v12 }
 0x202   : > { %2274 = vst [vmem:[%s4158_s24 + $0xd0] sm:$0xff] %v2226_v1  ;;  %v2068_v14 = vadd.f32 %v2997_v32, %v4317_v22  ;;  %v2220_v48 = vpop.f32.mrf.mxu0  ;;  %v2344_v2 = vmul.f32 %v2226_v1, %v2226_v1 }
 0x203   : > { %v2999_v19 = vpop.f32.mrf.mxu1  ;;  %v2221_v53 = vadd.f32 %v2220_v48, %v2060_v11  ;;  %v2303_v55 = vadd.f32 %v2302_v24, %v2218_v12  ;;  %v2372_v13 = vadd.f32 %v2371_v54, %v2341_v23 }
 0x204   : > { %v3000_v42 = vadd.f32 %v2999_v19, %v2998_v6  ;;  %v2229_v0 = vadd.f32 %v3077_v49, %v2068_v14  ;;  %v3080_v37 = vpop.f32.mrf.mxu0 }
 0x205   : > { %v3001_v20 = vpop.f32.mrf.mxu1  ;;  %2273 = vst [vmem:[%s4158_s24 + $0xc8] sm:$0xff] %v2221_v53  ;;  %v2343_v63 = vmul.f32 %v2221_v53, %v2221_v53  ;;  %v2373_v33 = vadd.f32 %v2372_v13, %v2342_v3  ;;  %v2304_v60 = vadd.f32 %v2303_v55, %v2221_v53 }
 0x206   : > { %2275 = vst [vmem:[%s4158_s24 + $0xd8] sm:$0xff] %v2229_v0  ;;  %v2073_v5 = vadd.f32 %v3000_v42, %v4319_v44  ;;  %v2233_v61 = vpop.f32.mrf.mxu0  ;;  %v2345_v7 = vmul.f32 %v2229_v0, %v2229_v0 }
 0x207   : > { %v3002_v56 = vpop.f32.mrf.mxu1  ;;  %v2305_v10 = vadd.f32 %v2304_v60, %v2226_v1  ;;  %v2374_v18 = vadd.f32 %v2373_v33, %v2343_v63 }
 0x208   : > { %v3003_v45 = vadd.f32 %v3002_v56, %v3001_v20  ;;  %v2234_v17 = vadd.f32 %v2233_v61, %v2073_v5  ;;  %v3081_v27 = vpop.f32.mrf.mxu0 }
 0x209   : > { %v3004_v40 = vpop.f32.mrf.mxu1  ;;  %v2375_v38 = vadd.f32 %v2374_v18, %v2344_v2  ;;  %v2306_v59 = vadd.f32 %v2305_v10, %v2229_v0 }
 0x20a   : > { %2276 = vst [vmem:[%s4158_s24 + $0xe0] sm:$0xff] %v2234_v17  ;;  %v2076_v34 = vadd.f32 %v3003_v45, %v4320_v29  ;;  %v2236_v47 = vpop.f32.mrf.mxu0  ;;  %v2346_v50 = vmul.f32 %v2234_v17, %v2234_v17 }
 0x20b   : > { %v3005_v58 = vpop.f32.mrf.mxu1  ;;  %v2307_v46 = vadd.f32 %v2306_v59, %v2234_v17  ;;  %v2376_v6 = vadd.f32 %v2375_v38, %v2345_v7 }
 0x20c   : > { %v3006_v36 = vadd.f32 %v3005_v58, %v3004_v40  ;;  %v2237_v51 = vadd.f32 %v2236_v47, %v2076_v34 }
 0x20d   : > { %v3007_v9 = vpop.f32.mrf.mxu1  ;;  %v2377_v43 = vadd.f32 %v2376_v6, %v2346_v50 }
 0x20e   : > { %v2081_v39 = vadd.f32 %v3006_v36, %v4144_v41  ;;  %2277 = vst [vmem:[%s4158_s24 + $0xe8] sm:$0xff] %v2237_v51  ;;  %v2347_v41 = vmul.f32 %v2237_v51, %v2237_v51  ;;  %v2308_v31 = vadd.f32 %v2307_v46, %v2237_v51 }
 0x20f   : > { %v3008_v32 = vpop.f32.mrf.mxu1 }
 0x210   : > { %v2242_v62 = vadd.f32 %v3080_v37, %v2081_v39  ;;  %v3009_v30 = vadd.f32 %v3008_v32, %v3007_v9  ;;  %v2378_v16 = vadd.f32 %v2377_v43, %v2347_v41 }
 0x212   : > { %2278 = vst [vmem:[%s4158_s24 + $0xf0] sm:$0xff] %v2242_v62  ;;  %v2084_v26 = vadd.f32 %v3009_v30, %v4163_v57  ;;  %v2348_v4 = vmul.f32 %v2242_v62, %v2242_v62  ;;  %v2309_v28 = vadd.f32 %v2308_v31, %v2242_v62 }
 0x214   : > { %v2245_v1 = vadd.f32 %v3081_v27, %v2084_v26  ;;  %v2379_v15 = vadd.f32 %v2378_v16, %v2348_v4 }
 0x216   : > { %2279 = vst [vmem:[%s4158_s24 + $0xf8] sm:$0xff] %v2245_v1  ;;  %v2349_v8 = vmul.f32 %v2245_v1, %v2245_v1  ;;  %v2310_v19 = vadd.f32 %v2309_v28, %v2245_v1 }
 0x218   : > { %v2311_v12 = vrot.slane %v2310_v19, 4  ;;  %v2380_v22 = vadd.f32 %v2379_v15, %v2349_v8 }
 0x21a   : > { %v2312_v14 = vadd.f32 %v2311_v12, %v2310_v19  ;;  %v2381_v25 = vrot.slane %v2380_v22, 4 }
 0x21c   : > { %v2313_v35 = vrot.slane %v2312_v14, 2  ;;  %v2382_v52 = vadd.f32 %v2381_v25, %v2380_v22 }
 0x21e   : > { %v2314_v57 = vadd.f32 %v2313_v35, %v2312_v14  ;;  %v2383_v20 = vrot.slane %v2382_v52, 2 }
 0x220   : > { %v2315_v49 = vrot.slane %v2314_v57, 1  ;;  %v2384_v42 = vadd.f32 %v2383_v20, %v2382_v52 }
 0x222   : > { %v2316_v0 = vadd.f32 %v2315_v49, %v2314_v57  ;;  %v2385_v21 = vrot.slane %v2384_v42, 1 }
 0x224   : > { %2317 = vst [vmem:[%s235_s27] sm:$0x1] %v2316_v0  ;;  %v2386_v11 = vadd.f32 %v2385_v21, %v2384_v42 }
 0x226   : > { %2387 = vst [vmem:[%s235_s27 + $0x1] sm:$0x1] %v2386_v11 }
 0x227 PF: > { %s16_s18 = sadd.s32 1, %s3186_s18  }
 0x228   : > { %p13_p4 = scmp.ge.s32.totalorder %s16_s18, 4  }
 0x22a   :  { %15 = sbr.rel (!%p13_p4) target bundleno = 1 (0x1), region = 80 }

// kernel: plain_decoder_block_forward.4
= control target key start
LH: loop header
LB: loop body
LE: loop exit
PB: predicated region body
PF: predicated region fallthrough
CT: control target
= control target key end

     0   :  { %s3252_s18 = smov 0   ;;  %s4358_s0 = inlined_call_operand.vmem [shape: f32[2,16,16,128], index: 0, kind: input, shape index: {}]   ;;  %s4359_s1 = inlined_call_operand.vmem [shape: f32[1,128], index: 1, kind: input, shape index: {}]   ;;  %s4360_s2 = inlined_call_operand.vmem [shape: f32[1,128], index: 2, kind: input, shape index: {}]   ;;  %s4361_s3 = inlined_call_operand.vmem [shape: bf16[1152,128], index: 3, kind: input, shape index: {}]   ;;  %s4362_s4 = inlined_call_operand.vmem [shape: f32[2,16,16,128], index: 4, kind: output, shape index: {0}]   ;;  %s4363_s5 = inlined_call_operand.vmem [shape: f32[2,2,128], index: 5, kind: output, shape index: {1}]  }
   0x1 LB: > { %s2506_s19 = sadd.s32 4294967295, %s3218_s18   ;;  %p2510_p0 = scmp.ge.s32.totalorder %s3218_s18, 1  ;;  %s3218_s18 = sphi %s3252_s18, %s16_s18  }
   0x2   : > { %p190_p1 = scmp.lt.s32.totalorder %s3218_s18, 3 }
   0x4   : > { %p191_p2 = pnand %p2510_p0, %p190_p1 }
   0x6   : > { %194 = sbr.rel (%p191_p2) target bundleno = 551 (0x227), region = 36 }
   0xb   : > { %v3139_v0 = vld [vmem:[%s4361_s3 + $0x78] sm:$0xff]   ;;  %v3220_v2 = vmov 0.0   ;;  %v3141_v3 = vld [vmem:[%s4361_s3 + $0x70] sm:$0xff]   ;;  %p222_p3 = scmp.lt.s32.totalorder %s2506_s19, 1  ;;  %v3143_v5 = vld [vmem:[%s4361_s3 + $0x68] sm:$0xff]   ;;  %v3221_v63 = vmov 0.0|0.0  }
   0xc   : > { %v3140_v1 = vld [vmem:[%s4361_s3 + $0x38] sm:$0xff]   ;;  %379 = vst [vmem:[#allocation2] sm:$0xff] %v3220_v2  ;;  %380 = vst [vmem:[#allocation2 + $0x8] sm:$0xff] %v3220_v2  ;;  %2594 = vmatprep.subr.bf16.mxu0 %v3139_v0  ;;  %3114 = vmatprep.subr.bf16.mxu1 %v3139_v0  ;;  %v3142_v4 = vld [vmem:[%s4361_s3 + $0x30] sm:$0xff]  }
   0xd   : > { %381 = vst [vmem:[#allocation2 + $0x10] sm:$0x3] %v3220_v2  ;;  %382 = vst [vmem:[#allocation2 + $0x18] sm:$0xff] %v3220_v2  ;;  %2595 = vmatpush3.bf16.msra.mxu0 %v3140_v1  ;;  %3122 = vmatpush3.bf16.msra.mxu1 %v3140_v1  ;;  %s4387_s19 = smov (!%p222_p3, %s2506_s19), 1  ;;  %v3144_v6 = vld [vmem:[%s4361_s3 + $0x28] sm:$0xff]   ;;  %v3145_v7 = vld [vmem:[%s4361_s3 + $0x60] sm:$0xff]  }
   0xe   : > { %383 = vst [vmem:[#allocation2 + $0x20] sm:$0xff] %v3220_v2  ;;  %384 = vst [vmem:[#allocation2 + $0x28] sm:$0x3] %v3220_v2  ;;  %2596 = vmatprep.subr.bf16.mxu0 %v3141_v3  ;;  %3115 = vmatprep.subr.bf16.mxu1 %v3141_v3  ;;  %s2592_s9 = sshll.u32 %s4387_s19, 8  ;;  %v3146_v8 = vld [vmem:[%s4361_s3 + $0x20] sm:$0xff]   ;;  %v3147_v9 = vld [vmem:[%s4361_s3 + $0x58] sm:$0xff]  }
   0xf   : > { %385 = vst [vmem:[#allocation2 + $0x30] sm:$0xff] %v3220_v2  ;;  %386 = vst [vmem:[#allocation2 + $0x38] sm:$0xff] %v3220_v2  ;;  %s3299_s16 = scalar_lea.vmem %s4358_s0, %s2592_s9  ;;  %v3148_v10 = vld [vmem:[%s4361_s3 + $0x18] sm:$0xff]   ;;  %v3149_v11 = vld [vmem:[%s4361_s3 + $0x50] sm:$0xff]   ;;  %s4223_s24 = scalar_lea.vmem %s4362_s4, %s2592_s9 }
  0x10   : > { %387 = vst [vmem:[#allocation2 + $0x40] sm:$0x3] %v3220_v2  ;;  %388 = vst [vmem:[#allocation2 + $0x48] sm:$0xff] %v3220_v2  ;;  %v259_v14 = vld [vmem:[%s3299_s16 + $0xb0] sm:$0xff]  ;;  %v260_v16 = vld [vmem:[%s3299_s16 + $0xb8] sm:$0xff]  ;;  %s2515_s9 = sshll.u32 %s4387_s19, 1 }
  0x11   : > { %389 = vst [vmem:[#allocation2 + $0x50] sm:$0xff] %v3220_v2  ;;  %390 = vst [vmem:[#allocation2 + $0x58] sm:$0x3] %v3220_v2  ;;  %2597 = vmatpush3.bf16.msra.mxu0 %v3142_v4  ;;  %3123 = vmatpush3.bf16.msra.mxu1 %v3142_v4  ;;  %v3312_v17 = vld [vmem:[%s4359_s1] ss:$0 sm:$0xff]  ;;  %v3150_v21 = vld [vmem:[%s4361_s3 + $0x10] sm:$0xff]   ;;  %s235_s27 = scalar_lea.vmem %s4363_s5, %s2515_s9 }
  0x12   : > { %391 = vst [vmem:[#allocation2 + $0x60] sm:$0xff] %v3220_v2  ;;  %392 = vst [vmem:[#allocation2 + $0x68] sm:$0xff] %v3220_v2  ;;  %2598 = vmatprep.subr.bf16.mxu0 %v3143_v5  ;;  %3116 = vmatprep.subr.bf16.mxu1 %v3143_v5  ;;  %v3317_v18 = vld [vmem:[%s4360_s2] ss:$0 sm:$0xff]  ;;  %v298_v19 = vmul.f32 %v3312_v17, %v259_v14  ;;  %v299_v20 = vmul.f32 %v3312_v17, %v260_v16  ;;  %v3151_v22 = vld [vmem:[%s4361_s3 + $0x48] sm:$0xff]  }
  0x13   : > { %393 = vst [vmem:[#allocation2 + $0x70] sm:$0x3] %v3220_v2  ;;  %394 = vst [vmem:[#allocation2 + $0x78] sm:$0xff] %v3220_v2  ;;  %v498_v12 = vld [vmem:[#allocation2 + $0x1] sm:$0xff]  ;;  %v3155_v39 = vld [vmem:[%s4361_s3 + $0xf8] sm:$0xff]  }
  0x14   : > { %395 = vst [vmem:[#allocation2 + $0x80] sm:$0xff] %v3220_v2  ;;  %396 = vst [vmem:[#allocation2 + $0x88] sm:$0x3] %v3220_v2  ;;  %v499_v13 = vld [vmem:[#allocation2 + $0x9] sm:$0xff]  ;;  %v337_v23 = vadd.f32 %v3317_v18, %v298_v19  ;;  %v338_v24 = vadd.f32 %v3317_v18, %v299_v20  ;;  %v3153_v28 = vld [vmem:[%s4361_s3 + $0x40] sm:$0xff]  }
  0x15   : > { %397 = vst [vmem:[#allocation2 + $0x90] sm:$0xff] %v3220_v2  ;;  %398 = vst [vmem:[#allocation2 + $0x98] sm:$0xff] %v3220_v2  ;;  %2599 = vmatpush3.bf16.msra.mxu0 %v3144_v6  ;;  %3124 = vmatpush3.bf16.msra.mxu1 %v3144_v6  ;;  %v756_v15 = vpack.c.bf16 %v499_v13, %v498_v12  ;;  %v3152_v27 = vld [vmem:[%s4361_s3 + $0x8] sm:$0xff]   ;;  %v237_v30 = vld [vmem:[%s3299_s16] sm:$0xff] }
  0x16   : > { %399 = vst [vmem:[#allocation2 + $0xa0] sm:$0x3] %v3220_v2  ;;  %400 = vst [vmem:[#allocation2 + $0xa8] sm:$0xff] %v3220_v2  ;;  %2600 = vmatprep.subr.bf16.mxu0 %v3145_v7  ;;  %3117 = vmatprep.subr.bf16.mxu1 %v3145_v7  ;;  %v369_v25 = vmax.f32 %v337_v23, 0.0  ;;  %v370_v26 = vmax.f32 %v338_v24, 0.0  ;;  %v238_v31 = vld [vmem:[%s3299_s16 + $0x8] sm:$0xff]  ;;  %v276_v32 = vmul.f32 %v3312_v17, %v237_v30 }
  0x17   : > { %401 = vst [vmem:[#allocation2 + $0xb0] sm:$0xff] %v3220_v2  ;;  %402 = vst [vmem:[#allocation2 + $0xb8] sm:$0x3] %v3220_v2  ;;  %1507 = vmatprep.mubr.bf16.mxu0 %v756_v15  ;;  %v277_v33 = vmul.f32 %v3312_v17, %v238_v31  ;;  %v261_v34 = vld [vmem:[%s3299_s16 + $0xc0] sm:$0xff]  ;;  %v262_v35 = vld [vmem:[%s3299_s16 + $0xc8] sm:$0xff] }
  0x18   : > { %403 = vst [vmem:[#allocation2 + $0xc0] sm:$0xff] %v3220_v2  ;;  %404 = vst [vmem:[#allocation2 + $0xc8] sm:$0xff] %v3220_v2  ;;  %v864_v29 = vpack.c.bf16 %v370_v26, %v369_v25  ;;  %v3154_v36 = vld [vmem:[%s4361_s3] sm:$0xff]   ;;  %v300_v37 = vmul.f32 %v3312_v17, %v261_v34  ;;  %v301_v38 = vmul.f32 %v3312_v17, %v262_v35  ;;  %v3156_v42 = vld [vmem:[%s4361_s3 + $0x178] sm:$0xff]  }
  0x19   : > { %405 = vst [vmem:[#allocation2 + $0xd0] sm:$0x3] %v3220_v2  ;;  %406 = vst [vmem:[#allocation2 + $0xd8] sm:$0xff] %v3220_v2  ;;  %2601 = vmatpush3.bf16.msra.mxu0 %v3146_v8  ;;  %3125 = vmatpush3.bf16.msra.mxu1 %v3146_v8  ;;  %v315_v40 = vadd.f32 %v3317_v18, %v276_v32  ;;  %v316_v41 = vadd.f32 %v3317_v18, %v277_v33  ;;  %v3157_v45 = vld [vmem:[%s4361_s3 + $0xb8] sm:$0xff]   ;;  %v3159_v49 = vld [vmem:[%s4361_s3 + $0xf0] sm:$0xff]  }
  0x1a   : > { %407 = vst [vmem:[#allocation2 + $0xe0] sm:$0xff] %v3220_v2  ;;  %408 = vst [vmem:[#allocation2 + $0xe8] sm:$0x3] %v3220_v2  ;;  %2602 = vmatprep.subr.bf16.mxu0 %v3147_v9  ;;  %3118 = vmatprep.subr.bf16.mxu1 %v3147_v9  ;;  %v339_v43 = vadd.f32 %v3317_v18, %v300_v37  ;;  %v340_v44 = vadd.f32 %v3317_v18, %v301_v38  ;;  %v3158_v46 = vld [vmem:[%s4361_s3 + $0x138] sm:$0xff]   ;;  %v3164_v56 = vld [vmem:[%s4361_s3 + $0x170] sm:$0xff]  }
  0x1b   : > { %409 = vst [vmem:[#allocation2 + $0xf0] sm:$0xff] %v3220_v2  ;;  %410 = vst [vmem:[#allocation2 + $0xf8] sm:$0xff] %v3220_v2  ;;  %1603 = vmatprep.mubr.bf16.mxu1 %v864_v29  ;;  %v347_v47 = vmax.f32 %v315_v40, 0.0  ;;  %v348_v48 = vmax.f32 %v316_v41, 0.0  ;;  %v239_v57 = vld [vmem:[%s3299_s16 + $0x10] sm:$0xff]  ;;  %v240_v59 = vld [vmem:[%s3299_s16 + $0x18] sm:$0xff] }
  0x1c   : > { %411 = vst [vmem:[#allocation2 + $0x100] sm:$0x3] %v3220_v2  ;;  %412 = vst [vmem:[#allocation2 + $0x108] sm:$0xff] %v3220_v2  ;;  %v371_v50 = vmax.f32 %v339_v43, 0.0  ;;  %v372_v51 = vmax.f32 %v340_v44, 0.0  ;;  %v278_v60 = vmul.f32 %v3312_v17, %v239_v57  ;;  %v263_v61 = vld [vmem:[%s3299_s16 + $0xd0] sm:$0xff]  ;;  %v279_v1 = vmul.f32 %v3312_v17, %v240_v59 }
  0x1d   : > { %413 = vst [vmem:[#allocation2 + $0x110] sm:$0xff] %v3220_v2  ;;  %414 = vst [vmem:[#allocation2 + $0x118] sm:$0x3] %v3220_v2  ;;  %2603 = vmatpush3.bf16.msra.mxu0 %v3148_v10  ;;  %3126 = vmatpush3.bf16.msra.mxu1 %v3148_v10  ;;  %v3365_v55 = vpack.c.bf16 %v348_v48, %v347_v47  ;;  %v264_v62 = vld [vmem:[%s3299_s16 + $0xd8] sm:$0xff]  ;;  %v3160_v0 = vld [vmem:[%s4361_s3 + $0xb0] sm:$0xff]  }
  0x1e   : > { %415 = vst [vmem:[#allocation2 + $0x120] sm:$0xff] %v3220_v2  ;;  %416 = vst [vmem:[#allocation2 + $0x128] sm:$0xff] %v3220_v2  ;;  %2604 = vmatprep.subr.bf16.mxu0 %v3149_v11  ;;  %3119 = vmatprep.subr.bf16.mxu1 %v3149_v11  ;;  %v873_v58 = vpack.c.bf16 %v372_v51, %v371_v50  ;;  %v303_v3 = vmul.f32 %v3312_v17, %v264_v62  ;;  %v3166_v4 = vld [vmem:[%s4361_s3 + $0x130] sm:$0xff]   ;;  %v3161_v6 = vld [vmem:[%s4361_s3 + $0xe8] sm:$0xff]  }
  0x1f   : > { %417 = vst [vmem:[#allocation2 + $0x130] sm:$0x3] %v3220_v2  ;;  %418 = vst [vmem:[#allocation2 + $0x138] sm:$0xff] %v3220_v2  ;;  %v317_v5 = vadd.f32 %v3317_v18, %v278_v60  ;;  %v318_v7 = vadd.f32 %v3317_v18, %v279_v1  ;;  %v3162_v10 = vld [vmem:[%s4361_s3 + $0xa8] sm:$0xff]   ;;  %v3163_v14 = vld [vmem:[%s4361_s3 + $0xe0] sm:$0xff]  }
  0x20   : > { %419 = vst [vmem:[#allocation2 + $0x140] sm:$0xff] %v3220_v2  ;;  %420 = vst [vmem:[#allocation2 + $0x148] sm:$0x3] %v3220_v2  ;;  %v342_v9 = vadd.f32 %v3317_v18, %v303_v3  ;;  %v241_v20 = vld [vmem:[%s3299_s16 + $0x20] sm:$0xff]  ;;  %v242_v24 = vld [vmem:[%s3299_s16 + $0x28] sm:$0xff] }
  0x21   : > { %421 = vst [vmem:[#allocation2 + $0x150] sm:$0xff] %v3220_v2  ;;  %422 = vst [vmem:[#allocation2 + $0x158] sm:$0xff] %v3220_v2  ;;  %2605 = vmatpush3.bf16.msra.mxu0 %v3150_v21  ;;  %3127 = vmatpush3.bf16.msra.mxu1 %v3150_v21  ;;  %v349_v11 = vmax.f32 %v317_v5, 0.0  ;;  %v350_v15 = vmax.f32 %v318_v7, 0.0  ;;  %v281_v29 = vmul.f32 %v3312_v17, %v242_v24  ;;  %v265_v30 = vld [vmem:[%s3299_s16 + $0xe0] sm:$0xff]  ;;  %v266_v31 = vld [vmem:[%s3299_s16 + $0xe8] sm:$0xff] }
  0x22   : > { %423 = vst [vmem:[#allocation2 + $0x160] sm:$0x3] %v3220_v2  ;;  %424 = vst [vmem:[#allocation2 + $0x168] sm:$0xff] %v3220_v2  ;;  %2606 = vmatprep.subr.bf16.mxu0 %v3151_v22  ;;  %3120 = vmatprep.subr.bf16.mxu1 %v3151_v22  ;;  %v374_v19 = vmax.f32 %v342_v9, 0.0  ;;  %v3165_v32 = vld [vmem:[%s4361_s3 + $0xa0] sm:$0xff]   ;;  %v304_v34 = vmul.f32 %v3312_v17, %v265_v30  ;;  %v305_v35 = vmul.f32 %v3312_v17, %v266_v31  ;;  %v3172_v37 = vld [vmem:[%s4361_s3 + $0x168] sm:$0xff]  }
  0x23   : > { %425 = vst [vmem:[#allocation2 + $0x170] sm:$0xff] %v3220_v2  ;;  %426 = vst [vmem:[#allocation2 + $0x178] sm:$0x3] %v3220_v2  ;;  %v3167_v38 = vld [vmem:[%s4361_s3 + $0xd8] sm:$0xff]   ;;  %v3174_v43 = vld [vmem:[%s4361_s3 + $0x128] sm:$0xff]  }
  0x24   : > { %427 = vst [vmem:[#allocation2 + $0x180] sm:$0xff] %v3220_v2  ;;  %428 = vst [vmem:[#allocation2 + $0x188] sm:$0xff] %v3220_v2  ;;  %v343_v40 = vadd.f32 %v3317_v18, %v304_v34  ;;  %v344_v41 = vadd.f32 %v3317_v18, %v305_v35  ;;  %v3168_v44 = vld [vmem:[%s4361_s3 + $0x98] sm:$0xff]   ;;  %v243_v57 = vld [vmem:[%s3299_s16 + $0x30] sm:$0xff] }
  0x25   : > { %429 = vst [vmem:[#allocation2 + $0x190] sm:$0x3] %v3220_v2  ;;  %430 = vst [vmem:[#allocation2 + $0x198] sm:$0xff] %v3220_v2  ;;  %2607 = vmatpush3.bf16.msra.mxu0 %v3152_v27  ;;  %3128 = vmatpush3.bf16.msra.mxu1 %v3152_v27  ;;  %v3405_v27 = vpack.c.bf16 %v350_v15, %v349_v11  ;;  %v282_v59 = vmul.f32 %v3312_v17, %v243_v57  ;;  %v3171_v62 = vld [vmem:[%s4361_s3 + $0xc8] sm:$0xff]  }
  0x26   : > { %431 = vst [vmem:[#allocation2 + $0x1a0] sm:$0xff] %v3220_v2  ;;  %432 = vst [vmem:[#allocation2 + $0x1a8] sm:$0x3] %v3220_v2  ;;  %2608 = vmatprep.subr.bf16.mxu0 %v3153_v28  ;;  %3121 = vmatprep.subr.bf16.mxu1 %v3153_v28  ;;  %v302_v2 = vmul.f32 %v3312_v17, %v263_v61  ;;  %v3170_v61 = vld [vmem:[%s4361_s3 + $0x90] sm:$0xff]   ;;  %v530_v24 = vld [vmem:[#allocation2 + $0x2] sm:$0xff] }
  0x27   : > { %456 = vst [vmem:[#allocation2 + $0x121] sm:$0xff] %v369_v25  ;;  %457 = vst [vmem:[#allocation2 + $0x129] sm:$0xff] %v370_v26  ;;  %v280_v25 = vmul.f32 %v3312_v17, %v241_v20  ;;  %v247_v20 = vld [vmem:[%s3299_s16 + $0x50] sm:$0xff] }
  0x28   : > { %434 = vst [vmem:[#allocation2 + $0x19] sm:$0xff] %v347_v47  ;;  %435 = vst [vmem:[#allocation2 + $0x21] sm:$0xff] %v348_v48  ;;  %v341_v8 = vadd.f32 %v3317_v18, %v302_v2  ;;  %v3179_v2 = vld [vmem:[%s4361_s3 + $0x160] sm:$0xff]  }
  0x29   : > { %2609 = vmatpush3.bf16.msra.mxu0 %v3154_v36  ;;  %3129 = vmatpush3.bf16.msra.mxu1 %v3154_v36  ;;  %458 = vst [vmem:[#allocation2 + $0x139] sm:$0xff] %v371_v50  ;;  %459 = vst [vmem:[#allocation2 + $0x141] sm:$0xff] %v372_v51  ;;  %v319_v33 = vadd.f32 %v3317_v18, %v280_v25  ;;  %v320_v36 = vadd.f32 %v3317_v18, %v281_v29  ;;  %v531_v25 = vld [vmem:[#allocation2 + $0xa] sm:$0xff] }
  0x2a   : > { %2706 = vmatprep.subr.bf16.mxu1 %v3155_v39  ;;  %2818 = vmatprep.subr.bf16.mxu0 %v3156_v42  ;;  %v373_v16 = vmax.f32 %v341_v8, 0.0  ;;  %436 = vst [vmem:[#allocation2 + $0x31] sm:$0xff] %v349_v11  ;;  %437 = vst [vmem:[#allocation2 + $0x39] sm:$0xff] %v350_v15  ;;  %v286_v29 = vmul.f32 %v3312_v17, %v247_v20 }
  0x2b   : > { %461 = vst [vmem:[#allocation2 + $0x159] sm:$0xff] %v374_v19  ;;  %v351_v39 = vmax.f32 %v319_v33, 0.0  ;;  %v352_v42 = vmax.f32 %v320_v36, 0.0  ;;  %v3177_v33 = vld [vmem:[%s4361_s3 + $0x1f8] sm:$0xff]  }
  0x2c   : > { %1508 = vmatmul.mubr.bf16.vlgmr.msra.gmra.mxu0 %v3221_v63  ;;  %460 = vst [vmem:[#allocation2 + $0x151] sm:$0xff] %v373_v16  ;;  %v882_v28 = vpack.c.bf16 %v374_v19, %v373_v16  ;;  %v321_v63 = vadd.f32 %v3317_v18, %v282_v59  ;;  %v3175_v16 = vld [vmem:[%s4361_s3 + $0xc0] sm:$0xff]   ;;  %v3499_v35 = vadd.f32 %v3317_v18, %v286_v29  ;;  %v251_v59 = vld [vmem:[%s3299_s16 + $0x70] sm:$0xff]  ;;  %v3190_v29 = vld [vmem:[%s4361_s3 + $0x108] sm:$0xff]  }
  0x2d   : > { %2819 = vmatpush3.bf16.msra.mxu0 %v3158_v46  ;;  %1515 = vmatprep.mubr.bf16.mxu0 %v3365_v55  ;;  %438 = vst [vmem:[#allocation2 + $0x49] sm:$0xff] %v351_v39  ;;  %v376_v46 = vmax.f32 %v344_v41, 0.0  ;;  %439 = vst [vmem:[#allocation2 + $0x51] sm:$0xff] %v352_v42  ;;  %v3434_v51 = vpack.c.bf16 %v352_v42, %v351_v39  ;;  %v249_v41 = vld [vmem:[%s3299_s16 + $0x60] sm:$0xff]  ;;  %v250_v42 = vld [vmem:[%s3299_s16 + $0x68] sm:$0xff] }
  0x2e   : > { %v490_v52 = vld [vmem:[#allocation2 + $0x120] sm:$0xff]  ;;  %v491_v53 = vld [vmem:[#allocation2 + $0x128] sm:$0xff]  ;;  %2820 = vmatprep.subr.bf16.mxu0 %v3164_v56  ;;  %v357_v39 = vmax.f32 %v3499_v35, 0.0 }
  0x2f   : > { %v863_v54 = vpack.c.bf16 %v491_v53, %v490_v52  ;;  %v468_v12 = vld [vmem:[#allocation2 + $0x18] sm:$0xff]  ;;  %v469_v13 = vld [vmem:[#allocation2 + $0x20] sm:$0xff]  ;;  %463 = vst [vmem:[#allocation2 + $0x171] sm:$0xff] %v376_v46 }
  0x30   : > { %v3399_v21 = vpack.c.bf16 %v469_v13, %v468_v12  ;;  %v492_v22 = vld [vmem:[#allocation2 + $0x138] sm:$0xff]  ;;  %v493_v23 = vld [vmem:[#allocation2 + $0x140] sm:$0xff]  ;;  %v3173_v12 = vld [vmem:[%s4361_s3 + $0x88] sm:$0xff]   ;;  %444 = vst [vmem:[#allocation2 + $0x91] sm:$0xff] %v357_v39 }
  0x31   : > { %1604 = vmatmul.mubr.bf16.vlgmr.msra.gmra.mxu1 %v863_v54  ;;  %2821 = vmatpush3.bf16.msra.mxu0 %v3166_v4  ;;  %v3403_v26 = vpack.c.bf16 %v493_v23, %v492_v22  ;;  %v470_v47 = vld [vmem:[#allocation2 + $0x30] sm:$0xff]  ;;  %v471_v48 = vld [vmem:[#allocation2 + $0x38] sm:$0xff]  ;;  %v353_v4 = vmax.f32 %v321_v63, 0.0  ;;  %v3176_v23 = vld [vmem:[%s4361_s3 + $0x80] sm:$0xff]  }
  0x32   : > { %2707 = vmatpush3.bf16.msra.mxu1 %v3157_v45  ;;  %1611 = vmatprep.mubr.bf16.mxu1 %v873_v58  ;;  %v375_v45 = vmax.f32 %v343_v40, 0.0  ;;  %v3436_v52 = vpack.c.bf16 %v471_v48, %v470_v47  ;;  %v3169_v54 = vld [vmem:[%s4361_s3 + $0xd0] sm:$0xff]   ;;  %v244_v58 = vld [vmem:[%s3299_s16 + $0x38] sm:$0xff] }
  0x33   : > { %2708 = vmatprep.subr.bf16.mxu1 %v3159_v49  ;;  %2822 = vmatprep.subr.bf16.mxu0 %v3172_v37  ;;  %v494_v49 = vld [vmem:[#allocation2 + $0x150] sm:$0xff]  ;;  %v495_v50 = vld [vmem:[#allocation2 + $0x158] sm:$0xff]  ;;  %v283_v60 = vmul.f32 %v3312_v17, %v244_v58  ;;  %440 = vst [vmem:[#allocation2 + $0x61] sm:$0xff] %v353_v4 }
  0x34   : > { %1516 = vmatmul.mubr.bf16.gmra.mxu0 %v3399_v21  ;;  %462 = vst [vmem:[#allocation2 + $0x169] sm:$0xff] %v375_v45  ;;  %v3438_v53 = vpack.c.bf16 %v495_v50, %v494_v49  ;;  %v891_v56 = vpack.c.bf16 %v376_v46, %v375_v45  ;;  %v472_v1 = vld [vmem:[#allocation2 + $0x48] sm:$0xff]  ;;  %v473_v3 = vld [vmem:[#allocation2 + $0x50] sm:$0xff]  ;;  %v248_v22 = vld [vmem:[%s3299_s16 + $0x58] sm:$0xff]  ;;  %v757_v45 = vpack.c.bf16 %v531_v25, %v530_v24 }
  0x35   : > { %1523 = vmatprep.mubr.bf16.mxu0 %v3405_v27  ;;  %2823 = vmatpush3.bf16.msra.mxu0 %v3174_v43  ;;  %v3464_v7 = vpack.c.bf16 %v473_v3, %v472_v1  ;;  %v287_v30 = vmul.f32 %v3312_v17, %v248_v22  ;;  %v289_v46 = vmul.f32 %v3312_v17, %v250_v42  ;;  %v3178_v48 = vld [vmem:[%s4361_s3 + $0x1b8] sm:$0xff]   ;;  %v3185_v58 = vld [vmem:[%s4361_s3 + $0x150] sm:$0xff]   ;;  %v3188_v22 = vld [vmem:[%s4361_s3 + $0x1a8] sm:$0xff]  }
  0x36   : > { %2709 = vmatpush3.bf16.msra.mxu1 %v3160_v0  ;;  %v322_v0 = vadd.f32 %v3317_v18, %v283_v60  ;;  %2824 = vmatprep.subr.bf16.mxu0 %v3179_v2  ;;  %v532_v50 = vld [vmem:[#allocation2 + $0x1a] sm:$0xff]  ;;  %v290_v1 = vmul.f32 %v3312_v17, %v251_v59  ;;  %v3184_v3 = vld [vmem:[%s4361_s3 + $0x1b0] sm:$0xff]   ;;  %v3189_v25 = vld [vmem:[%s4361_s3 + $0x148] sm:$0xff]  }
  0x37   : > { %2710 = vmatprep.subr.bf16.mxu1 %v3161_v6  ;;  %v3180_v6 = vld [vmem:[%s4361_s3 + $0x120] sm:$0xff]   ;;  %v326_v36 = vadd.f32 %v3317_v18, %v287_v30  ;;  %v3525_v57 = vadd.f32 %v3317_v18, %v289_v46  ;;  %v252_v60 = vld [vmem:[%s3299_s16 + $0x78] sm:$0xff]  ;;  %v255_v30 = vld [vmem:[%s3299_s16 + $0x90] sm:$0xff] }
  0x38   : > { %v354_v5 = vmax.f32 %v322_v0, 0.0  ;;  %v3186_v0 = vld [vmem:[%s4361_s3 + $0x110] sm:$0xff]   ;;  %v291_v2 = vmul.f32 %v3312_v17, %v252_v60  ;;  %v294_v35 = vmul.f32 %v3312_v17, %v255_v30  ;;  %v3191_v42 = vld [vmem:[%s4361_s3 + $0x1e0] sm:$0xff]  }
  0x39   : > { %1612 = vmatmul.mubr.bf16.gmra.mxu1 %v3403_v26  ;;  %2825 = vmatpush3.bf16.msra.mxu0 %v3180_v6  ;;  %v358_v40 = vmax.f32 %v326_v36, 0.0  ;;  %v360_v63 = vmax.f32 %v3525_v57, 0.0  ;;  %v3193_v46 = vld [vmem:[%s4361_s3 + $0x140] sm:$0xff]   ;;  %v536_v60 = vld [vmem:[#allocation2 + $0x4a] sm:$0xff] }
  0x3a   : > { %2711 = vmatpush3.bf16.msra.mxu1 %v3162_v10  ;;  %1619 = vmatprep.mubr.bf16.mxu1 %v882_v28  ;;  %v245_v10 = vld [vmem:[%s3299_s16 + $0x40] sm:$0xff]  ;;  %441 = vst [vmem:[#allocation2 + $0x69] sm:$0xff] %v354_v5  ;;  %v3472_v13 = vpack.c.bf16 %v354_v5, %v353_v4  ;;  %v3550_v5 = vadd.f32 %v3317_v18, %v290_v1 }
  0x3b   : > { %2712 = vmatprep.subr.bf16.mxu1 %v3163_v14  ;;  %v496_v8 = vld [vmem:[#allocation2 + $0x168] sm:$0xff]  ;;  %v497_v9 = vld [vmem:[#allocation2 + $0x170] sm:$0xff]  ;;  %v284_v15 = vmul.f32 %v3312_v17, %v245_v10  ;;  %v474_v43 = vld [vmem:[#allocation2 + $0x60] sm:$0xff]  ;;  %445 = vst [vmem:[#allocation2 + $0x99] sm:$0xff] %v358_v40  ;;  %v3553_v6 = vadd.f32 %v3317_v18, %v291_v2  ;;  %v3567_v20 = vpack.c.bf16 %v358_v40, %v357_v39 }
  0x3c   : > { %1524 = vmatmul.mubr.bf16.gmra.mxu0 %v3436_v52  ;;  %v3467_v11 = vpack.c.bf16 %v497_v9, %v496_v8  ;;  %v246_v14 = vld [vmem:[%s3299_s16 + $0x48] sm:$0xff]  ;;  %447 = vst [vmem:[#allocation2 + $0xb1] sm:$0xff] %v360_v63  ;;  %v253_v10 = vld [vmem:[%s3299_s16 + $0x80] sm:$0xff]  ;;  %v3602_v40 = vadd.f32 %v3317_v18, %v294_v35  ;;  %v3657_v2 = vld [vmem:[%s4361_s3 + $0x238] sm:$0xff]  }
  0x3d   : > { %1531 = vmatprep.mubr.bf16.mxu0 %v3434_v51  ;;  %v285_v19 = vmul.f32 %v3312_v17, %v246_v14  ;;  %v323_v28 = vadd.f32 %v3317_v18, %v284_v15  ;;  %v3187_v8 = vld [vmem:[%s4361_s3 + $0x1e8] sm:$0xff]   ;;  %v361_v15 = vmax.f32 %v3550_v5, 0.0 }
  0x3e   : > { %2713 = vmatpush3.bf16.msra.mxu1 %v3165_v32  ;;  %v3181_v32 = vld [vmem:[%s4361_s3 + $0x158] sm:$0xff]  }
  0x3f   : > { %2714 = vmatprep.subr.bf16.mxu1 %v3167_v38  ;;  %v324_v31 = vadd.f32 %v3317_v18, %v285_v19  ;;  %v355_v34 = vmax.f32 %v323_v28, 0.0  ;;  %v3183_v38 = vld [vmem:[%s4361_s3 + $0x118] sm:$0xff]   ;;  %2826 = vmatprep.subr.bf16.mxu0 %v3181_v32  ;;  %v292_v19 = vmul.f32 %v3312_v17, %v253_v10  ;;  %448 = vst [vmem:[#allocation2 + $0xc1] sm:$0xff] %v361_v15 }
  0x40   : > { %2827 = vmatpush3.bf16.msra.mxu0 %v3183_v38  ;;  %v534_v32 = vld [vmem:[#allocation2 + $0x32] sm:$0xff] }
  0x41   : > { %1620 = vmatmul.mubr.bf16.gmra.mxu1 %v3438_v53  ;;  %v356_v37 = vmax.f32 %v324_v31, 0.0  ;;  %442 = vst [vmem:[#allocation2 + $0x79] sm:$0xff] %v355_v34  ;;  %2828 = vmatprep.subr.bf16.mxu0 %v3185_v58  ;;  %v3578_v24 = vadd.f32 %v3317_v18, %v292_v19  ;;  %v256_v31 = vld [vmem:[%s3299_s16 + $0x98] sm:$0xff]  ;;  %v258_v58 = vld [vmem:[%s3299_s16 + $0xa8] sm:$0xff]  ;;  %v3198_v19 = vld [vmem:[%s4361_s3 + $0x1d0] sm:$0xff]  }
  0x42   : > { %2715 = vmatpush3.bf16.msra.mxu1 %v3168_v44  ;;  %1627 = vmatprep.mubr.bf16.mxu1 %v891_v56  ;;  %v475_v44 = vld [vmem:[#allocation2 + $0x68] sm:$0xff]  ;;  %v295_v36 = vmul.f32 %v3312_v17, %v256_v31  ;;  %v479_v38 = vld [vmem:[#allocation2 + $0x98] sm:$0xff]  ;;  %v297_v57 = vmul.f32 %v3312_v17, %v258_v58 }
  0x43   : > { %2716 = vmatprep.subr.bf16.mxu1 %v3169_v54  ;;  %443 = vst [vmem:[#allocation2 + $0x81] sm:$0xff] %v356_v37  ;;  %v3511_v47 = vpack.c.bf16 %v475_v44, %v474_v43  ;;  %v3516_v49 = vpack.c.bf16 %v356_v37, %v355_v34  ;;  %v3182_v54 = vld [vmem:[%s4361_s3 + $0x1f0] sm:$0xff]   ;;  %v363_v34 = vmax.f32 %v3578_v24, 0.0  ;;  %v538_v5 = vld [vmem:[#allocation2 + $0x62] sm:$0xff] }
  0x44   : > { %1532 = vmatmul.mubr.bf16.gmra.mxu0 %v3464_v7  ;;  %v478_v37 = vld [vmem:[#allocation2 + $0x90] sm:$0xff]  ;;  %v3652_v1 = vadd.f32 %v3317_v18, %v297_v57  ;;  %v3203_v31 = vld [vmem:[%s4361_s3 + $0x188] sm:$0xff]   ;;  %v3204_v24 = vld [vmem:[%s4361_s3 + $0x1c0] sm:$0xff]  }
  0x45   : > { %1539 = vmatprep.mubr.bf16.mxu0 %v3472_v13  ;;  %2829 = vmatpush3.bf16.msra.mxu0 %v3186_v0  ;;  %450 = vst [vmem:[#allocation2 + $0xd9] sm:$0xff] %v363_v34  ;;  %v3615_v43 = vpack.c.bf16 %v479_v38, %v478_v37  ;;  %v268_v37 = vld [vmem:[%s3299_s16 + $0xf8] sm:$0xff] }
  0x46   : > { %2717 = vmatpush3.bf16.msra.mxu1 %v3170_v61  ;;  %v533_v61 = vld [vmem:[#allocation2 + $0x22] sm:$0xff]  ;;  %2830 = vmatprep.subr.bf16.mxu0 %v3189_v25 }
  0x47   : > { %2718 = vmatprep.subr.bf16.mxu1 %v3171_v62 }
  0x48   : > { %v476_v4 = vld [vmem:[#allocation2 + $0x78] sm:$0xff] }
  0x49   : > { %1628 = vmatmul.mubr.bf16.gmra.mxu1 %v3467_v11  ;;  %2831 = vmatpush3.bf16.msra.mxu0 %v3190_v29 }
  0x4a   : > { %2719 = vmatpush3.bf16.msra.mxu1 %v3173_v12  ;;  %1668 = vmatprep.mubr.bf16.mxu1 %v3399_v21  ;;  %v288_v21 = vmul.f32 %v3312_v17, %v249_v41  ;;  %v477_v9 = vld [vmem:[#allocation2 + $0x80] sm:$0xff]  ;;  %v254_v12 = vld [vmem:[%s3299_s16 + $0x88] sm:$0xff]  ;;  %v3605_v41 = vadd.f32 %v3317_v18, %v295_v36  ;;  %v267_v36 = vld [vmem:[%s3299_s16 + $0xf0] sm:$0xff] }
  0x4b   : > { %2720 = vmatprep.subr.bf16.mxu1 %v3175_v16  ;;  %v3562_v14 = vpack.c.bf16 %v477_v9, %v476_v4  ;;  %v362_v16 = vmax.f32 %v3553_v6, 0.0  ;;  %2832 = vmatprep.subr.bf16.mxu0 %v3193_v46  ;;  %v368_v4 = vmax.f32 %v3652_v1, 0.0  ;;  %v3200_v6 = vld [vmem:[%s4361_s3 + $0x190] sm:$0xff]   ;;  %v541_v35 = vld [vmem:[#allocation2 + $0x82] sm:$0xff]  ;;  %v306_v38 = vmul.f32 %v3312_v17, %v267_v36  ;;  %v556_v36 = vld [vmem:[#allocation2 + $0x13a] sm:$0xff] }
  0x4c   : > { %v3522_v56 = vadd.f32 %v3317_v18, %v288_v21  ;;  %1540 = vmatmul.mubr.bf16.gmra.mxu0 %v3511_v47  ;;  %v366_v21 = vmax.f32 %v3605_v41, 0.0  ;;  %v543_v41 = vld [vmem:[#allocation2 + $0x9a] sm:$0xff] }
  0x4d   : > { %1547 = vmatprep.mubr.bf16.mxu0 %v3516_v49  ;;  %449 = vst [vmem:[#allocation2 + $0xc9] sm:$0xff] %v362_v16  ;;  %455 = vst [vmem:[#allocation2 + $0x111] sm:$0xff] %v368_v4 }
  0x4e   : > { %2721 = vmatpush3.bf16.msra.mxu1 %v3176_v23  ;;  %v359_v62 = vmax.f32 %v3522_v56, 0.0  ;;  %v293_v23 = vmul.f32 %v3312_v17, %v254_v12  ;;  %453 = vst [vmem:[#allocation2 + $0xf9] sm:$0xff] %v366_v21  ;;  %v3673_v12 = vpack.c.bf16 %v362_v16, %v361_v15  ;;  %v482_v15 = vld [vmem:[#allocation2 + $0xc0] sm:$0xff] }
  0x4f   : > { %2930 = vmatprep.subr.bf16.mxu1 %v3177_v33  ;;  %v535_v33 = vld [vmem:[#allocation2 + $0x3a] sm:$0xff] }
  0x50   : > { %446 = vst [vmem:[#allocation2 + $0xa9] sm:$0xff] %v359_v62  ;;  %v3584_v28 = vadd.f32 %v3317_v18, %v293_v23  ;;  %v3617_v44 = vpack.c.bf16 %v535_v33, %v534_v32  ;;  %v3201_v23 = vld [vmem:[%s4361_s3 + $0x1c8] sm:$0xff]   ;;  %v484_v32 = vld [vmem:[#allocation2 + $0xd8] sm:$0xff] }
  0x51   : > { %1669 = vmatmul.mubr.bf16.vlgmr.msra.gmra.mxu1 %v757_v45  ;;  %v365_v45 = vmax.f32 %v3602_v40, 0.0  ;;  %v540_v33 = vld [vmem:[#allocation2 + $0x7a] sm:$0xff] }
  0x52   : > { %2931 = vmatpush3.bf16.msra.mxu1 %v3178_v48  ;;  %1676 = vmatprep.mubr.bf16.mxu1 %v3436_v52  ;;  %v3558_v52 = vpack.c.bf16 %v533_v61, %v532_v50  ;;  %v364_v39 = vmax.f32 %v3584_v28, 0.0  ;;  %v3194_v48 = vld [vmem:[%s4361_s3 + $0x100] sm:$0xff]   ;;  %v3631_v50 = vpack.c.bf16 %v360_v63, %v359_v62  ;;  %v537_v61 = vld [vmem:[#allocation2 + $0x52] sm:$0xff] }
  0x53   : > { %2932 = vmatprep.subr.bf16.mxu1 %v3182_v54  ;;  %452 = vst [vmem:[#allocation2 + $0xf1] sm:$0xff] %v365_v45  ;;  %v257_v54 = vld [vmem:[%s3299_s16 + $0xa0] sm:$0xff]  ;;  %2833 = vmatpush3.bf16.msra.mxu0 %v3194_v48  ;;  %v3195_v62 = vld [vmem:[%s4361_s3 + $0x1d8] sm:$0xff]   ;;  %v3666_v10 = vpack.c.bf16 %v537_v61, %v536_v60  ;;  %v3727_v46 = vpack.c.bf16 %v366_v21, %v365_v45 }
  0x54   : > { %1548 = vmatmul.mubr.bf16.gmra.mxu0 %v3562_v14  ;;  %451 = vst [vmem:[#allocation2 + $0xe1] sm:$0xff] %v364_v39  ;;  %v296_v56 = vmul.f32 %v3312_v17, %v257_v54  ;;  %3066 = vmatprep.subr.bf16.mxu0 %v3657_v2  ;;  %v483_v16 = vld [vmem:[#allocation2 + $0xc8] sm:$0xff]  ;;  %v3700_v30 = vpack.c.bf16 %v364_v39, %v363_v34  ;;  %v3206_v34 = vld [vmem:[%s4361_s3 + $0x180] sm:$0xff]  }
  0x55   : > { %1555 = vmatprep.mubr.bf16.mxu0 %v3567_v20  ;;  %v3692_v25 = vpack.c.bf16 %v483_v16, %v482_v15  ;;  %v345_v48 = vadd.f32 %v3317_v18, %v306_v38  ;;  %v546_v1 = vld [vmem:[#allocation2 + $0xc2] sm:$0xff]  ;;  %v558_v38 = vld [vmem:[#allocation2 + $0x152] sm:$0xff] }
  0x56   : > { %2933 = vmatpush3.bf16.msra.mxu1 %v3184_v3  ;;  %v3649_v0 = vadd.f32 %v3317_v18, %v296_v56  ;;  %v584_v16 = vld [vmem:[#allocation2 + $0x120] sm:$0xff] }
  0x57   : > { %2934 = vmatprep.subr.bf16.mxu1 %v3187_v8  ;;  %v480_v59 = vld [vmem:[#allocation2 + $0xa8] sm:$0xff]  ;;  %v481_v63 = vld [vmem:[#allocation2 + $0xb0] sm:$0xff]  ;;  %v3197_v8 = vld [vmem:[%s4361_s3 + $0x198] sm:$0xff]   ;;  %v377_v58 = vmax.f32 %v345_v48, 0.0 }
  0x58   : > { %v367_v3 = vmax.f32 %v3649_v0, 0.0  ;;  %v3664_v9 = vpack.c.bf16 %v481_v63, %v480_v59  ;;  %v542_v59 = vld [vmem:[#allocation2 + $0x92] sm:$0xff]  ;;  %v544_v61 = vld [vmem:[#allocation2 + $0xaa] sm:$0xff] }
  0x59   : > { %1677 = vmatmul.mubr.bf16.gmra.mxu1 %v3558_v52  ;;  %464 = vst [vmem:[#allocation2 + $0x181] sm:$0xff] %v377_v58  ;;  %v3737_v21 = vpack.c.bf16 %v543_v41, %v542_v59  ;;  %v560_v59 = vld [vmem:[#allocation2 + $0x16a] sm:$0xff] }
  0x5a   : > { %1684 = vmatprep.mubr.bf16.mxu1 %v3464_v7  ;;  %2935 = vmatpush3.bf16.msra.mxu1 %v3188_v22  ;;  %v3192_v7 = vld [vmem:[%s4361_s3 + $0x1a0] sm:$0xff]   ;;  %454 = vst [vmem:[#allocation2 + $0x109] sm:$0xff] %v367_v3  ;;  %v539_v22 = vld [vmem:[#allocation2 + $0x6a] sm:$0xff]  ;;  %v487_v40 = vld [vmem:[#allocation2 + $0xf8] sm:$0xff] }
  0x5b   : > { %2936 = vmatprep.subr.bf16.mxu1 %v3191_v42  ;;  %v3694_v29 = vpack.c.bf16 %v539_v22, %v538_v5  ;;  %v485_v28 = vld [vmem:[#allocation2 + $0xe0] sm:$0xff]  ;;  %v3720_v42 = vpack.c.bf16 %v541_v35, %v540_v33  ;;  %v585_v22 = vld [vmem:[#allocation2 + $0x128] sm:$0xff]  ;;  %v553_v33 = vld [vmem:[#allocation2 + $0x112] sm:$0xff] }
  0x5c   : > { %1556 = vmatmul.mubr.bf16.gmra.mxu0 %v3615_v43  ;;  %v3718_v39 = vpack.c.bf16 %v485_v28, %v484_v32  ;;  %v548_v5 = vld [vmem:[#allocation2 + $0xda] sm:$0xff]  ;;  %v3786_v32 = vpack.c.bf16 %v585_v22, %v584_v16  ;;  %v3209_v35 = vld [vmem:[%s4361_s3 + $0x208] sm:$0xff]  }
  0x5d   : > { %1563 = vmatprep.mubr.bf16.mxu0 %v3631_v50  ;;  %v555_v28 = vld [vmem:[#allocation2 + $0x12a] sm:$0xff] }
  0x5e   : > { %2937 = vmatpush3.bf16.msra.mxu1 %v3192_v7  ;;  %v307_v7 = vmul.f32 %v3312_v17, %v268_v37  ;;  %v486_v17 = vld [vmem:[#allocation2 + $0xf0] sm:$0xff]  ;;  %v557_v37 = vld [vmem:[#allocation2 + $0x142] sm:$0xff] }
  0x5f   : > { %2938 = vmatprep.subr.bf16.mxu1 %v3195_v62  ;;  %v3735_v45 = vpack.c.bf16 %v487_v40, %v486_v17  ;;  %v545_v62 = vld [vmem:[#allocation2 + $0xb2] sm:$0xff] }
  0x60   : > { %v346_v54 = vadd.f32 %v3317_v18, %v307_v7  ;;  %v3743_v18 = vpack.c.bf16 %v368_v4, %v367_v3  ;;  %v547_v3 = vld [vmem:[#allocation2 + $0xca] sm:$0xff]  ;;  %v559_v7 = vld [vmem:[#allocation2 + $0x15a] sm:$0xff] }
  0x61   : > { %1685 = vmatmul.mubr.bf16.gmra.mxu1 %v3617_v44  ;;  %v488_v56 = vld [vmem:[#allocation2 + $0x108] sm:$0xff]  ;;  %v489_v57 = vld [vmem:[#allocation2 + $0x110] sm:$0xff]  ;;  %v3759_v4 = vpack.c.bf16 %v547_v3, %v546_v1  ;;  %v592_v48 = vld [vmem:[#allocation2 + $0x180] sm:$0xff] }
  0x62   : > { %1692 = vmatprep.mubr.bf16.mxu1 %v3511_v47  ;;  %2939 = vmatpush3.bf16.msra.mxu1 %v3197_v8  ;;  %v378_v60 = vmax.f32 %v346_v54, 0.0  ;;  %v3749_v63 = vpack.c.bf16 %v489_v57, %v488_v56  ;;  %v3751_v8 = vpack.c.bf16 %v545_v62, %v544_v61  ;;  %v692_v17 = vld [vmem:[#allocation2 + $0x39] sm:$0xff]  ;;  %v659_v61 = vld [vmem:[#allocation2 + $0x30] sm:$0xff] }
  0x63   : > { %2940 = vmatprep.subr.bf16.mxu1 %v3198_v19  ;;  %v3199_v19 = vld [vmem:[%s4361_s3 + $0x230] sm:$0xff]   ;;  %v660_v56 = vld [vmem:[#allocation2 + $0x38] sm:$0xff] }
  0x64   : > { %1564 = vmatmul.mubr.bf16.gmra.mxu0 %v3664_v9  ;;  %465 = vst [vmem:[#allocation2 + $0x189] sm:$0xff] %v378_v60  ;;  %v3753_v0 = vpack.c.bf16 %v378_v60, %v377_v58  ;;  %v3819_v58 = vpack.c.bf16 %v559_v7, %v558_v38  ;;  %v691_v60 = vld [vmem:[#allocation2 + $0x31] sm:$0xff]  ;;  %v693_v57 = vld [vmem:[#allocation2 + $0x49] sm:$0xff]  ;;  %v761_v1 = vpack.c.bf16 %v660_v56, %v659_v61 }
  0x65   : > { %1571 = vmatprep.mubr.bf16.mxu0 %v3673_v12  ;;  %v762_v41 = vpack.c.bf16 %v692_v17, %v691_v60  ;;  %v694_v62 = vld [vmem:[#allocation2 + $0x51] sm:$0xff]  ;;  %v622_v38 = vld [vmem:[#allocation2 + $0x169] sm:$0xff] }
  0x66   : > { %2941 = vmatpush3.bf16.msra.mxu1 %v3200_v6  ;;  %v549_v6 = vld [vmem:[#allocation2 + $0xe2] sm:$0xff]  ;;  %v771_v3 = vpack.c.bf16 %v694_v62, %v693_v57  ;;  %v623_v7 = vld [vmem:[#allocation2 + $0x171] sm:$0xff] }
  0x67   : > { %2942 = vmatprep.subr.bf16.mxu1 %v3201_v23  ;;  %v3772_v15 = vpack.c.bf16 %v549_v6, %v548_v5  ;;  %v3207_v23 = vld [vmem:[%s4361_s3 + $0x218] sm:$0xff]   ;;  %v662_v5 = vld [vmem:[#allocation2 + $0x50] sm:$0xff]  ;;  %v3871_v56 = vpack.c.bf16 %v623_v7, %v622_v38 }
  0x68   : > { %v728_v38 = vld [vmem:[#allocation2 + $0x6a] sm:$0xff] }
  0x69   : > { %1693 = vmatmul.mubr.bf16.gmra.mxu1 %v3666_v10 }
  0x6a   : > { %1700 = vmatprep.mubr.bf16.mxu1 %v3562_v14  ;;  %2943 = vmatpush3.bf16.msra.mxu1 %v3203_v31 }
  0x6b   : > { %2944 = vmatprep.subr.bf16.mxu1 %v3204_v24  ;;  %v593_v54 = vld [vmem:[#allocation2 + $0x188] sm:$0xff] }
  0x6c   : > { %1572 = vmatmul.mubr.bf16.gmra.mxu0 %v3692_v25 }
  0x6d   : > { %1579 = vmatprep.mubr.bf16.mxu0 %v3700_v30 }
  0x6e   : > { %2945 = vmatpush3.bf16.msra.mxu1 %v3206_v34 }
  0x71   : > { %1701 = vmatmul.mubr.bf16.gmra.mxu1 %v3694_v29 }
  0x72   : > { %1708 = vmatprep.mubr.bf16.mxu1 %v3615_v43 }
  0x74   : > { %1580 = vmatmul.mubr.bf16.gmra.mxu0 %v3718_v39 }
  0x75   : > { %1587 = vmatprep.mubr.bf16.mxu0 %v3727_v46 }
  0x79   : > { %1709 = vmatmul.mubr.bf16.gmra.mxu1 %v3720_v42 }
  0x7a   : > { %1716 = vmatprep.mubr.bf16.mxu1 %v3664_v9 }
  0x7c   : > { %1588 = vmatmul.mubr.bf16.gmra.mxu0 %v3735_v45 }
  0x7d   : > { %1595 = vmatprep.mubr.bf16.mxu0 %v3743_v18 }
  0x81   : > { %1717 = vmatmul.mubr.bf16.gmra.mxu1 %v3737_v21 }
  0x82   : > { %1724 = vmatprep.mubr.bf16.mxu1 %v3692_v25 }
  0x84   : > { %1596 = vmatmul.mubr.bf16.gmra.mxu0 %v3749_v63 }
  0x85   : > { %1829 = vmatprep.mubr.bf16.mxu0 %v3558_v52  ;;  %v3202_v52 = vld [vmem:[%s4361_s3 + $0x228] sm:$0xff]  }
  0x89   : > { %1725 = vmatmul.mubr.bf16.gmra.mxu1 %v3751_v8 }
  0x8a   : > { %1732 = vmatprep.mubr.bf16.mxu1 %v3718_v39 }
  0x8c   : > { %1830 = vmatmul.mubr.bf16.vlgmr.msra.gmra.mxu0 %v3365_v55  ;;  %v3205_v55 = vld [vmem:[%s4361_s3 + $0x220] sm:$0xff]  }
  0x8d   : > { %3067 = vmatpush3.bf16.msra.mxu0 %v3657_v2  ;;  %1837 = vmatprep.mubr.bf16.mxu0 %v3617_v44  ;;  %v550_v44 = vld [vmem:[#allocation2 + $0xf2] sm:$0xff]  ;;  %v551_v2 = vld [vmem:[#allocation2 + $0xfa] sm:$0xff] }
  0x8e   : > { %3068 = vmatprep.subr.bf16.mxu0 %v3199_v19  ;;  %v3784_v31 = vpack.c.bf16 %v551_v2, %v550_v44  ;;  %v619_v2 = vld [vmem:[#allocation2 + $0x141] sm:$0xff] }
  0x91   : > { %1733 = vmatmul.mubr.bf16.gmra.mxu1 %v3759_v4  ;;  %3069 = vmatpush3.bf16.msra.mxu0 %v3199_v19  ;;  %v661_v19 = vld [vmem:[#allocation2 + $0x48] sm:$0xff] }
  0x92   : > { %1740 = vmatprep.mubr.bf16.mxu1 %v3735_v45  ;;  %3070 = vmatprep.subr.bf16.mxu0 %v3202_v52  ;;  %v770_v6 = vpack.c.bf16 %v662_v5, %v661_v19 }
  0x94   : > { %1838 = vmatmul.mubr.bf16.gmra.mxu0 %v3405_v27  ;;  %v3208_v27 = vld [vmem:[%s4361_s3 + $0x210] sm:$0xff]  }
  0x95   : > { %1845 = vmatprep.mubr.bf16.mxu0 %v3666_v10  ;;  %3071 = vmatpush3.bf16.msra.mxu0 %v3202_v52  ;;  %v552_v10 = vld [vmem:[#allocation2 + $0x10a] sm:$0xff]  ;;  %v616_v52 = vld [vmem:[#allocation2 + $0x121] sm:$0xff] }
  0x96   : > { %3072 = vmatprep.subr.bf16.mxu0 %v3205_v55  ;;  %v3798_v24 = vpack.c.bf16 %v553_v33, %v552_v10 }
  0x99   : > { %1741 = vmatmul.mubr.bf16.gmra.mxu1 %v3772_v15  ;;  %3073 = vmatpush3.bf16.msra.mxu0 %v3205_v55  ;;  %v617_v55 = vld [vmem:[#allocation2 + $0x129] sm:$0xff] }
  0x9a   : > { %1748 = vmatprep.mubr.bf16.mxu1 %v3749_v63  ;;  %3074 = vmatprep.subr.bf16.mxu0 %v3207_v23  ;;  %v3841_v44 = vpack.c.bf16 %v617_v55, %v616_v52  ;;  %v723_v52 = vld [vmem:[#allocation2 + $0x32] sm:$0xff]  ;;  %v724_v55 = vld [vmem:[#allocation2 + $0x3a] sm:$0xff] }
  0x9c   : > { %1846 = vmatmul.mubr.bf16.gmra.mxu0 %v3434_v51  ;;  %v3210_v51 = vld [vmem:[%s4361_s3 + $0x200] sm:$0xff]  }
  0x9d   : > { %1853 = vmatprep.mubr.bf16.mxu0 %v3694_v29  ;;  %3075 = vmatpush3.bf16.msra.mxu0 %v3207_v23  ;;  %v554_v29 = vld [vmem:[#allocation2 + $0x122] sm:$0xff] }
  0x9e   : > { %3076 = vmatprep.subr.bf16.mxu0 %v3208_v27  ;;  %v3807_v34 = vpack.c.bf16 %v555_v28, %v554_v29 }
  0xa1   : > { %1749 = vmatmul.mubr.bf16.gmra.mxu1 %v3784_v31  ;;  %3077 = vmatpush3.bf16.msra.mxu0 %v3208_v27 }
  0xa2   : > { %1756 = vmatprep.mubr.bf16.mxu1 %v3786_v32  ;;  %3078 = vmatprep.subr.bf16.mxu0 %v3209_v35 }
  0xa4   : > { %1854 = vmatmul.mubr.bf16.gmra.mxu0 %v3472_v13 }
  0xa5   : > { %1861 = vmatprep.mubr.bf16.mxu0 %v3720_v42  ;;  %3079 = vmatpush3.bf16.msra.mxu0 %v3209_v35 }
  0xa6   : > { %3080 = vmatprep.subr.bf16.mxu0 %v3210_v51 }
  0xa9   : > { %1757 = vmatmul.mubr.bf16.gmra.mxu1 %v3798_v24  ;;  %3081 = vmatpush3.bf16.msra.mxu0 %v3210_v51 }
  0xaa   : > { %1764 = vmatprep.mubr.bf16.mxu1 %v3403_v26  ;;  %v3813_v26 = vpack.c.bf16 %v557_v37, %v556_v36 }
  0xac   : > { %1862 = vmatmul.mubr.bf16.gmra.mxu0 %v3516_v49 }
  0xad   : > { %1869 = vmatprep.mubr.bf16.mxu0 %v3737_v21 }
  0xb1   : > { %1765 = vmatmul.mubr.bf16.gmra.mxu1 %v3807_v34 }
  0xb2   : > { %1772 = vmatprep.mubr.bf16.mxu1 %v3438_v53  ;;  %v3821_v53 = vpack.c.bf16 %v593_v54, %v592_v48 }
  0xb4   : > { %1870 = vmatmul.mubr.bf16.gmra.mxu0 %v3567_v20 }
  0xb5   : > { %1877 = vmatprep.mubr.bf16.mxu0 %v3751_v8 }
  0xb9   : > { %1773 = vmatmul.mubr.bf16.gmra.mxu1 %v3813_v26 }
  0xba   : > { %1780 = vmatprep.mubr.bf16.mxu1 %v3467_v11  ;;  %v561_v11 = vld [vmem:[#allocation2 + $0x172] sm:$0xff] }
  0xbb   : > { %v3827_v40 = vpack.c.bf16 %v561_v11, %v560_v59  ;;  %v656_v59 = vld [vmem:[#allocation2 + $0x182] sm:$0xff]  ;;  %v657_v11 = vld [vmem:[#allocation2 + $0x18a] sm:$0xff] }
  0xbc   : > { %1878 = vmatmul.mubr.bf16.gmra.mxu0 %v3631_v50  ;;  %v3873_v57 = vpack.c.bf16 %v657_v11, %v656_v59 }
  0xbd   : > { %1885 = vmatprep.mubr.bf16.mxu0 %v3759_v4 }
  0xc1   : > { %1781 = vmatmul.mubr.bf16.gmra.mxu1 %v3819_v58 }
  0xc2   : > { %1788 = vmatprep.mubr.bf16.mxu1 %v3821_v53 }
  0xc4   : > { %1886 = vmatmul.mubr.bf16.gmra.mxu0 %v3673_v12 }
  0xc5   : > { %1893 = vmatprep.mubr.bf16.mxu0 %v3772_v15 }
  0xc9   : > { %1789 = vmatmul.mubr.bf16.gmra.mxu1 %v3827_v40 }
  0xca   : > { %1990 = vmatprep.mubr.bf16.mxu1 %v762_v41 }
  0xcc   : > { %1894 = vmatmul.mubr.bf16.gmra.mxu0 %v3700_v30 }
  0xcd   : > { %1901 = vmatprep.mubr.bf16.mxu0 %v3784_v31 }
  0xd1   : > { %1991 = vmatmul.mubr.bf16.vlgmr.msra.gmra.mxu1 %v761_v1 }
  0xd2   : > { %1998 = vmatprep.mubr.bf16.mxu1 %v771_v3 }
  0xd4   : > { %1902 = vmatmul.mubr.bf16.gmra.mxu0 %v3727_v46 }
  0xd5   : > { %1909 = vmatprep.mubr.bf16.mxu0 %v3798_v24 }
  0xd9   : > { %1999 = vmatmul.mubr.bf16.gmra.mxu1 %v770_v6 }
  0xda   : > { %2006 = vmatprep.mubr.bf16.mxu1 %v3472_v13  ;;  %v618_v13 = vld [vmem:[#allocation2 + $0x139] sm:$0xff] }
  0xdb   : > { %v3847_v16 = vpack.c.bf16 %v619_v2, %v618_v13 }
  0xdc   : > { %1910 = vmatmul.mubr.bf16.gmra.mxu0 %v3743_v18 }
  0xdd   : > { %1917 = vmatprep.mubr.bf16.mxu0 %v3807_v34 }
  0xe1   : > { %2007 = vmatmul.mubr.bf16.gmra.mxu1 %v3511_v47 }
  0xe2   : > { %2014 = vmatprep.mubr.bf16.mxu1 %v3516_v49  ;;  %v620_v49 = vld [vmem:[#allocation2 + $0x151] sm:$0xff] }
  0xe4   : > { %1918 = vmatmul.mubr.bf16.gmra.mxu0 %v3841_v44 }
  0xe5   : > { %1925 = vmatprep.mubr.bf16.mxu0 %v3813_v26 }
  0xe9   : > { %2015 = vmatmul.mubr.bf16.gmra.mxu1 %v3562_v14  ;;  %v621_v14 = vld [vmem:[#allocation2 + $0x159] sm:$0xff] }
  0xea   : > { %2022 = vmatprep.mubr.bf16.mxu1 %v3567_v20  ;;  %v3857_v51 = vpack.c.bf16 %v621_v14, %v620_v49  ;;  %v763_v49 = vpack.c.bf16 %v724_v55, %v723_v52 }
  0xec   : > { %v2610_v47 = vpop.f32.mrf.mxu0  ;;  %1926 = vmatmul.mubr.bf16.gmra.mxu0 %v3847_v16 }
  0xed   : > { %1933 = vmatprep.mubr.bf16.mxu0 %v3819_v58 }
  0xee   : > { %v2611_v23 = vpop.f32.mrf.mxu0 }
  0xef   : > { %v3853_v10 = vadd.f32 %v2611_v23, %v2610_v47 }
  0xf0   : > { %v2613_v33 = vpop.f32.mrf.mxu0 }
  0xf1   : > { %v2682_v22 = vpop.f32.mrf.mxu1  ;;  %2023 = vmatmul.mubr.bf16.gmra.mxu1 %v3615_v43 }
  0xf2   : > { %2030 = vmatprep.mubr.bf16.mxu1 %v3631_v50  ;;  %v2614_v29 = vpop.f32.mrf.mxu0 }
  0xf3   : > { %v2683_v27 = vpop.f32.mrf.mxu1  ;;  %v3859_v36 = vadd.f32 %v2614_v29, %v2613_v33  ;;  %v726_v29 = vld [vmem:[#allocation2 + $0x52] sm:$0xff] }
  0xf4   : > { %v3855_v20 = vadd.f32 %v2683_v27, %v2682_v22  ;;  %v2616_v37 = vpop.f32.mrf.mxu0  ;;  %1934 = vmatmul.mubr.bf16.gmra.mxu0 %v3857_v51 }
  0xf5   : > { %v2685_v35 = vpop.f32.mrf.mxu1  ;;  %1941 = vmatprep.mubr.bf16.mxu0 %v3827_v40 }
  0xf6   : > { %v2617_v48 = vpop.f32.mrf.mxu0 }
  0xf7   : > { %v2686_v28 = vpop.f32.mrf.mxu1  ;;  %v3867_v60 = vadd.f32 %v2617_v48, %v2616_v37 }
  0xf8   : > { %v3861_v43 = vadd.f32 %v2686_v28, %v2685_v35  ;;  %v2619_v41 = vpop.f32.mrf.mxu0 }
  0xf9   : > { %v2688_v50 = vpop.f32.mrf.mxu1  ;;  %2031 = vmatmul.mubr.bf16.gmra.mxu1 %v3664_v9 }
  0xfa   : > { %2038 = vmatprep.mubr.bf16.mxu1 %v3673_v12  ;;  %v2620_v9 = vpop.f32.mrf.mxu0 }
  0xfb   : > { %v2689_v54 = vpop.f32.mrf.mxu1  ;;  %v3875_v1 = vadd.f32 %v2620_v9, %v2619_v41 }
  0xfc   : > { %v3869_v17 = vadd.f32 %v2689_v54, %v2688_v50  ;;  %v2622_v3 = vpop.f32.mrf.mxu0  ;;  %1942 = vmatmul.mubr.bf16.gmra.mxu0 %v3871_v56  ;;  %v727_v50 = vld [vmem:[#allocation2 + $0x62] sm:$0xff] }
  0xfd   : > { %v2691_v61 = vpop.f32.mrf.mxu1  ;;  %1949 = vmatprep.mubr.bf16.mxu0 %v3873_v57  ;;  %v781_v41 = vpack.c.bf16 %v728_v38, %v727_v50 }
  0xfe   : > { %v2623_v5 = vpop.f32.mrf.mxu0 }
  0xff   : > { %v2692_v62 = vpop.f32.mrf.mxu1  ;;  %v3883_v13 = vadd.f32 %v2623_v5, %v2622_v3 }
 0x100   : > { %v3877_v12 = vadd.f32 %v2692_v62, %v2691_v61  ;;  %v2625_v47 = vpop.f32.mrf.mxu0 }
 0x101   : > { %v2694_v19 = vpop.f32.mrf.mxu1  ;;  %2039 = vmatmul.mubr.bf16.gmra.mxu1 %v3692_v25 }
 0x102   : > { %2046 = vmatprep.mubr.bf16.mxu1 %v3700_v30  ;;  %v2626_v14 = vpop.f32.mrf.mxu0  ;;  %v725_v30 = vld [vmem:[#allocation2 + $0x4a] sm:$0xff] }
 0x103   : > { %v2695_v6 = vpop.f32.mrf.mxu1  ;;  %v3887_v27 = vadd.f32 %v2626_v14, %v2625_v47  ;;  %v772_v11 = vpack.c.bf16 %v726_v29, %v725_v30 }
 0x104   : > { %v3885_v2 = vadd.f32 %v2695_v6, %v2694_v19  ;;  %v2628_v33 = vpop.f32.mrf.mxu0  ;;  %1950 = vmatmul.mubr.bf16.gmra.mxu0 %v3753_v0 }
 0x105   : > { %v2697_v22 = vpop.f32.mrf.mxu1  ;;  %3082 = vmatprep.mubr.bf16.mxu0 %v763_v49 }
 0x106   : > { %v2629_v28 = vpop.f32.mrf.mxu0 }
 0x107   : > { %v2698_v23 = vpop.f32.mrf.mxu1  ;;  %v3894_v7 = vadd.f32 %v2629_v28, %v2628_v33 }
 0x108   : > { %v3889_v25 = vadd.f32 %v2698_v23, %v2697_v22  ;;  %v2631_v54 = vpop.f32.mrf.mxu0 }
 0x109   : > { %v2700_v35 = vpop.f32.mrf.mxu1  ;;  %2047 = vmatmul.mubr.bf16.gmra.mxu1 %v3718_v39 }
 0x10a   : > { %2054 = vmatprep.mubr.bf16.mxu1 %v3727_v46  ;;  %v2632_v61 = vpop.f32.mrf.mxu0 }
 0x10b   : > { %v2701_v37 = vpop.f32.mrf.mxu1  ;;  %v3898_v39 = vadd.f32 %v2632_v61, %v2631_v54 }
 0x10c   : > { %v3896_v48 = vadd.f32 %v2701_v37, %v2700_v35  ;;  %v2634_v62 = vpop.f32.mrf.mxu0  ;;  %3083 = vmatmul.mubr.bf16.vlgmr.msra.gmra.mxu0 %v772_v11 }
 0x10d   : > { %v2703_v59 = vpop.f32.mrf.mxu1  ;;  %3086 = vmatprep.mubr.bf16.mxu0 %v781_v41 }
 0x10e   : > { %v2635_v19 = vpop.f32.mrf.mxu0 }
 0x10f   : > { %v2704_v9 = vpop.f32.mrf.mxu1  ;;  %v3904_v6 = vadd.f32 %v2635_v19, %v2634_v62 }
 0x110   : > { %v3900_v46 = vadd.f32 %v2704_v9, %v2703_v59  ;;  %v2637_v55 = vpop.f32.mrf.mxu0 }
 0x111   : > { %v2722_v3 = vpop.f32.mrf.mxu1  ;;  %2055 = vmatmul.mubr.bf16.gmra.mxu1 %v3735_v45 }
 0x112   : > { %2062 = vmatprep.mubr.bf16.mxu1 %v3743_v18  ;;  %v2638_v49 = vpop.f32.mrf.mxu0 }
 0x113   : > { %v2723_v5 = vpop.f32.mrf.mxu1  ;;  %v3909_v23 = vadd.f32 %v2638_v49, %v2637_v55  ;;  %v683_v49 = vld [vmem:[#allocation2 + $0x150] sm:$0xff] }
 0x114   : > { %v2724_v52 = vadd.f32 %v2723_v5, %v2722_v3  ;;  %v2640_v45 = vpop.f32.mrf.mxu0  ;;  %3087 = vmatmul.mubr.bf16.gmra.mxu0 %v3720_v42 }
 0x115   : > { %v2725_v47 = vpop.f32.mrf.mxu1  ;;  %3090 = vmatprep.mubr.bf16.mxu0 %v3737_v21 }
 0x116   : > { %v3907_v22 = vadd.f32 %v2724_v52, %v3853_v10  ;;  %v2641_v10 = vpop.f32.mrf.mxu0 }
 0x117   : > { %v2726_v14 = vpop.f32.mrf.mxu1  ;;  %v3918_v29 = vadd.f32 %v2641_v10, %v2640_v45 }
 0x118   : > { %v2727_v33 = vadd.f32 %v2726_v14, %v2725_v47  ;;  %v2643_v37 = vpop.f32.mrf.mxu0 }
 0x119   : > { %v2728_v35 = vpop.f32.mrf.mxu1  ;;  %2063 = vmatmul.mubr.bf16.gmra.mxu1 %v3749_v63 }
 0x11a   : > { %v3914_v18 = vadd.f32 %v2727_v33, %v3859_v36  ;;  %2070 = vmatprep.mubr.bf16.mxu1 %v3841_v44  ;;  %v2644_v63 = vpop.f32.mrf.mxu0  ;;  %v681_v44 = vld [vmem:[#allocation2 + $0x138] sm:$0xff] }
 0x11b   : > { %v2729_v30 = vpop.f32.mrf.mxu1  ;;  %v3923_v42 = vadd.f32 %v2644_v63, %v2643_v37 }
 0x11c   : > { %v2730_v28 = vadd.f32 %v2729_v30, %v2728_v35  ;;  %v2646_v59 = vpop.f32.mrf.mxu0  ;;  %3091 = vmatmul.mubr.bf16.gmra.mxu0 %v3751_v8 }
 0x11d   : > { %v2731_v50 = vpop.f32.mrf.mxu1  ;;  %3094 = vmatprep.mubr.bf16.mxu0 %v3759_v4 }
 0x11e   : > { %v3921_v38 = vadd.f32 %v2730_v28, %v3867_v60  ;;  %v682_v60 = vld [vmem:[#allocation2 + $0x140] sm:$0xff]  ;;  %v2647_v41 = vpop.f32.mrf.mxu0 }
 0x11f   : > { %v2732_v54 = vpop.f32.mrf.mxu1  ;;  %v3932_v9 = vadd.f32 %v2647_v41, %v2646_v59  ;;  %v860_v5 = vpack.c.bf16 %v682_v60, %v681_v44 }
 0x120   : > { %v2733_v36 = vadd.f32 %v2732_v54, %v2731_v50  ;;  %v2649_v3 = vpop.f32.mrf.mxu0 }
 0x121   : > { %v2734_v11 = vpop.f32.mrf.mxu1  ;;  %2071 = vmatmul.mubr.bf16.gmra.mxu1 %v3786_v32 }
 0x122   : > { %v3928_v21 = vadd.f32 %v2733_v36, %v3875_v1  ;;  %2078 = vmatprep.mubr.bf16.mxu1 %v3847_v16  ;;  %v2650_v8 = vpop.f32.mrf.mxu0  ;;  %v685_v36 = vld [vmem:[#allocation2 + $0x168] sm:$0xff] }
 0x123   : > { %v2735_v61 = vpop.f32.mrf.mxu1  ;;  %v3937_v52 = vadd.f32 %v2650_v8, %v2649_v3 }
 0x124   : > { %v2736_v62 = vadd.f32 %v2735_v61, %v2734_v11  ;;  %v2652_v55 = vpop.f32.mrf.mxu0  ;;  %3095 = vmatmul.mubr.bf16.gmra.mxu0 %v3772_v15 }
 0x125   : > { %v2737_v19 = vpop.f32.mrf.mxu1  ;;  %3098 = vmatprep.mubr.bf16.mxu0 %v3784_v31 }
 0x126   : > { %v3935_v32 = vadd.f32 %v2736_v62, %v3883_v13  ;;  %v684_v13 = vld [vmem:[#allocation2 + $0x158] sm:$0xff]  ;;  %v2653_v14 = vpop.f32.mrf.mxu0 }
 0x127   : > { %v2738_v1 = vpop.f32.mrf.mxu1  ;;  %v3945_v45 = vadd.f32 %v2653_v14, %v2652_v55  ;;  %v869_v28 = vpack.c.bf16 %v684_v13, %v683_v49  ;;  %v722_v55 = vld [vmem:[#allocation2 + $0x1a1] sm:$0xff] }
 0x128   : > { %v2739_v16 = vadd.f32 %v2738_v1, %v2737_v19  ;;  %v2655_v10 = vpop.f32.mrf.mxu0 }
 0x129   : > { %v2740_v4 = vpop.f32.mrf.mxu1  ;;  %2079 = vmatmul.mubr.bf16.gmra.mxu1 %v860_v5 }
 0x12a   : > { %v3941_v47 = vadd.f32 %v2739_v16, %v3887_v27  ;;  %2086 = vmatprep.mubr.bf16.mxu1 %v3857_v51  ;;  %v2656_v15 = vpop.f32.mrf.mxu0  ;;  %v721_v16 = vld [vmem:[#allocation2 + $0x199] sm:$0xff] }
 0x12b   : > { %v2741_v33 = vpop.f32.mrf.mxu1  ;;  %v3950_v50 = vadd.f32 %v2656_v15, %v2655_v10  ;;  %v754_v15 = vld [vmem:[#allocation2 + $0x1a2] sm:$0xff] }
 0x12c   : > { %v2742_v35 = vadd.f32 %v2741_v33, %v2740_v4  ;;  %v2658_v63 = vpop.f32.mrf.mxu0  ;;  %3099 = vmatmul.mubr.bf16.gmra.mxu0 %v3798_v24 }
 0x12d   : > { %v2743_v30 = vpop.f32.mrf.mxu1  ;;  %3102 = vmatprep.mubr.bf16.mxu0 %v3807_v34 }
 0x12e   : > { %v3948_v37 = vadd.f32 %v2742_v35, %v3894_v7  ;;  %v686_v7 = vld [vmem:[#allocation2 + $0x170] sm:$0xff]  ;;  %v2659_v59 = vpop.f32.mrf.mxu0 }
 0x12f   : > { %v2744_v27 = vpop.f32.mrf.mxu1  ;;  %v3958_v44 = vadd.f32 %v2659_v59, %v2658_v63  ;;  %v878_v62 = vpack.c.bf16 %v686_v7, %v685_v36  ;;  %v3211_v59 = vld [vmem:[#allocation2] sm:$0xff] }
 0x130   : > { %v2745_v51 = vadd.f32 %v2744_v27, %v2743_v30  ;;  %v2661_v41 = vpop.f32.mrf.mxu0 }
 0x131   : > { %v2746_v31 = vpop.f32.mrf.mxu1  ;;  %2087 = vmatmul.mubr.bf16.gmra.mxu1 %v869_v28 }
 0x132   : > { %v3954_v54 = vadd.f32 %v2745_v51, %v3898_v39  ;;  %2094 = vmatprep.mubr.bf16.mxu1 %v3871_v56  ;;  %v2662_v24 = vpop.f32.mrf.mxu0 }
 0x133   : > { %v2747_v11 = vpop.f32.mrf.mxu1  ;;  %v3963_v19 = vadd.f32 %v2662_v24, %v2661_v41 }
 0x134   : > { %v2748_v60 = vadd.f32 %v2747_v11, %v2746_v31  ;;  %v2664_v5 = vpop.f32.mrf.mxu0  ;;  %3103 = vmatmul.mubr.bf16.gmra.mxu0 %v3813_v26  ;;  %v897_v26 = vpack.c.bf16 %v722_v55, %v721_v16  ;;  %v896_v11 = vpack.c.bf16 %v3211_v59, %v3211_v59 }
 0x135   : > { %v2749_v61 = vpop.f32.mrf.mxu1  ;;  %3106 = vmatprep.mubr.bf16.mxu0 %v3819_v58 }
 0x136   : > { %v3961_v3 = vadd.f32 %v2748_v60, %v3904_v6  ;;  %v2665_v1 = vpop.f32.mrf.mxu0 }
 0x137   : > { %v2750_v39 = vpop.f32.mrf.mxu1  ;;  %v3971_v4 = vadd.f32 %v2665_v1, %v2664_v5 }
 0x138   : > { %v2751_v56 = vadd.f32 %v2750_v39, %v2749_v61  ;;  %v2667_v13 = vpop.f32.mrf.mxu0 }
 0x139   : > { %v2752_v34 = vpop.f32.mrf.mxu1  ;;  %2095 = vmatmul.mubr.bf16.gmra.mxu1 %v878_v62 }
 0x13a   : > { %v3967_v8 = vadd.f32 %v2751_v56, %v3909_v23  ;;  %2102 = vmatprep.mubr.bf16.mxu1 %v3753_v0  ;;  %v2668_v35 = vpop.f32.mrf.mxu0 }
 0x13b   : > { %v2753_v6 = vpop.f32.mrf.mxu1  ;;  %v3976_v10 = vadd.f32 %v2668_v35, %v2667_v13 }
 0x13c   : > { %v2754_v49 = vadd.f32 %v2753_v6, %v2752_v34  ;;  %v2670_v30 = vpop.f32.mrf.mxu0  ;;  %3107 = vmatmul.mubr.bf16.gmra.mxu0 %v3827_v40 }
 0x13d   : > { %v2755_v14 = vpop.f32.mrf.mxu1  ;;  %3110 = vmatprep.mubr.bf16.mxu0 %v3873_v57 }
 0x13e   : > { %v3974_v33 = vadd.f32 %v2754_v49, %v3918_v29  ;;  %v753_v29 = vld [vmem:[#allocation2 + $0x19a] sm:$0xff]  ;;  %v2671_v27 = vpop.f32.mrf.mxu0 }
 0x13f   : > { %v2756_v23 = vpop.f32.mrf.mxu1  ;;  %v3984_v63 = vadd.f32 %v2671_v27, %v2670_v30 }
 0x140   : > { %v2757_v0 = vadd.f32 %v2756_v23, %v2755_v14  ;;  %v2673_v36 = vpop.f32.mrf.mxu0 }
 0x141   : > { %v2758_v58 = vpop.f32.mrf.mxu1  ;;  %2103 = vmatmul.mubr.bf16.gmra.mxu1 %v3821_v53  ;;  %v898_v53 = vpack.c.bf16 %v754_v15, %v753_v29 }
 0x142   : > { %v3981_v28 = vadd.f32 %v2757_v0, %v3923_v42  ;;  %2110 = vmatprep.mubr.bf16.mxu1 %v897_v26  ;;  %v2674_v42 = vpop.f32.mrf.mxu0 }
 0x143   : > { %v2759_v51 = vpop.f32.mrf.mxu1  ;;  %v3989_v41 = vadd.f32 %v2674_v42, %v2673_v36 }
 0x144   : > { %v2760_v31 = vadd.f32 %v2759_v51, %v2758_v58  ;;  %v2676_v61 = vpop.f32.mrf.mxu0  ;;  %3111 = vmatmul.mubr.bf16.gmra.mxu0 %v898_v53 }
 0x145   : > { %v2761_v7 = vpop.f32.mrf.mxu1 }
 0x146   : > { %v3987_v40 = vadd.f32 %v2760_v31, %v3932_v9  ;;  %v2677_v39 = vpop.f32.mrf.mxu0 }
 0x147   : > { %v2762_v60 = vpop.f32.mrf.mxu1  ;;  %v3994_v5 = vadd.f32 %v2677_v39, %v2676_v61 }
 0x148   : > { %v2763_v57 = vadd.f32 %v2762_v60, %v2761_v7  ;;  %v2679_v1 = vpop.f32.mrf.mxu0 }
 0x149   : > { %v2764_v62 = vpop.f32.mrf.mxu1  ;;  %2111 = vmatmul.mubr.bf16.gmra.mxu1 %v896_v11 }
 0x14a   : > { %v3992_v24 = vadd.f32 %v2763_v57, %v3937_v52  ;;  %v2680_v16 = vpop.f32.mrf.mxu0 }
 0x14b   : > { %v2765_v56 = vpop.f32.mrf.mxu1  ;;  %v3999_v49 = vadd.f32 %v2680_v16, %v2679_v1 }
 0x14c   : > { %v2766_v34 = vadd.f32 %v2765_v56, %v2764_v62  ;;  %v2834_v26 = vpop.f32.mrf.mxu0 }
 0x14d   : > { %v2767_v9 = vpop.f32.mrf.mxu1 }
 0x14e   : > { %v3997_v6 = vadd.f32 %v2766_v34, %v3945_v45  ;;  %v2835_v23 = vpop.f32.mrf.mxu0 }
 0x14f   : > { %v2768_v55 = vpop.f32.mrf.mxu1  ;;  %v2836_v30 = vadd.f32 %v2835_v23, %v2834_v26 }
 0x150   : > { %v2769_v13 = vadd.f32 %v2768_v55, %v2767_v9  ;;  %v2837_v29 = vpop.f32.mrf.mxu0 }
 0x151   : > { %v2770_v14 = vpop.f32.mrf.mxu1  ;;  %v4008_v45 = vadd.f32 %v2836_v30, %v3907_v22 }
 0x152   : > { %v4002_v52 = vadd.f32 %v2769_v13, %v3950_v50  ;;  %v2838_v51 = vpop.f32.mrf.mxu0 }
 0x153   : > { %v2771_v35 = vpop.f32.mrf.mxu1  ;;  %v2839_v36 = vadd.f32 %v2838_v51, %v2837_v29 }
 0x154   : > { %v2772_v0 = vadd.f32 %v2771_v35, %v2770_v14  ;;  %v2840_v59 = vpop.f32.mrf.mxu0 }
 0x155   : > { %v2773_v58 = vpop.f32.mrf.mxu1  ;;  %v4014_v11 = vadd.f32 %v2839_v36, %v3914_v18 }
 0x156   : > { %v4005_v15 = vadd.f32 %v2772_v0, %v3958_v44  ;;  %v2841_v42 = vpop.f32.mrf.mxu0 }
 0x157   : > { %v2774_v27 = vpop.f32.mrf.mxu1  ;;  %v2842_v44 = vadd.f32 %v2841_v42, %v2840_v59 }
 0x158   : > { %v2775_v31 = vadd.f32 %v2774_v27, %v2773_v58  ;;  %v2843_v61 = vpop.f32.mrf.mxu0 }
 0x159   : > { %v2776_v7 = vpop.f32.mrf.mxu1  ;;  %v4020_v62 = vadd.f32 %v2842_v44, %v3921_v38 }
 0x15a   : > { %v4011_v50 = vadd.f32 %v2775_v31, %v3963_v19  ;;  %v2844_v56 = vpop.f32.mrf.mxu0 }
 0x15b   : > { %v2777_v53 = vpop.f32.mrf.mxu1  ;;  %v2845_v19 = vadd.f32 %v2844_v56, %v2843_v61 }
 0x15c   : > { %v2778_v60 = vadd.f32 %v2777_v53, %v2776_v7  ;;  %v2846_v9 = vpop.f32.mrf.mxu0 }
 0x15d   : > { %v2779_v57 = vpop.f32.mrf.mxu1  ;;  %v4026_v16 = vadd.f32 %v2845_v19, %v3928_v21 }
 0x15e   : > { %v4017_v22 = vadd.f32 %v2778_v60, %v3971_v4  ;;  %v2847_v13 = vpop.f32.mrf.mxu0 }
 0x15f   : > { %v2780_v39 = vpop.f32.mrf.mxu1  ;;  %v2848_v4 = vadd.f32 %v2847_v13, %v2846_v9 }
 0x160   : > { %v2781_v34 = vadd.f32 %v2780_v39, %v2779_v57  ;;  %v2849_v35 = vpop.f32.mrf.mxu0 }
 0x161   : > { %v2782_v1 = vpop.f32.mrf.mxu1  ;;  %v4032_v23 = vadd.f32 %v2848_v4, %v3935_v32 }
 0x162   : > { %v4023_v18 = vadd.f32 %v2781_v34, %v3976_v10  ;;  %v2850_v30 = vpop.f32.mrf.mxu0 }
 0x163   : > { %v2783_v55 = vpop.f32.mrf.mxu1  ;;  %v2851_v10 = vadd.f32 %v2850_v30, %v2849_v35 }
 0x164   : > { %v2784_v14 = vadd.f32 %v2783_v55, %v2782_v1  ;;  %v2852_v27 = vpop.f32.mrf.mxu0 }
 0x165   : > { %v2785_v26 = vpop.f32.mrf.mxu1  ;;  %v4038_v51 = vadd.f32 %v2851_v10, %v3941_v47 }
 0x166   : > { %v4029_v38 = vadd.f32 %v2784_v14, %v3984_v63  ;;  %v2853_v36 = vpop.f32.mrf.mxu0 }
 0x167   : > { %v2786_v0 = vpop.f32.mrf.mxu1  ;;  %v2854_v63 = vadd.f32 %v2853_v36, %v2852_v27 }
 0x168   : > { %v2787_v58 = vadd.f32 %v2786_v0, %v2785_v26  ;;  %v2855_v53 = vpop.f32.mrf.mxu0 }
 0x169   : > { %v2788_v29 = vpop.f32.mrf.mxu1  ;;  %v4044_v42 = vadd.f32 %v2854_v63, %v3948_v37 }
 0x16a   : > { %v4035_v21 = vadd.f32 %v2787_v58, %v3989_v41  ;;  %v2856_v44 = vpop.f32.mrf.mxu0 }
 0x16b   : > { %v2789_v31 = vpop.f32.mrf.mxu1  ;;  %v2857_v41 = vadd.f32 %v2856_v44, %v2855_v53 }
 0x16c   : > { %v2790_v7 = vadd.f32 %v2789_v31, %v2788_v29  ;;  %v2858_v39 = vpop.f32.mrf.mxu0 }
 0x16d   : > { %v2791_v59 = vpop.f32.mrf.mxu1  ;;  %v4050_v56 = vadd.f32 %v2857_v41, %v3954_v54 }
 0x16e   : > { %v4041_v32 = vadd.f32 %v2790_v7, %v3994_v5  ;;  %v2859_v19 = vpop.f32.mrf.mxu0 }
 0x16f   : > { %v2792_v60 = vpop.f32.mrf.mxu1  ;;  %v2860_v5 = vadd.f32 %v2859_v19, %v2858_v39 }
 0x170   : > { %v2793_v57 = vadd.f32 %v2792_v60, %v2791_v59  ;;  %v2861_v55 = vpop.f32.mrf.mxu0 }
 0x171   : > { %v2794_v61 = vpop.f32.mrf.mxu1  ;;  %v4056_v13 = vadd.f32 %v2860_v5, %v3961_v3 }
 0x172   : > { %v4047_v47 = vadd.f32 %v2793_v57, %v3999_v49  ;;  %v2862_v4 = vpop.f32.mrf.mxu0 }
 0x173   : > { %v2795_v34 = vpop.f32.mrf.mxu1  ;;  %v2863_v49 = vadd.f32 %v2862_v4, %v2861_v55 }
 0x174   : > { %v2796_v1 = vadd.f32 %v2795_v34, %v2794_v61  ;;  %v2864_v0 = vpop.f32.mrf.mxu0 }
 0x175   : > { %v2797_v9 = vpop.f32.mrf.mxu1  ;;  %v4062_v30 = vadd.f32 %v2863_v49, %v3967_v8 }
 0x176   : > { %v4053_v37 = vadd.f32 %v2796_v1, %v3855_v20  ;;  %v2865_v10 = vpop.f32.mrf.mxu0 }
 0x177   : > { %v2798_v14 = vpop.f32.mrf.mxu1  ;;  %v2866_v20 = vadd.f32 %v2865_v10, %v2864_v0 }
 0x178   : > { %v2799_v26 = vadd.f32 %v2798_v14, %v2797_v9  ;;  %v2867_v31 = vpop.f32.mrf.mxu0 }
 0x179   : > { %v2800_v35 = vpop.f32.mrf.mxu1  ;;  %v4068_v36 = vadd.f32 %v2866_v20, %v3974_v33 }
 0x17a   : > { %v4059_v54 = vadd.f32 %v2799_v26, %v3861_v43  ;;  %v2868_v63 = vpop.f32.mrf.mxu0 }
 0x17b   : > { %v2801_v58 = vpop.f32.mrf.mxu1  ;;  %v2869_v43 = vadd.f32 %v2868_v63, %v2867_v31 }
 0x17c   : > { %v2802_v29 = vadd.f32 %v2801_v58, %v2800_v35  ;;  %v2870_v60 = vpop.f32.mrf.mxu0 }
 0x17d   : > { %v2803_v27 = vpop.f32.mrf.mxu1  ;;  %v4074_v44 = vadd.f32 %v2869_v43, %v3981_v28 }
 0x17e   : > { %v4065_v3 = vadd.f32 %v2802_v29, %v3869_v17  ;;  %v2871_v41 = vpop.f32.mrf.mxu0 }
 0x17f   : > { %v2804_v7 = vpop.f32.mrf.mxu1  ;;  %v2872_v17 = vadd.f32 %v2871_v41, %v2870_v60 }
 0x180   : > { %v2805_v59 = vadd.f32 %v2804_v7, %v2803_v27  ;;  %v2873_v34 = vpop.f32.mrf.mxu0 }
 0x181   : > { %v2806_v53 = vpop.f32.mrf.mxu1  ;;  %v4080_v19 = vadd.f32 %v2872_v17, %v3987_v40 }
 0x182   : > { %v4071_v8 = vadd.f32 %v2805_v59, %v3877_v12  ;;  %v2874_v5 = vpop.f32.mrf.mxu0 }
 0x183   : > { %v2807_v57 = vpop.f32.mrf.mxu1  ;;  %v2875_v12 = vadd.f32 %v2874_v5, %v2873_v34 }
 0x184   : > { %v2808_v61 = vadd.f32 %v2807_v57, %v2806_v53  ;;  %v2876_v14 = vpop.f32.mrf.mxu0 }
 0x185   : > { %v2809_v39 = vpop.f32.mrf.mxu1  ;;  %v4086_v4 = vadd.f32 %v2875_v12, %v3992_v24 }
 0x186   : > { %v4077_v33 = vadd.f32 %v2808_v61, %v3885_v2  ;;  %v2877_v49 = vpop.f32.mrf.mxu0 }
 0x187   : > { %v2810_v1 = vpop.f32.mrf.mxu1  ;;  %v2878_v2 = vadd.f32 %v2877_v49, %v2876_v14 }
 0x188   : > { %v2811_v9 = vadd.f32 %v2810_v1, %v2809_v39  ;;  %v2879_v58 = vpop.f32.mrf.mxu0 }
 0x189   : > { %v2812_v55 = vpop.f32.mrf.mxu1  ;;  %v4092_v10 = vadd.f32 %v2878_v2, %v3997_v6 }
 0x18a   : > { %v4083_v28 = vadd.f32 %v2811_v9, %v3889_v25  ;;  %v2880_v20 = vpop.f32.mrf.mxu0 }
 0x18b   : > { %v2813_v26 = vpop.f32.mrf.mxu1  ;;  %v2881_v25 = vadd.f32 %v2880_v20, %v2879_v58 }
 0x18c   : > { %v2814_v35 = vadd.f32 %v2813_v26, %v2812_v55  ;;  %v2882_v31 = vpop.f32.mrf.mxu0 }
 0x18d   : > { %v2815_v0 = vpop.f32.mrf.mxu1  ;;  %v4100_v63 = vadd.f32 %v2881_v25, %v4002_v52 }
 0x18e   : > { %v4089_v40 = vadd.f32 %v2814_v35, %v3896_v48  ;;  %v2883_v59 = vpop.f32.mrf.mxu0 }
 0x18f   : > { %v2816_v29 = vpop.f32.mrf.mxu1  ;;  %v2884_v48 = vadd.f32 %v2883_v59, %v2882_v31 }
 0x190   : > { %v2817_v27 = vadd.f32 %v2816_v29, %v2815_v0  ;;  %v2885_v53 = vpop.f32.mrf.mxu0 }
 0x191   : > { %v4094_v7 = vpop.f32.mrf.mxu1  ;;  %v4107_v60 = vadd.f32 %v2884_v48, %v4005_v15 }
 0x192   : > { %v4097_v24 = vadd.f32 %v2817_v27, %v3900_v46  ;;  %v2886_v57 = vpop.f32.mrf.mxu0 }
 0x193   : > { %v4102_v43 = vpop.f32.mrf.mxu1  ;;  %v2887_v61 = vadd.f32 %v2886_v57, %v2885_v53 }
 0x194   : > { %v2888_v17 = vpop.f32.mrf.mxu0 }
 0x195   : > { %v4104_v6 = vpop.f32.mrf.mxu1  ;;  %v4114_v52 = vadd.f32 %v2887_v61, %v4011_v50 }
 0x196   : > { %v2889_v39 = vpop.f32.mrf.mxu0 }
 0x197   : > { %v4109_v41 = vpop.f32.mrf.mxu1  ;;  %4364 = vst [vmem:[#allocation3_spill] sm:$0xff] %v4114_v52  ;;  %v2890_v1 = vadd.f32 %v2889_v39, %v2888_v17 }
 0x198   : > { %v2891_v5 = vpop.f32.mrf.mxu0 }
 0x199   : > { %v4111_v46 = vpop.f32.mrf.mxu1  ;;  %v4121_v15 = vadd.f32 %v2890_v1, %v4017_v22 }
 0x19a   : > { %v2892_v12 = vpop.f32.mrf.mxu0 }
 0x19b   : > { %v4116_v34 = vpop.f32.mrf.mxu1  ;;  %v2893_v14 = vadd.f32 %v2892_v12, %v2891_v5 }
 0x19c   : > { %v2894_v26 = vpop.f32.mrf.mxu0 }
 0x19d   : > { %v4118_v9 = vpop.f32.mrf.mxu1  ;;  %v4128_v50 = vadd.f32 %v2893_v14, %v4023_v18 }
 0x19e   : > { %v2895_v35 = vpop.f32.mrf.mxu0 }
 0x19f   : > { %v4123_v55 = vpop.f32.mrf.mxu1  ;;  %v2896_v0 = vadd.f32 %v2895_v35, %v2894_v26 }
 0x1a0   : > { %v2897_v58 = vpop.f32.mrf.mxu0 }
 0x1a1   : > { %v4125_v49 = vpop.f32.mrf.mxu1  ;;  %v4135_v22 = vadd.f32 %v2896_v0, %v4029_v38 }
 0x1a2   : > { %v2898_v20 = vpop.f32.mrf.mxu0 }
 0x1a3   : > { %v4130_v2 = vpop.f32.mrf.mxu1  ;;  %4365 = vst [vmem:[#allocation4_spill] sm:$0xff] %v4135_v22  ;;  %v2899_v25 = vadd.f32 %v2898_v20, %v2897_v58 }
 0x1a4   : > { %v2900_v31 = vpop.f32.mrf.mxu0 }
 0x1a5   : > { %v4132_v29 = vpop.f32.mrf.mxu1  ;;  %v4142_v18 = vadd.f32 %v2899_v25, %v4035_v21 }
 0x1a6   : > { %v2901_v48 = vpop.f32.mrf.mxu0 }
 0x1a7   : > { %v4137_v27 = vpop.f32.mrf.mxu1  ;;  %4366 = vst [vmem:[#allocation5_spill] sm:$0xff] %v4142_v18  ;;  %v2902_v57 = vadd.f32 %v2901_v48, %v2900_v31 }
 0x1a8   : > { %v2903_v61 = vpop.f32.mrf.mxu0 }
 0x1a9   : > { %v4139_v59 = vpop.f32.mrf.mxu1  ;;  %v4149_v38 = vadd.f32 %v2902_v57, %v4041_v32 }
 0x1aa   : > { %v2904_v39 = vpop.f32.mrf.mxu0 }
 0x1ab   : > { %v4144_v53 = vpop.f32.mrf.mxu1  ;;  %4367 = vst [vmem:[#allocation6_spill] sm:$0xff] %v4149_v38  ;;  %v2905_v5 = vadd.f32 %v2904_v39, %v2903_v61 }
 0x1ac   : > { %v2906_v12 = vpop.f32.mrf.mxu0 }
 0x1ad   : > { %v4146_v17 = vpop.f32.mrf.mxu1  ;;  %v4156_v21 = vadd.f32 %v2905_v5, %v4047_v47 }
 0x1ae   : > { %v2907_v26 = vpop.f32.mrf.mxu0 }
 0x1af   : > { %v4151_v1 = vpop.f32.mrf.mxu1  ;;  %4368 = vst [vmem:[#allocation7_spill] sm:$0xff] %v4156_v21  ;;  %v2908_v0 = vadd.f32 %v2907_v26, %v2906_v12 }
 0x1b0   : > { %v2909_v58 = vpop.f32.mrf.mxu0 }
 0x1b1   : > { %v4153_v14 = vpop.f32.mrf.mxu1  ;;  %v4163_v32 = vadd.f32 %v2908_v0, %v4053_v37 }
 0x1b2   : > { %v2910_v25 = vpop.f32.mrf.mxu0 }
 0x1b3   : > { %v4158_v35 = vpop.f32.mrf.mxu1  ;;  %4369 = vst [vmem:[#allocation8_spill] sm:$0xff] %v4163_v32  ;;  %v2911_v48 = vadd.f32 %v2910_v25, %v2909_v58 }
 0x1b4   : > { %v2912_v57 = vpop.f32.mrf.mxu0 }
 0x1b5   : > { %v4160_v20 = vpop.f32.mrf.mxu1  ;;  %v4170_v47 = vadd.f32 %v2911_v48, %v4059_v54 }
 0x1b6   : > { %v2913_v39 = vpop.f32.mrf.mxu0 }
 0x1b7   : > { %v4165_v31 = vpop.f32.mrf.mxu1  ;;  %4370 = vst [vmem:[#allocation9_spill] sm:$0xff] %v4170_v47  ;;  %v2914_v12 = vadd.f32 %v2913_v39, %v2912_v57 }
 0x1b8   : > { %v2915_v26 = vpop.f32.mrf.mxu0 }
 0x1b9   : > { %v4167_v61 = vpop.f32.mrf.mxu1  ;;  %v4177_v37 = vadd.f32 %v2914_v12, %v4065_v3 }
 0x1ba   : > { %v2916_v0 = vpop.f32.mrf.mxu0 }
 0x1bb   : > { %v4172_v5 = vpop.f32.mrf.mxu1  ;;  %4371 = vst [vmem:[#allocation10_spill] sm:$0xff] %v4177_v37  ;;  %v2917_v58 = vadd.f32 %v2916_v0, %v2915_v26 }
 0x1bc   : > { %v2918_v25 = vpop.f32.mrf.mxu0 }
 0x1bd   : > { %v4174_v18 = vpop.f32.mrf.mxu1  ;;  %v4184_v54 = vadd.f32 %v2917_v58, %v4071_v8 }
 0x1be   : > { %v2919_v48 = vpop.f32.mrf.mxu0 }
 0x1bf   : > { %v4179_v32 = vpop.f32.mrf.mxu1  ;;  %4372 = vst [vmem:[#allocation11_spill] sm:$0xff] %v4184_v54  ;;  %v2920_v57 = vadd.f32 %v2919_v48, %v2918_v25  ;;  %v2954_v25 = vadd.f32 %v4116_v34, %v4111_v46 }
 0x1c0   : > { %v2921_v39 = vpop.f32.mrf.mxu0 }
 0x1c1   : > { %v4181_v21 = vpop.f32.mrf.mxu1  ;;  %v4191_v3 = vadd.f32 %v2920_v57, %v4077_v33 }
 0x1c2   : > { %v2922_v12 = vpop.f32.mrf.mxu0 }
 0x1c3   : > { %v4186_v47 = vpop.f32.mrf.mxu1  ;;  %4373 = vst [vmem:[#allocation12_spill] sm:$0xff] %v4191_v3  ;;  %v2923_v26 = vadd.f32 %v2922_v12, %v2921_v39  ;;  %v2948_v39 = vadd.f32 %v4102_v43, %v4094_v7  ;;  %v2951_v7 = vadd.f32 %v4109_v41, %v4104_v6 }
 0x1c4   : > { %v2924_v0 = vpop.f32.mrf.mxu0 }
 0x1c5   : > { %v4188_v22 = vpop.f32.mrf.mxu1  ;;  %v4198_v8 = vadd.f32 %v2923_v26, %v4083_v28  ;;  %v2957_v28 = vadd.f32 %v4123_v55, %v4118_v9  ;;  %v1996_v41 = vadd.f32 %v2951_v7, %v4014_v11 }
 0x1c6   : > { %v2925_v58 = vpop.f32.mrf.mxu0 }
 0x1c7   : > { %v4193_v37 = vpop.f32.mrf.mxu1  ;;  %4374 = vst [vmem:[#allocation13_spill] sm:$0xff] %v4198_v8  ;;  %v2926_v48 = vadd.f32 %v2925_v58, %v2924_v0  ;;  %v2001_v8 = vadd.f32 %v2954_v25, %v4020_v62  ;;  %v1993_v62 = vadd.f32 %v2948_v39, %v4008_v45  ;;  %v2004_v58 = vadd.f32 %v2957_v28, %v4026_v16 }
 0x1c8   : > { %v2927_v33 = vpop.f32.mrf.mxu0  ;;  %v2960_v45 = vadd.f32 %v4130_v2, %v4125_v49  ;;  %v2963_v49 = vadd.f32 %v4137_v27, %v4132_v29  ;;  %v2978_v2 = vadd.f32 %v4172_v5, %v4167_v61 }
 0x1c9   : > { %v4195_v38 = vpop.f32.mrf.mxu1  ;;  %v4209_v12 = vadd.f32 %v2926_v48, %v4089_v40 }
 0x1ca   : > { %v2928_v3 = vpop.f32.mrf.mxu0 }
 0x1cb   : > { %v4200_v54 = vpop.f32.mrf.mxu1  ;;  %v2929_v26 = vadd.f32 %v2928_v3, %v2927_v33  ;;  %v2966_v3 = vadd.f32 %v4144_v53, %v4139_v59  ;;  %v2969_v59 = vadd.f32 %v4151_v1, %v4146_v17 }
 0x1cc   : > { %v3084_v40 = vpop.f32.mrf.mxu0 }
 0x1cd   : > { %v4204_v57 = vpop.f32.mrf.mxu1  ;;  %v4228_v43 = vadd.f32 %v2929_v26, %v4097_v24  ;;  %v2162_v34 = vadd.f32 %v3084_v40, %v2001_v8  ;;  %v2017_v16 = vadd.f32 %v2966_v3, %v4044_v42  ;;  %v2009_v42 = vadd.f32 %v2960_v45, %v4032_v23 }
 0x1ce   : > { %v2153_v55 = vpop.f32.mrf.mxu0  ;;  %v2020_v3 = vadd.f32 %v2969_v59, %v4050_v56  ;;  %v2033_v56 = vadd.f32 %v2978_v2, %v4068_v36 }
 0x1cf   : > { %v4211_v52 = vpop.f32.mrf.mxu1  ;;  %2282 = vst [vmem:[%s4223_s24 + $0x10] sm:$0xff] %v2162_v34  ;;  %v2154_v0 = vadd.f32 %v2153_v55, %v1993_v62  ;;  %v2352_v7 = vmul.f32 %v2162_v34, %v2162_v34 }
 0x1d0   : > { %v3085_v6 = vpop.f32.mrf.mxu0 }
 0x1d1   : > { %v4216_v46 = vpop.f32.mrf.mxu1  ;;  %2280 = vst [vmem:[%s4223_s24] sm:$0xff] %v2154_v0  ;;  %v2165_v24 = vadd.f32 %v3085_v6, %v2004_v58  ;;  %v2350_v28 = vmul.f32 %v2154_v0, %v2154_v0 }
 0x1d2   : > { %v2156_v48 = vpop.f32.mrf.mxu0 }
 0x1d3   : > { %v4231_v9 = vpop.f32.mrf.mxu1  ;;  %2283 = vst [vmem:[%s4223_s24 + $0x18] sm:$0xff] %v2165_v24  ;;  %v2157_v53 = vadd.f32 %v2156_v48, %v1996_v41  ;;  %v2353_v61 = vmul.f32 %v2165_v24, %v2165_v24 }
 0x1d4   : > { %v3088_v39 = vpop.f32.mrf.mxu0 }
 0x1d5   : > { %v4237_v25 = vpop.f32.mrf.mxu1  ;;  %2281 = vst [vmem:[%s4223_s24 + $0x8] sm:$0xff] %v2157_v53  ;;  %v2312_v11 = vadd.f32 %v2157_v53, %v2154_v0  ;;  %v2351_v26 = vmul.f32 %v2157_v53, %v2157_v53  ;;  %v2178_v40 = vadd.f32 %v3088_v39, %v2017_v16  ;;  %v2972_v0 = vadd.f32 %v4158_v35, %v4153_v14 }
 0x1d6   : > { %v2169_v1 = vpop.f32.mrf.mxu0  ;;  %v2981_v14 = vadd.f32 %v4179_v32, %v4174_v18  ;;  %v2975_v39 = vadd.f32 %v4165_v31, %v4160_v20 }
 0x1d7   : > { %v4243_v8 = vpop.f32.mrf.mxu1  ;;  %v2313_v62 = vadd.f32 %v2312_v11, %v2162_v34  ;;  %v2382_v55 = vadd.f32 %v2351_v26, %v2350_v28  ;;  %2286 = vst [vmem:[%s4223_s24 + $0x30] sm:$0xff] %v2178_v40  ;;  %v2170_v58 = vadd.f32 %v2169_v1, %v2009_v42  ;;  %v2012_v34 = vadd.f32 %v2963_v49, %v4038_v51 }
 0x1d8   : > { %v3089_v27 = vpop.f32.mrf.mxu0  ;;  %v2025_v11 = vadd.f32 %v2972_v0, %v4056_v13  ;;  %v2990_v49 = vadd.f32 %v4200_v54, %v4195_v38  ;;  %v2036_v42 = vadd.f32 %v2981_v14, %v4074_v44  ;;  %v2356_v20 = vmul.f32 %v2178_v40, %v2178_v40 }
 0x1d9   : > { %v4249_v33 = vpop.f32.mrf.mxu1  ;;  %v2383_v5 = vadd.f32 %v2382_v55, %v2352_v7  ;;  %v2314_v6 = vadd.f32 %v2313_v62, %v2165_v24  ;;  %v2181_v41 = vadd.f32 %v3089_v27, %v2020_v3  ;;  %2284 = vst [vmem:[%s4223_s24 + $0x20] sm:$0xff] %v2170_v58  ;;  %v2354_v48 = vmul.f32 %v2170_v58, %v2170_v58 }
 0x1da   : > { %v2172_v45 = vpop.f32.mrf.mxu0  ;;  %v2984_v62 = vadd.f32 %v4186_v47, %v4181_v21  ;;  %v2028_v3 = vadd.f32 %v2975_v39, %v4062_v30 }
 0x1db   : > { %v4256_v17 = vpop.f32.mrf.mxu1  ;;  %v2315_v35 = vadd.f32 %v2314_v6, %v2170_v58  ;;  %v2384_v59 = vadd.f32 %v2383_v5, %v2353_v61  ;;  %2287 = vst [vmem:[%s4223_s24 + $0x38] sm:$0xff] %v2181_v41  ;;  %v2173_v53 = vadd.f32 %v2172_v45, %v2012_v34  ;;  %v2357_v38 = vmul.f32 %v2181_v41, %v2181_v41 }
 0x1dc   : > { %v3092_v16 = vpop.f32.mrf.mxu0  ;;  %v2049_v61 = vadd.f32 %v2990_v49, %v4092_v10  ;;  %v2987_v34 = vadd.f32 %v4193_v37, %v4188_v22  ;;  %v3002_v10 = vadd.f32 %v4256_v17, %v4249_v33 }
 0x1dd   : > { %v4263_v29 = vpop.f32.mrf.mxu1  ;;  %v2385_v28 = vadd.f32 %v2384_v59, %v2354_v48  ;;  %v2194_v51 = vadd.f32 %v3092_v16, %v2033_v56  ;;  %2285 = vst [vmem:[%s4223_s24 + $0x28] sm:$0xff] %v2173_v53  ;;  %v2316_v36 = vadd.f32 %v2315_v35, %v2173_v53  ;;  %v2355_v18 = vmul.f32 %v2173_v53, %v2173_v53 }
 0x1de   : > { %v2185_v26 = vpop.f32.mrf.mxu0  ;;  %v2041_v56 = vadd.f32 %v2984_v62, %v4080_v19  ;;  %v2996_v19 = vadd.f32 %v4231_v9, %v4216_v46  ;;  %v2065_v49 = vadd.f32 %v3002_v10, %v4121_v15 }
 0x1df   : > { %v4266_v23 = vpop.f32.mrf.mxu1  ;;  %2290 = vst [vmem:[%s4223_s24 + $0x50] sm:$0xff] %v2194_v51  ;;  %v2186_v2 = vadd.f32 %v2185_v26, %v2025_v11  ;;  %v2317_v31 = vadd.f32 %v2316_v36, %v2178_v40  ;;  %v2386_v1 = vadd.f32 %v2385_v28, %v2355_v18  ;;  %v2993_v40 = vadd.f32 %v4211_v52, %v4204_v57 }
 0x1e0   : > { %v3093_v13 = vpop.f32.mrf.mxu0  ;;  %v2360_v53 = vmul.f32 %v2194_v51, %v2194_v51  ;;  %v2044_v11 = vadd.f32 %v2987_v34, %v4086_v4  ;;  %v2999_v4 = vadd.f32 %v4243_v8, %v4237_v25 }
 0x1e1   : > { %v4273_v24 = vpop.f32.mrf.mxu1  ;;  %2288 = vst [vmem:[%s4223_s24 + $0x40] sm:$0xff] %v2186_v2  ;;  %v2197_v55 = vadd.f32 %v3093_v13, %v2036_v42  ;;  %v2387_v54 = vadd.f32 %v2386_v1, %v2356_v20  ;;  %v2318_v0 = vadd.f32 %v2317_v31, %v2181_v41  ;;  %v2358_v47 = vmul.f32 %v2186_v2, %v2186_v2 }
 0x1e2   : > { %v2188_v44 = vpop.f32.mrf.mxu0  ;;  %v2052_v59 = vadd.f32 %v2993_v40, %v4100_v63  ;;  %v3005_v63 = vadd.f32 %v4266_v23, %v4263_v29  ;;  %v2057_v13 = vadd.f32 %v2996_v19, %v4107_v60 }
 0x1e3   : > { %v4279_v32 = vpop.f32.mrf.mxu1  ;;  %2291 = vst [vmem:[%s4223_s24 + $0x58] sm:$0xff] %v2197_v55  ;;  %v2189_v27 = vadd.f32 %v2188_v44, %v2028_v3  ;;  %v2319_v21 = vadd.f32 %v2318_v0, %v2186_v2  ;;  %v2388_v5 = vadd.f32 %v2387_v54, %v2357_v38  ;;  %v2361_v36 = vmul.f32 %v2197_v55, %v2197_v55 }
 0x1e4   : > { %v3096_v30 = vpop.f32.mrf.mxu0  ;;  %v2068_v38 = vadd.f32 %v3005_v63, %v4128_v50  ;;  %v3008_v40 = vadd.f32 %v4279_v32, %v4273_v24  ;;  %v4379_v63 = vld [vmem:[#allocation5_spill] sm:$0xff] }
 0x1e5   : > { %v4285_v7 = vpop.f32.mrf.mxu1  ;;  %2289 = vst [vmem:[%s4223_s24 + $0x48] sm:$0xff] %v2189_v27  ;;  %v2359_v41 = vmul.f32 %v2189_v27, %v2189_v27  ;;  %v2210_v45 = vadd.f32 %v3096_v30, %v2049_v61  ;;  %v2389_v52 = vadd.f32 %v2388_v5, %v2358_v47  ;;  %v2320_v57 = vadd.f32 %v2319_v21, %v2189_v27  ;;  %v4375_v27 = vld [vmem:[#allocation3_spill] sm:$0xff] }
 0x1e6   : > { %v2201_v35 = vpop.f32.mrf.mxu0  ;;  %v2060_v61 = vadd.f32 %v2999_v4, %v4375_v27 }
 0x1e7   : > { %v4291_v58 = vpop.f32.mrf.mxu1  ;;  %2294 = vst [vmem:[%s4223_s24 + $0x70] sm:$0xff] %v2210_v45  ;;  %v2202_v48 = vadd.f32 %v2201_v35, %v2041_v56  ;;  %v2321_v22 = vadd.f32 %v2320_v57, %v2194_v51  ;;  %v2390_v37 = vadd.f32 %v2389_v52, %v2359_v41  ;;  %v2364_v54 = vmul.f32 %v2210_v45, %v2210_v45  ;;  %v4376_v41 = vld [vmem:[#allocation6_spill] sm:$0xff] }
 0x1e8   : > { %v3097_v39 = vpop.f32.mrf.mxu0 }
 0x1e9   : > { %v3012_v6 = vpop.f32.mrf.mxu1  ;;  %2292 = vst [vmem:[%s4223_s24 + $0x60] sm:$0xff] %v2202_v48  ;;  %v2213_v28 = vadd.f32 %v3097_v39, %v2052_v59  ;;  %v2391_v33 = vadd.f32 %v2390_v37, %v2360_v53  ;;  %v2322_v17 = vadd.f32 %v2321_v22, %v2197_v55  ;;  %v2362_v46 = vmul.f32 %v2202_v48, %v2202_v48 }
 0x1ea   : > { %v2204_v26 = vpop.f32.mrf.mxu0 }
 0x1eb   : > { %v3013_v14 = vpop.f32.mrf.mxu1  ;;  %2295 = vst [vmem:[%s4223_s24 + $0x78] sm:$0xff] %v2213_v28  ;;  %v2205_v51 = vadd.f32 %v2204_v26, %v2044_v11  ;;  %v2323_v2 = vadd.f32 %v2322_v17, %v2202_v48  ;;  %v2392_v9 = vadd.f32 %v2391_v33, %v2361_v36  ;;  %v2365_v21 = vmul.f32 %v2213_v28, %v2213_v28  ;;  %v4377_v48 = vld [vmem:[#allocation4_spill] sm:$0xff] }
 0x1ec   : > { %v3100_v20 = vpop.f32.mrf.mxu0  ;;  %v3014_v15 = vadd.f32 %v3013_v14, %v3012_v6  ;;  %v3011_v14 = vadd.f32 %v4291_v58, %v4285_v7  ;;  %v2073_v59 = vadd.f32 %v3008_v40, %v4377_v48 }
 0x1ed   : > { %v3015_v16 = vpop.f32.mrf.mxu1  ;;  %2293 = vst [vmem:[%s4223_s24 + $0x68] sm:$0xff] %v2205_v51  ;;  %v2363_v31 = vmul.f32 %v2205_v51, %v2205_v51  ;;  %v2226_v1 = vadd.f32 %v3100_v20, %v2065_v49  ;;  %v2393_v29 = vadd.f32 %v2392_v9, %v2362_v46  ;;  %v2324_v23 = vadd.f32 %v2323_v2, %v2205_v51 }
 0x1ee   : > { %v2217_v55 = vpop.f32.mrf.mxu0  ;;  %v2076_v51 = vadd.f32 %v3011_v14, %v4379_v63 }
 0x1ef   : > { %v3016_v18 = vpop.f32.mrf.mxu1  ;;  %2298 = vst [vmem:[%s4223_s24 + $0x90] sm:$0xff] %v2226_v1  ;;  %v2218_v3 = vadd.f32 %v2217_v55, %v2057_v13  ;;  %v2325_v0 = vadd.f32 %v2324_v23, %v2210_v45  ;;  %v2394_v44 = vadd.f32 %v2393_v29, %v2363_v31  ;;  %v2081_v45 = vadd.f32 %v3014_v15, %v4376_v41  ;;  %v4380_v13 = vld [vmem:[#allocation10_spill] sm:$0xff]  ;;  %v4383_v41 = vld [vmem:[#allocation9_spill] sm:$0xff] }
 0x1f0   : > { %v3101_v8 = vpop.f32.mrf.mxu0  ;;  %v3017_v50 = vadd.f32 %v3016_v18, %v3015_v16  ;;  %v2368_v36 = vmul.f32 %v2226_v1, %v2226_v1 }
 0x1f1   : > { %v3018_v42 = vpop.f32.mrf.mxu1  ;;  %2296 = vst [vmem:[%s4223_s24 + $0x80] sm:$0xff] %v2218_v3  ;;  %v2229_v60 = vadd.f32 %v3101_v8, %v2068_v38  ;;  %v2395_v47 = vadd.f32 %v2394_v44, %v2364_v54  ;;  %v2326_v5 = vadd.f32 %v2325_v0, %v2213_v28  ;;  %v2366_v52 = vmul.f32 %v2218_v3, %v2218_v3  ;;  %v4378_v28 = vld [vmem:[#allocation7_spill] sm:$0xff]  ;;  %v4381_v54 = vld [vmem:[#allocation8_spill] sm:$0xff] }
 0x1f2   : > { %v2220_v30 = vpop.f32.mrf.mxu0  ;;  %v2084_v11 = vadd.f32 %v3017_v50, %v4378_v28 }
 0x1f3   : > { %v3019_v62 = vpop.f32.mrf.mxu1  ;;  %2299 = vst [vmem:[%s4223_s24 + $0x98] sm:$0xff] %v2229_v60  ;;  %v2221_v34 = vadd.f32 %v2220_v30, %v2060_v61  ;;  %v2327_v56 = vadd.f32 %v2326_v5, %v2218_v3  ;;  %v2396_v57 = vadd.f32 %v2395_v47, %v2365_v21  ;;  %v2369_v49 = vmul.f32 %v2229_v60, %v2229_v60  ;;  %v4382_v61 = vld [vmem:[#allocation11_spill] sm:$0xff] }
 0x1f4   : > { %v3104_v32 = vpop.f32.mrf.mxu0  ;;  %v3020_v18 = vadd.f32 %v3019_v62, %v3018_v42 }
 0x1f5   : > { %v3021_v25 = vpop.f32.mrf.mxu1  ;;  %2297 = vst [vmem:[%s4223_s24 + $0x88] sm:$0xff] %v2221_v34  ;;  %v2367_v35 = vmul.f32 %v2221_v34, %v2221_v34  ;;  %v2242_v10 = vadd.f32 %v3104_v32, %v2081_v45  ;;  %v2397_v53 = vadd.f32 %v2396_v57, %v2366_v52  ;;  %v2328_v22 = vadd.f32 %v2327_v56, %v2221_v34 }
 0x1f6   : > { %v2233_v16 = vpop.f32.mrf.mxu0  ;;  %v2089_v0 = vadd.f32 %v3020_v18, %v4381_v54 }
 0x1f7   : > { %v3022_v6 = vpop.f32.mrf.mxu1  ;;  %2302 = vst [vmem:[%s4223_s24 + $0xb0] sm:$0xff] %v2242_v10  ;;  %v2234_v19 = vadd.f32 %v2233_v16, %v2073_v59  ;;  %v2329_v33 = vadd.f32 %v2328_v22, %v2226_v1  ;;  %v2398_v17 = vadd.f32 %v2397_v53, %v2367_v35  ;;  %v2372_v47 = vmul.f32 %v2242_v10, %v2242_v10  ;;  %v4384_v16 = vld [vmem:[#allocation12_spill] sm:$0xff] }
 0x1f8   : > { %v3105_v58 = vpop.f32.mrf.mxu0  ;;  %v3023_v15 = vadd.f32 %v3022_v6, %v3021_v25 }
 0x1f9   : > { %v3024_v24 = vpop.f32.mrf.mxu1  ;;  %2300 = vst [vmem:[%s4223_s24 + $0xa0] sm:$0xff] %v2234_v19  ;;  %v2245_v26 = vadd.f32 %v3105_v58, %v2084_v11  ;;  %v2399_v2 = vadd.f32 %v2398_v17, %v2368_v36  ;;  %v2330_v46 = vadd.f32 %v2329_v33, %v2229_v60  ;;  %v2370_v23 = vmul.f32 %v2234_v19, %v2234_v19 }
 0x1fa   : > { %v2236_v20 = vpop.f32.mrf.mxu0  ;;  %v2092_v45 = vadd.f32 %v3023_v15, %v4383_v41 }
 0x1fb   : > { %v3025_v37 = vpop.f32.mrf.mxu1  ;;  %2303 = vst [vmem:[%s4223_s24 + $0xb8] sm:$0xff] %v2245_v26  ;;  %v2237_v31 = vadd.f32 %v2236_v20, %v2076_v51  ;;  %v2331_v29 = vadd.f32 %v2330_v46, %v2234_v19  ;;  %v2400_v55 = vadd.f32 %v2399_v2, %v2369_v49  ;;  %v2373_v56 = vmul.f32 %v2245_v26, %v2245_v26  ;;  %v4385_v49 = vld [vmem:[#allocation13_spill] sm:$0xff] }
 0x1fc   : > { %v3026_v39 = vadd.f32 %v3025_v37, %v3024_v24  ;;  %v3108_v62 = vpop.f32.mrf.mxu0 }
 0x1fd   : > { %v3027_v7 = vpop.f32.mrf.mxu1  ;;  %2301 = vst [vmem:[%s4223_s24 + $0xa8] sm:$0xff] %v2237_v31  ;;  %v2371_v3 = vmul.f32 %v2237_v31, %v2237_v31  ;;  %v2401_v44 = vadd.f32 %v2400_v55, %v2370_v23  ;;  %v2332_v8 = vadd.f32 %v2331_v29, %v2237_v31 }
 0x1fe   : > { %v2097_v1 = vadd.f32 %v3026_v39, %v4380_v13  ;;  %v2249_v60 = vpop.f32.mrf.mxu0 }
 0x1ff   : > { %v3028_v9 = vpop.f32.mrf.mxu1  ;;  %v2250_v27 = vadd.f32 %v2249_v60, %v2089_v0  ;;  %v2333_v5 = vadd.f32 %v2332_v8, %v2242_v10  ;;  %v2402_v30 = vadd.f32 %v2401_v44, %v2371_v3 }
 0x200   : > { %v3029_v4 = vadd.f32 %v3028_v9, %v3027_v7  ;;  %v2258_v38 = vadd.f32 %v3108_v62, %v2097_v1  ;;  %v3109_v25 = vpop.f32.mrf.mxu0 }
 0x201   : > { %v3030_v42 = vpop.f32.mrf.mxu1  ;;  %2304 = vst [vmem:[%s4223_s24 + $0xc0] sm:$0xff] %v2250_v27  ;;  %v2403_v52 = vadd.f32 %v2402_v30, %v2372_v47  ;;  %v2334_v57 = vadd.f32 %v2333_v5, %v2245_v26  ;;  %v2374_v48 = vmul.f32 %v2250_v27, %v2250_v27 }
 0x202   : > { %2306 = vst [vmem:[%s4223_s24 + $0xd0] sm:$0xff] %v2258_v38  ;;  %v2100_v21 = vadd.f32 %v3029_v4, %v4382_v61  ;;  %v2252_v32 = vpop.f32.mrf.mxu0  ;;  %v2376_v7 = vmul.f32 %v2258_v38, %v2258_v38 }
 0x203   : > { %v3031_v40 = vpop.f32.mrf.mxu1  ;;  %v2253_v14 = vadd.f32 %v2252_v32, %v2092_v45  ;;  %v2335_v35 = vadd.f32 %v2334_v57, %v2250_v27  ;;  %v2404_v59 = vadd.f32 %v2403_v52, %v2373_v56 }
 0x204   : > { %v3032_v6 = vadd.f32 %v3031_v40, %v3030_v42  ;;  %v2261_v34 = vadd.f32 %v3109_v25, %v2100_v21  ;;  %v3112_v53 = vpop.f32.mrf.mxu0 }
 0x205   : > { %v3033_v50 = vpop.f32.mrf.mxu1  ;;  %2305 = vst [vmem:[%s4223_s24 + $0xc8] sm:$0xff] %v2253_v14  ;;  %v2375_v37 = vmul.f32 %v2253_v14, %v2253_v14  ;;  %v2405_v19 = vadd.f32 %v2404_v59, %v2374_v48  ;;  %v2336_v28 = vadd.f32 %v2335_v35, %v2253_v14 }
 0x206   : > { %2307 = vst [vmem:[%s4223_s24 + $0xd8] sm:$0xff] %v2261_v34  ;;  %v2105_v39 = vadd.f32 %v3032_v6, %v4384_v16  ;;  %v2265_v36 = vpop.f32.mrf.mxu0  ;;  %v2377_v46 = vmul.f32 %v2261_v34, %v2261_v34 }
 0x207   : > { %v3034_v24 = vpop.f32.mrf.mxu1  ;;  %v2337_v58 = vadd.f32 %v2336_v28, %v2258_v38  ;;  %v2406_v18 = vadd.f32 %v2405_v19, %v2375_v37 }
 0x208   : > { %v3035_v22 = vadd.f32 %v3034_v24, %v3033_v50  ;;  %v2266_v17 = vadd.f32 %v2265_v36, %v2105_v39  ;;  %v3113_v63 = vpop.f32.mrf.mxu0 }
 0x209   : > { %v3036_v10 = vpop.f32.mrf.mxu1  ;;  %v2407_v9 = vadd.f32 %v2406_v18, %v2376_v7  ;;  %v2338_v20 = vadd.f32 %v2337_v58, %v2261_v34 }
 0x20a   : > { %2308 = vst [vmem:[%s4223_s24 + $0xe0] sm:$0xff] %v2266_v17  ;;  %v2108_v2 = vadd.f32 %v3035_v22, %v4385_v49  ;;  %v2268_v31 = vpop.f32.mrf.mxu0  ;;  %v2378_v55 = vmul.f32 %v2266_v17, %v2266_v17 }
 0x20b   : > { %v3037_v11 = vpop.f32.mrf.mxu1  ;;  %v2339_v23 = vadd.f32 %v2338_v20, %v2266_v17  ;;  %v2408_v42 = vadd.f32 %v2407_v9, %v2377_v46 }
 0x20c   : > { %v3038_v33 = vadd.f32 %v3037_v11, %v3036_v10  ;;  %v2269_v29 = vadd.f32 %v2268_v31, %v2108_v2 }
 0x20d   : > { %v3039_v26 = vpop.f32.mrf.mxu1  ;;  %v2409_v15 = vadd.f32 %v2408_v42, %v2378_v55 }
 0x20e   : > { %v2113_v51 = vadd.f32 %v3038_v33, %v4209_v12  ;;  %2309 = vst [vmem:[%s4223_s24 + $0xe8] sm:$0xff] %v2269_v29  ;;  %v2379_v12 = vmul.f32 %v2269_v29, %v2269_v29  ;;  %v2340_v3 = vadd.f32 %v2339_v23, %v2269_v29 }
 0x20f   : > { %v3040_v4 = vpop.f32.mrf.mxu1 }
 0x210   : > { %v2274_v13 = vadd.f32 %v3112_v53, %v2113_v51  ;;  %v3041_v1 = vadd.f32 %v3040_v4, %v3039_v26  ;;  %v2410_v44 = vadd.f32 %v2409_v15, %v2379_v12 }
 0x212   : > { %2310 = vst [vmem:[%s4223_s24 + $0xf0] sm:$0xff] %v2274_v13  ;;  %v2116_v62 = vadd.f32 %v3041_v1, %v4228_v43  ;;  %v2380_v54 = vmul.f32 %v2274_v13, %v2274_v13  ;;  %v2341_v0 = vadd.f32 %v2340_v3, %v2274_v13 }
 0x214   : > { %v2277_v38 = vadd.f32 %v3113_v63, %v2116_v62  ;;  %v2411_v60 = vadd.f32 %v2410_v44, %v2380_v54 }
 0x216   : > { %2311 = vst [vmem:[%s4223_s24 + $0xf8] sm:$0xff] %v2277_v38  ;;  %v2381_v8 = vmul.f32 %v2277_v38, %v2277_v38  ;;  %v2342_v40 = vadd.f32 %v2341_v0, %v2277_v38 }
 0x218   : > { %v2343_v27 = vrot.slane %v2342_v40, 4  ;;  %v2412_v61 = vadd.f32 %v2411_v60, %v2381_v8 }
 0x21a   : > { %v2344_v21 = vadd.f32 %v2343_v27, %v2342_v40  ;;  %v2413_v47 = vrot.slane %v2412_v61, 4 }
 0x21c   : > { %v2345_v5 = vrot.slane %v2344_v21, 2  ;;  %v2414_v30 = vadd.f32 %v2413_v47, %v2412_v61 }
 0x21e   : > { %v2346_v43 = vadd.f32 %v2345_v5, %v2344_v21  ;;  %v2415_v50 = vrot.slane %v2414_v30, 2 }
 0x220   : > { %v2347_v25 = vrot.slane %v2346_v43, 1  ;;  %v2416_v6 = vadd.f32 %v2415_v50, %v2414_v30 }
 0x222   : > { %v2348_v34 = vadd.f32 %v2347_v25, %v2346_v43  ;;  %v2417_v41 = vrot.slane %v2416_v6, 1 }
 0x224   : > { %2349 = vst [vmem:[%s235_s27] sm:$0x1] %v2348_v34  ;;  %v2418_v45 = vadd.f32 %v2417_v41, %v2416_v6 }
 0x226   : > { %2419 = vst [vmem:[%s235_s27 + $0x1] sm:$0x1] %v2418_v45 }
 0x227 PF: > { %s16_s18 = sadd.s32 1, %s3218_s18  }
 0x228   : > { %p13_p4 = scmp.ge.s32.totalorder %s16_s18, 4  }
 0x22a   :  { %15 = sbr.rel (!%p13_p4) target bundleno = 1 (0x1), region = 80 }

</bundles_post_ra>
